<compile_context>
chip_gen: v7x
topology: tpu7x:2x2x1
jax: 0.10.0
libtpu: 0.0.40
codegen_flags: <defaults>
</compile_context>

<pallas_src>
import functools
import math

import jax
import jax.numpy as jnp
from jax.experimental import pallas as pl
from jax.experimental.pallas import tpu as pltpu


# ---------------------------------------------------------------------------
# Fused forward kernel
# ---------------------------------------------------------------------------
def _make_kernel(n_layers, T, B, H):
    H2, H3, H4, H8 = 2 * H, 3 * H, 4 * H, 8 * H
    scale = 1.0 / math.sqrt(float(H2))   # d_k = 2H (query feature dim)

    def kernel(*refs):
        n_in = 8 + 3 * n_layers
        (vector_ref, pssm_ref, ext_w_ref, ext_b_ref,
         emb_w_ref, emb_b_ref, fc_w_ref, fc_b_ref) = refs[:8]
        lstm_refs = refs[8:n_in]
        logits_ref, attn_ref = refs[n_in], refs[n_in + 1]
        gi_scr, hsf_scr, hsb_scr = refs[n_in + 2], refs[n_in + 3], refs[n_in + 4]

        f32 = jnp.float32

        # ---- extractor: initial hidden/cell state, shared by every (layer, direction) ----
        feature = (jnp.dot(vector_ref[...], ext_w_ref[...], preferred_element_type=f32)
                   + ext_b_ref[...])                                     # (B, H)

        # ---- PSSM embedding: folded Conv1d+BatchNorm, time-major rows (row = t*B + b) ----
        x_flat = (jnp.dot(pssm_ref[...], emb_w_ref[...], preferred_element_type=f32)
                  + emb_b_ref[...])                                      # (T*B, E)

        # lane mask selecting the 'g' gate block inside a (B, 4H) gate tile (i, f, g, o order)
        lane = jax.lax.broadcasted_iota(jnp.int32, (B, H4), 1)
        g_mask = (lane >= H2) & (lane < H3)

        # ------------------------- bidirectional LSTM layers -------------------------
        for l in range(n_layers):
            wih_ref = lstm_refs[3 * l]        # (In_l, 8H)  [fwd gates | bwd gates]
            whh_ref = lstm_refs[3 * l + 1]    # (2, H, 4H)
            b_ref = lstm_refs[3 * l + 2]      # (1, 8H)     (b_ih + b_hh per direction)

            # Hoisted input projection for BOTH directions: one wide matmul outside the loop.
            if l == 0:
                gi = jnp.dot(x_flat, wih_ref[...], preferred_element_type=f32)
            else:
                gi = (jnp.dot(hsf_scr[...], wih_ref[0:H, :], preferred_element_type=f32)
                      + jnp.dot(hsb_scr[...], wih_ref[H:H2, :], preferred_element_type=f32))
            gi_scr[...] = gi + b_ref[...]                                # (T*B, 8H)

            whh_f = whh_ref[0]                                           # (H, 4H)
            whh_b = whh_ref[1]

            def step(t, carry):
                h_f, c_f, h_b, c_b = carry
                # ---- forward direction, time t ----
                gin_f = gi_scr[pl.ds(t * B, B), :]                       # (B, 8H)
                gates_f = gin_f[:, 0:H4] + jnp.dot(h_f, whh_f, preferred_element_type=f32)
                act_f = jnp.where(g_mask, jnp.tanh(gates_f), jax.nn.sigmoid(gates_f))
                c_f = act_f[:, H:H2] * c_f + act_f[:, 0:H] * act_f[:, H2:H3]
                h_f = act_f[:, H3:H4] * jnp.tanh(c_f)
                hsf_scr[pl.ds(t * B, B), :] = h_f
                # ---- backward direction, time T-1-t (index-reversed access, no flips) ----
                s = T - 1 - t
                gin_b = gi_scr[pl.ds(s * B, B), :]
                gates_b = gin_b[:, H4:H8] + jnp.dot(h_b, whh_b, preferred_element_type=f32)
                act_b = jnp.where(g_mask, jnp.tanh(gates_b), jax.nn.sigmoid(gates_b))
                c_b = act_b[:, H:H2] * c_b + act_b[:, 0:H] * act_b[:, H2:H3]
                h_b = act_b[:, H3:H4] * jnp.tanh(c_b)
                hsb_scr[pl.ds(s * B, B), :] = h_b
                return (h_f, c_f, h_b, c_b)

            jax.lax.fori_loop(0, T, step, (feature, feature, feature, feature), unroll=True)
            # inter-layer dropout(0.1) is identity in eval mode

        # ------------------- self-attention (query == output) + classifier -------------------
        hs_f = hsf_scr[...].reshape(T, B, H)                             # row t*B+b -> [t, b, :]
        hs_b = hsb_scr[...].reshape(T, B, H)
        fc_w = fc_w_ref[...]                                             # (2H, 2)
        fc_b = fc_b_ref[...]                                             # (1, 2)
        dn = (((1,), (1,)), ((), ()))                                    # A @ B^T
        for b in range(B):
            xf = hs_f[:, b, :]                                           # (T, H) fwd features
            xb = hs_b[:, b, :]                                           # (T, H) bwd features
            # <out_t, out_s> decomposes over the fwd/bwd halves of the concatenated feature.
            scores = (jax.lax.dot_general(xf, xf, dn, preferred_element_type=f32)
                      + jax.lax.dot_general(xb, xb, dn, preferred_element_type=f32)) * scale
            m = jnp.max(scores, axis=-1, keepdims=True)
            e = jnp.exp(scores - m)
            p = e * pl.reciprocal(jnp.sum(e, axis=-1, keepdims=True), approx=True)
            attn_ref[b] = p                                              # (T, T)
            # context = (softmax @ out).sum(seq) == colsum(p) @ out  (split over fwd/bwd halves)
            w_row = jnp.sum(p, axis=0, keepdims=True)                    # (1, T)
            ctx_f = jnp.dot(w_row, xf, preferred_element_type=f32)       # (1, H)
            ctx_b = jnp.dot(w_row, xb, preferred_element_type=f32)       # (1, H)
            logits_b = (jnp.dot(ctx_f, fc_w[0:H, :], preferred_element_type=f32)
                        + jnp.dot(ctx_b, fc_w[H:H2, :], preferred_element_type=f32)
                        + fc_b)                                          # (1, 2)
            logits_ref[pl.ds(b, 1), :] = logits_b

    return kernel


# ---------------------------------------------------------------------------
# Wrapper
# ---------------------------------------------------------------------------
def forward(vector, pssm, params, n_layers):
    B, T, _ = pssm.shape
    H = params["extractor_w"].shape[1]
    E = params["emb_w"].shape[1]

    # time-major flattened PSSM rows (row = t*B + b); cheap XLA reshuffle outside the kernel.
    pssm_tm = jnp.transpose(pssm, (1, 0, 2)).reshape(T * B, 20)

    inputs = [vector, pssm_tm,
              params["extractor_w"], params["extractor_b"],
              params["emb_w"], params["emb_b"],
              params["fc_w"], params["fc_b"]]
    for lyr in params["lstm"]:
        inputs += [lyr["wih"], lyr["whh"], lyr["b"]]

    def full_spec(shape):
        zeros = (0,) * len(shape)
        return pl.BlockSpec(tuple(shape), lambda i, _z=zeros: _z)

    in_specs = [full_spec(x.shape) for x in inputs]
    out_shape = (jax.ShapeDtypeStruct((B, 2), jnp.float32),
                 jax.ShapeDtypeStruct((B, T, T), jnp.float32))
    out_specs = (full_spec((B, 2)), full_spec((B, T, T)))
    scratch_shapes = [
        pltpu.VMEM((T * B, 8 * H), jnp.float32),   # hoisted gate inputs, both directions
        pltpu.VMEM((T * B, H), jnp.float32),       # forward h sequence
        pltpu.VMEM((T * B, H), jnp.float32),       # backward h sequence
    ]
    # NOTE: total VMEM footprint is a few hundred KB here; if scaled (large T, H>=512) the
    # gi/hseq scratches must be re-checked against v7x's 64 MiB VMEM.

    # Advisory cost estimate for the XLA scheduler.
    flops = 2 * B * vector.shape[1] * H + 2 * T * B * 20 * E
    for l in range(n_layers):
        in_l = E if l == 0 else 2 * H
        flops += 2 * T * B * in_l * 8 * H          # hoisted input projection
        flops += 2 * T * 2 * B * H * 4 * H         # recurrent matmuls
    flops += B * (2 * T * T * 2 * H + 2 * T * 2 * H + 2 * 2 * H * 2)
    trans = n_layers * T * 2 * (2 * B * 4 * H + B * H) + B * T * T
    bytes_accessed = 4 * (sum(int(x.size) for x in inputs) + B * 2 + B * T * T)

    logits, attn = pl.pallas_call(
        _make_kernel(n_layers, T, B, H),
        out_shape=out_shape,
        grid=(1,),
        in_specs=in_specs,
        out_specs=out_specs,
        scratch_shapes=scratch_shapes,
        compiler_params=pltpu.CompilerParams(dimension_semantics=("arbitrary",)),
        cost_estimate=pl.CostEstimate(flops=int(flops), transcendentals=int(trans),
                                      bytes_accessed=int(bytes_accessed)),
    )(*inputs)
    return logits, attn


# ---------------------------------------------------------------------------
# Deterministic parameter construction (PyTorch-equivalent layout, pre-packed)
# ---------------------------------------------------------------------------
def init_params(key, embedding_dim, hidden_dim, n_layers, vec_dim):
    E, H = embedding_dim, hidden_dim
    C = E // 20
    ks = iter(jax.random.split(key, 64))

    def nrm(shape, scale=0.1):
        return scale * jax.random.normal(next(ks), shape, jnp.float32)

    p = {}
    # extractor: nn.Linear(768, H), stored transposed (in, out)
    p["extractor_w"] = nrm((vec_dim, H), 0.02)
    p["extractor_b"] = nrm((1, H), 0.02)

    # PSSMEmbeddingLayer 'conv' branch: Conv1d(1, C, 3, pad=1) + BatchNorm1d(C) (eval mode),
    # folded into a banded (20, E) matmul; output feature index = c*20 + w.
    conv_w = nrm((C, 3), 0.3)
    conv_b = nrm((C,), 0.1)
    gamma = 1.0 + nrm((C,), 0.05)
    beta = nrm((C,), 0.05)
    run_mean = nrm((C,), 0.05)
    run_var = 1.0 + jnp.abs(nrm((C,), 0.05))
    eps = 1e-5
    jj = jnp.arange(20)[:, None]
    ww = jnp.arange(20)[None, :]
    kk = jj - ww + 1
    valid = (kk >= 0) & (kk <= 2)
    band = jnp.where(valid[None, :, :], conv_w[:, jnp.clip(kk, 0, 2)], 0.0)   # (C, 20, 20)
    M = jnp.transpose(band, (1, 0, 2)).reshape(20, C * 20)                    # (20, E)
    scale_c = gamma / jnp.sqrt(run_var + eps)
    shift_c = beta - run_mean * scale_c
    scale_f = jnp.repeat(scale_c, 20)
    shift_f = jnp.repeat(shift_c, 20)
    p["emb_w"] = M * scale_f[None, :]
    p["emb_b"] = (jnp.repeat(conv_b, 20) * scale_f + shift_f).reshape(1, E)

    # nn.LSTM(E, H, n_layers, bidirectional=True): PyTorch (i,f,g,o) layout, packed fwd|bwd.
    lstm = []
    for l in range(n_layers):
        in_dim = E if l == 0 else 2 * H
        w_ih_f = nrm((4 * H, in_dim)); w_hh_f = nrm((4 * H, H))
        b_ih_f = nrm((4 * H,));        b_hh_f = nrm((4 * H,))
        w_ih_b = nrm((4 * H, in_dim)); w_hh_b = nrm((4 * H, H))
        b_ih_b = nrm((4 * H,));        b_hh_b = nrm((4 * H,))
        lstm.append({
            "wih": jnp.concatenate([w_ih_f.T, w_ih_b.T], axis=1),      # (in, 8H)
            "whh": jnp.stack([w_hh_f.T, w_hh_b.T], axis=0),            # (2, H, 4H)
            "b": jnp.concatenate([b_ih_f + b_hh_f, b_ih_b + b_hh_b]).reshape(1, 8 * H),
        })
    p["lstm"] = lstm

    # fc: nn.Linear(2H, 2)
    p["fc_w"] = nrm((2 * H, 2), 0.1)
    p["fc_b"] = nrm((1, 2), 0.1)
    return p


# ---------------------------------------------------------------------------
if __name__ == "__main__":
    B, T = 2, 8
    EMBEDDING_DIM = 40   # must be divisible by 20
    HIDDEN_DIM = 32
    N_LAYERS = 2
    VEC_DIM = 768

    root = jax.random.PRNGKey(0)
    k_param, k_vec, k_pssm = jax.random.split(root, 3)

    params = init_params(k_param, EMBEDDING_DIM, HIDDEN_DIM, N_LAYERS, VEC_DIM)
    vector = jax.random.normal(k_vec, (B, VEC_DIM), jnp.float32)
    pssm = jax.random.normal(k_pssm, (B, T, 20), jnp.float32)

    # TODO(synk): dropout layers (p=0.1) are identity here (eval-mode semantics); training-mode
    # stochastic dropout is not implemented.
    fwd = jax.jit(functools.partial(forward, n_layers=N_LAYERS))
    logits, attn = fwd(vector, pssm, params)
    jax.block_until_ready((logits, attn))

    assert logits.shape == (B, 2) and attn.shape == (B, T, T)
    assert bool(jnp.all(jnp.isfinite(logits))) and bool(jnp.all(jnp.isfinite(attn)))
    print("KERNEL_OK")
</pallas_src>

<mosaic_0001>
module attributes {stable_mosaic.version = 11 : i64} {
  func.func @kernel(%arg0: i32, %arg1: memref<2x768xf32, #tpu.memory_space<vmem>>, %arg2: memref<16x20xf32, #tpu.memory_space<vmem>>, %arg3: memref<768x32xf32, #tpu.memory_space<vmem>>, %arg4: memref<1x32xf32, #tpu.memory_space<vmem>>, %arg5: memref<20x40xf32, #tpu.memory_space<vmem>>, %arg6: memref<1x40xf32, #tpu.memory_space<vmem>>, %arg7: memref<64x2xf32, #tpu.memory_space<vmem>>, %arg8: memref<1x2xf32, #tpu.memory_space<vmem>>, %arg9: memref<40x256xf32, #tpu.memory_space<vmem>>, %arg10: memref<2x32x128xf32, #tpu.memory_space<vmem>>, %arg11: memref<1x256xf32, #tpu.memory_space<vmem>>, %arg12: memref<64x256xf32, #tpu.memory_space<vmem>>, %arg13: memref<2x32x128xf32, #tpu.memory_space<vmem>>, %arg14: memref<1x256xf32, #tpu.memory_space<vmem>>, %arg15: memref<2x2xf32, #tpu.memory_space<vmem>>, %arg16: memref<2x8x8xf32, #tpu.memory_space<vmem>>, %arg17: memref<16x256xf32, #tpu.memory_space<vmem>>, %arg18: memref<16x32xf32, #tpu.memory_space<vmem>>, %arg19: memref<16x32xf32, #tpu.memory_space<vmem>>) attributes {dimension_semantics = [#tpu.dimension_semantics<arbitrary>], iteration_bounds = array<i64: 1>, scalar_prefetch = 0 : i64, scratch_operands = 3 : i64, tpu.core_type = #tpu.core_type<tc>, window_params = [{pipeline_mode = #tpu.pipeline_mode<synchronous>, transform_indices = @transform_0, window_bounds = array<i64: 2, 768>}, {pipeline_mode = #tpu.pipeline_mode<synchronous>, transform_indices = @transform_1, window_bounds = array<i64: 16, 20>}, {pipeline_mode = #tpu.pipeline_mode<synchronous>, transform_indices = @transform_2, window_bounds = array<i64: 768, 32>}, {pipeline_mode = #tpu.pipeline_mode<synchronous>, transform_indices = @transform_3, window_bounds = array<i64: 1, 32>}, {pipeline_mode = #tpu.pipeline_mode<synchronous>, transform_indices = @transform_4, window_bounds = array<i64: 20, 40>}, {pipeline_mode = #tpu.pipeline_mode<synchronous>, transform_indices = @transform_5, window_bounds = array<i64: 1, 40>}, {pipeline_mode = #tpu.pipeline_mode<synchronous>, transform_indices = @transform_6, window_bounds = array<i64: 64, 2>}, {pipeline_mode = #tpu.pipeline_mode<synchronous>, transform_indices = @transform_7, window_bounds = array<i64: 1, 2>}, {pipeline_mode = #tpu.pipeline_mode<synchronous>, transform_indices = @transform_8, window_bounds = array<i64: 40, 256>}, {pipeline_mode = #tpu.pipeline_mode<synchronous>, transform_indices = @transform_9, window_bounds = array<i64: 2, 32, 128>}, {pipeline_mode = #tpu.pipeline_mode<synchronous>, transform_indices = @transform_10, window_bounds = array<i64: 1, 256>}, {pipeline_mode = #tpu.pipeline_mode<synchronous>, transform_indices = @transform_11, window_bounds = array<i64: 64, 256>}, {pipeline_mode = #tpu.pipeline_mode<synchronous>, transform_indices = @transform_12, window_bounds = array<i64: 2, 32, 128>}, {pipeline_mode = #tpu.pipeline_mode<synchronous>, transform_indices = @transform_13, window_bounds = array<i64: 1, 256>}, {pipeline_mode = #tpu.pipeline_mode<synchronous>, transform_indices = @transform_14, window_bounds = array<i64: 2, 2>}, {pipeline_mode = #tpu.pipeline_mode<synchronous>, transform_indices = @transform_15, window_bounds = array<i64: 2, 8, 8>}]} {
    %c0 = arith.constant 0 : index
    %c0_0 = arith.constant 0 : index
    %0 = vector.load %arg1[%c0, %c0_0] : memref<2x768xf32, #tpu.memory_space<vmem>>, vector<2x768xf32>
    %c0_1 = arith.constant 0 : index
    %c0_2 = arith.constant 0 : index
    %1 = vector.load %arg3[%c0_1, %c0_2] : memref<768x32xf32, #tpu.memory_space<vmem>>, vector<768x32xf32>
    %cst = arith.constant dense<0.000000e+00> : vector<2x32xf32>
    %2 = tpu.matmul %0, %1, %cst {dimension_numbers = #tpu.dot_dimension_numbers<[1], [0], [0], [1], [0, 0, 1, 1], [], []>} : vector<2x768xf32>, vector<768x32xf32>, vector<2x32xf32> -> vector<2x32xf32>
    %c0_3 = arith.constant 0 : index
    %c0_4 = arith.constant 0 : index
    %3 = vector.load %arg4[%c0_3, %c0_4] : memref<1x32xf32, #tpu.memory_space<vmem>>, vector<1x32xf32>
    %4 = vector.broadcast %3 : vector<1x32xf32> to vector<2x32xf32>
    %5 = arith.addf %2, %4 : vector<2x32xf32>
    %c0_5 = arith.constant 0 : index
    %c0_6 = arith.constant 0 : index
    %6 = vector.load %arg2[%c0_5, %c0_6] : memref<16x20xf32, #tpu.memory_space<vmem>>, vector<16x20xf32>
    %c0_7 = arith.constant 0 : index
    %c0_8 = arith.constant 0 : index
    %7 = vector.load %arg5[%c0_7, %c0_8] : memref<20x40xf32, #tpu.memory_space<vmem>>, vector<20x40xf32>
    %cst_9 = arith.constant dense<0.000000e+00> : vector<16x40xf32>
    %8 = tpu.matmul %6, %7, %cst_9 {dimension_numbers = #tpu.dot_dimension_numbers<[1], [0], [0], [1], [0, 0, 1, 1], [], []>} : vector<16x20xf32>, vector<20x40xf32>, vector<16x40xf32> -> vector<16x40xf32>
    %c0_10 = arith.constant 0 : index
    %c0_11 = arith.constant 0 : index
    %9 = vector.load %arg6[%c0_10, %c0_11] : memref<1x40xf32, #tpu.memory_space<vmem>>, vector<1x40xf32>
    %10 = vector.broadcast %9 : vector<1x40xf32> to vector<16x40xf32>
    %11 = arith.addf %8, %10 : vector<16x40xf32>
    %12 = tpu.iota {dimensions = array<i32: 1>} : vector<2x128xi32>
    %c64_i32 = arith.constant 64 : i32
    %13 = vector.broadcast %c64_i32 : i32 to vector<2x128xi32>
    %14 = arith.cmpi sge, %12, %13 : vector<2x128xi32>
    %c96_i32 = arith.constant 96 : i32
    %15 = vector.broadcast %c96_i32 : i32 to vector<2x128xi32>
    %16 = arith.cmpi slt, %12, %15 : vector<2x128xi32>
    %17 = arith.andi %14, %16 : vector<2x128xi1>
    %c0_12 = arith.constant 0 : index
    %c0_13 = arith.constant 0 : index
    %18 = vector.load %arg9[%c0_12, %c0_13] : memref<40x256xf32, #tpu.memory_space<vmem>>, vector<40x256xf32>
    %cst_14 = arith.constant dense<0.000000e+00> : vector<16x256xf32>
    %19 = tpu.matmul %11, %18, %cst_14 {dimension_numbers = #tpu.dot_dimension_numbers<[1], [0], [0], [1], [0, 0, 1, 1], [], []>} : vector<16x40xf32>, vector<40x256xf32>, vector<16x256xf32> -> vector<16x256xf32>
    %c0_15 = arith.constant 0 : index
    %c0_16 = arith.constant 0 : index
    %20 = vector.load %arg11[%c0_15, %c0_16] : memref<1x256xf32, #tpu.memory_space<vmem>>, vector<1x256xf32>
    %21 = vector.broadcast %20 : vector<1x256xf32> to vector<16x256xf32>
    %22 = arith.addf %19, %21 : vector<16x256xf32>
    %c0_17 = arith.constant 0 : index
    %c0_18 = arith.constant 0 : index
    %23 = vector.load %arg17[%c0_17, %c0_18] : memref<16x256xf32, #tpu.memory_space<vmem>>, vector<16x256xf32>
    tpu.vector_store %arg17[%c0_17, %c0_18], %22 {strides = array<i32>} : memref<16x256xf32, #tpu.memory_space<vmem>>, vector<16x256xf32>,
    %c0_19 = arith.constant 0 : index
    %c0_20 = arith.constant 0 : index
    %c0_21 = arith.constant 0 : index
    %24 = vector.load %arg10[%c0_19, %c0_20, %c0_21] : memref<2x32x128xf32, #tpu.memory_space<vmem>>, vector<1x32x128xf32>
    %25 = vector.shape_cast %24 : vector<1x32x128xf32> to vector<32x128xf32>
    %c1 = arith.constant 1 : index
    %c0_22 = arith.constant 0 : index
    %c0_23 = arith.constant 0 : index
    %26 = vector.load %arg10[%c1, %c0_22, %c0_23] : memref<2x32x128xf32, #tpu.memory_space<vmem>>, vector<1x32x128xf32>
    %27 = vector.shape_cast %26 : vector<1x32x128xf32> to vector<32x128xf32>
    %c0_i32 = arith.constant 0 : i32
    %c2_i32 = arith.constant 2 : i32
    %28 = arith.muli %c0_i32, %c2_i32 : i32
    %29 = arith.index_cast %28 : i32 to index
    %c0_24 = arith.constant 0 : index
    %30 = vector.load %arg17[%29, %c0_24] : memref<16x256xf32, #tpu.memory_space<vmem>>, vector<2x256xf32>
    %31 = vector.extract_strided_slice %30 {offsets = [0, 0], sizes = [2, 128], strides = [1, 1]} : vector<2x256xf32> to vector<2x128xf32>
    %cst_25 = arith.constant dense<0.000000e+00> : vector<2x128xf32>
    %32 = tpu.matmul %5, %25, %cst_25 {dimension_numbers = #tpu.dot_dimension_numbers<[1], [0], [0], [1], [0, 0, 1, 1], [], []>} : vector<2x32xf32>, vector<32x128xf32>, vector<2x128xf32> -> vector<2x128xf32>
    %33 = arith.addf %31, %32 : vector<2x128xf32>
    %34 = math.tanh %33 : vector<2x128xf32>
    %35 = arith.negf %33 : vector<2x128xf32>
    %36 = math.exp %35 : vector<2x128xf32>
    %cst_26 = arith.constant 1.000000e+00 : f32
    %37 = vector.broadcast %cst_26 : f32 to vector<2x128xf32>
    %38 = arith.addf %37, %36 : vector<2x128xf32>
    %39 = arith.divf %37, %38 : vector<2x128xf32>
    %40 = arith.select %17, %34, %39 : vector<2x128xi1>, vector<2x128xf32>
    %41 = vector.extract_strided_slice %40 {offsets = [0, 32], sizes = [2, 32], strides = [1, 1]} : vector<2x128xf32> to vector<2x32xf32>
    %42 = arith.mulf %41, %5 : vector<2x32xf32>
    %43 = vector.extract_strided_slice %40 {offsets = [0, 0], sizes = [2, 32], strides = [1, 1]} : vector<2x128xf32> to vector<2x32xf32>
    %44 = vector.extract_strided_slice %40 {offsets = [0, 64], sizes = [2, 32], strides = [1, 1]} : vector<2x128xf32> to vector<2x32xf32>
    %45 = arith.mulf %43, %44 : vector<2x32xf32>
    %46 = arith.addf %42, %45 : vector<2x32xf32>
    %47 = vector.extract_strided_slice %40 {offsets = [0, 96], sizes = [2, 32], strides = [1, 1]} : vector<2x128xf32> to vector<2x32xf32>
    %48 = math.tanh %46 : vector<2x32xf32>
    %49 = arith.mulf %47, %48 : vector<2x32xf32>
    %c2_i32_27 = arith.constant 2 : i32
    %50 = arith.muli %c0_i32, %c2_i32_27 : i32
    %51 = arith.index_cast %50 : i32 to index
    %c0_28 = arith.constant 0 : index
    %52 = vector.load %arg18[%51, %c0_28] : memref<16x32xf32, #tpu.memory_space<vmem>>, vector<2x32xf32>
    tpu.vector_store %arg18[%51, %c0_28], %49 {strides = array<i32>} : memref<16x32xf32, #tpu.memory_space<vmem>>, vector<2x32xf32>,
    %c7_i32 = arith.constant 7 : i32
    %53 = arith.subi %c7_i32, %c0_i32 : i32
    %c2_i32_29 = arith.constant 2 : i32
    %54 = arith.muli %53, %c2_i32_29 : i32
    %55 = arith.index_cast %54 : i32 to index
    %c0_30 = arith.constant 0 : index
    %56 = vector.load %arg17[%55, %c0_30] : memref<16x256xf32, #tpu.memory_space<vmem>>, vector<2x256xf32>
    %57 = vector.extract_strided_slice %56 {offsets = [0, 128], sizes = [2, 128], strides = [1, 1]} : vector<2x256xf32> to vector<2x128xf32>
    %cst_31 = arith.constant dense<0.000000e+00> : vector<2x128xf32>
    %58 = tpu.matmul %5, %27, %cst_31 {dimension_numbers = #tpu.dot_dimension_numbers<[1], [0], [0], [1], [0, 0, 1, 1], [], []>} : vector<2x32xf32>, vector<32x128xf32>, vector<2x128xf32> -> vector<2x128xf32>
    %59 = arith.addf %57, %58 : vector<2x128xf32>
    %60 = math.tanh %59 : vector<2x128xf32>
    %61 = arith.negf %59 : vector<2x128xf32>
    %62 = math.exp %61 : vector<2x128xf32>
    %cst_32 = arith.constant 1.000000e+00 : f32
    %63 = vector.broadcast %cst_32 : f32 to vector<2x128xf32>
    %64 = arith.addf %63, %62 : vector<2x128xf32>
    %65 = arith.divf %63, %64 : vector<2x128xf32>
    %66 = arith.select %17, %60, %65 : vector<2x128xi1>, vector<2x128xf32>
    %67 = vector.extract_strided_slice %66 {offsets = [0, 32], sizes = [2, 32], strides = [1, 1]} : vector<2x128xf32> to vector<2x32xf32>
    %68 = arith.mulf %67, %5 : vector<2x32xf32>
    %69 = vector.extract_strided_slice %66 {offsets = [0, 0], sizes = [2, 32], strides = [1, 1]} : vector<2x128xf32> to vector<2x32xf32>
    %70 = vector.extract_strided_slice %66 {offsets = [0, 64], sizes = [2, 32], strides = [1, 1]} : vector<2x128xf32> to vector<2x32xf32>
    %71 = arith.mulf %69, %70 : vector<2x32xf32>
    %72 = arith.addf %68, %71 : vector<2x32xf32>
    %73 = vector.extract_strided_slice %66 {offsets = [0, 96], sizes = [2, 32], strides = [1, 1]} : vector<2x128xf32> to vector<2x32xf32>
    %74 = math.tanh %72 : vector<2x32xf32>
    %75 = arith.mulf %73, %74 : vector<2x32xf32>
    %c2_i32_33 = arith.constant 2 : i32
    %76 = arith.muli %53, %c2_i32_33 : i32
    %77 = arith.index_cast %76 : i32 to index
    %c0_34 = arith.constant 0 : index
    %78 = vector.load %arg19[%77, %c0_34] : memref<16x32xf32, #tpu.memory_space<vmem>>, vector<2x32xf32>
    tpu.vector_store %arg19[%77, %c0_34], %75 {strides = array<i32>} : memref<16x32xf32, #tpu.memory_space<vmem>>, vector<2x32xf32>,
    %c1_i32 = arith.constant 1 : i32
    %c2_i32_35 = arith.constant 2 : i32
    %79 = arith.muli %c1_i32, %c2_i32_35 : i32
    %80 = arith.index_cast %79 : i32 to index
    %c0_36 = arith.constant 0 : index
    %81 = vector.load %arg17[%80, %c0_36] : memref<16x256xf32, #tpu.memory_space<vmem>>, vector<2x256xf32>
    %82 = vector.extract_strided_slice %81 {offsets = [0, 0], sizes = [2, 128], strides = [1, 1]} : vector<2x256xf32> to vector<2x128xf32>
    %cst_37 = arith.constant dense<0.000000e+00> : vector<2x128xf32>
    %83 = tpu.matmul %49, %25, %cst_37 {dimension_numbers = #tpu.dot_dimension_numbers<[1], [0], [0], [1], [0, 0, 1, 1], [], []>} : vector<2x32xf32>, vector<32x128xf32>, vector<2x128xf32> -> vector<2x128xf32>
    %84 = arith.addf %82, %83 : vector<2x128xf32>
    %85 = math.tanh %84 : vector<2x128xf32>
    %86 = arith.negf %84 : vector<2x128xf32>
    %87 = math.exp %86 : vector<2x128xf32>
    %cst_38 = arith.constant 1.000000e+00 : f32
    %88 = vector.broadcast %cst_38 : f32 to vector<2x128xf32>
    %89 = arith.addf %88, %87 : vector<2x128xf32>
    %90 = arith.divf %88, %89 : vector<2x128xf32>
    %91 = arith.select %17, %85, %90 : vector<2x128xi1>, vector<2x128xf32>
    %92 = vector.extract_strided_slice %91 {offsets = [0, 32], sizes = [2, 32], strides = [1, 1]} : vector<2x128xf32> to vector<2x32xf32>
    %93 = arith.mulf %92, %46 : vector<2x32xf32>
    %94 = vector.extract_strided_slice %91 {offsets = [0, 0], sizes = [2, 32], strides = [1, 1]} : vector<2x128xf32> to vector<2x32xf32>
    %95 = vector.extract_strided_slice %91 {offsets = [0, 64], sizes = [2, 32], strides = [1, 1]} : vector<2x128xf32> to vector<2x32xf32>
    %96 = arith.mulf %94, %95 : vector<2x32xf32>
    %97 = arith.addf %93, %96 : vector<2x32xf32>
    %98 = vector.extract_strided_slice %91 {offsets = [0, 96], sizes = [2, 32], strides = [1, 1]} : vector<2x128xf32> to vector<2x32xf32>
    %99 = math.tanh %97 : vector<2x32xf32>
    %100 = arith.mulf %98, %99 : vector<2x32xf32>
    %c2_i32_39 = arith.constant 2 : i32
    %101 = arith.muli %c1_i32, %c2_i32_39 : i32
    %102 = arith.index_cast %101 : i32 to index
    %c0_40 = arith.constant 0 : index
    %103 = vector.load %arg18[%102, %c0_40] : memref<16x32xf32, #tpu.memory_space<vmem>>, vector<2x32xf32>
    tpu.vector_store %arg18[%102, %c0_40], %100 {strides = array<i32>} : memref<16x32xf32, #tpu.memory_space<vmem>>, vector<2x32xf32>,
    %c7_i32_41 = arith.constant 7 : i32
    %104 = arith.subi %c7_i32_41, %c1_i32 : i32
    %c2_i32_42 = arith.constant 2 : i32
    %105 = arith.muli %104, %c2_i32_42 : i32
    %106 = arith.index_cast %105 : i32 to index
    %c0_43 = arith.constant 0 : index
    %107 = vector.load %arg17[%106, %c0_43] : memref<16x256xf32, #tpu.memory_space<vmem>>, vector<2x256xf32>
    %108 = vector.extract_strided_slice %107 {offsets = [0, 128], sizes = [2, 128], strides = [1, 1]} : vector<2x256xf32> to vector<2x128xf32>
    %cst_44 = arith.constant dense<0.000000e+00> : vector<2x128xf32>
    %109 = tpu.matmul %75, %27, %cst_44 {dimension_numbers = #tpu.dot_dimension_numbers<[1], [0], [0], [1], [0, 0, 1, 1], [], []>} : vector<2x32xf32>, vector<32x128xf32>, vector<2x128xf32> -> vector<2x128xf32>
    %110 = arith.addf %108, %109 : vector<2x128xf32>
    %111 = math.tanh %110 : vector<2x128xf32>
    %112 = arith.negf %110 : vector<2x128xf32>
    %113 = math.exp %112 : vector<2x128xf32>
    %cst_45 = arith.constant 1.000000e+00 : f32
    %114 = vector.broadcast %cst_45 : f32 to vector<2x128xf32>
    %115 = arith.addf %114, %113 : vector<2x128xf32>
    %116 = arith.divf %114, %115 : vector<2x128xf32>
    %117 = arith.select %17, %111, %116 : vector<2x128xi1>, vector<2x128xf32>
    %118 = vector.extract_strided_slice %117 {offsets = [0, 32], sizes = [2, 32], strides = [1, 1]} : vector<2x128xf32> to vector<2x32xf32>
    %119 = arith.mulf %118, %72 : vector<2x32xf32>
    %120 = vector.extract_strided_slice %117 {offsets = [0, 0], sizes = [2, 32], strides = [1, 1]} : vector<2x128xf32> to vector<2x32xf32>
    %121 = vector.extract_strided_slice %117 {offsets = [0, 64], sizes = [2, 32], strides = [1, 1]} : vector<2x128xf32> to vector<2x32xf32>
    %122 = arith.mulf %120, %121 : vector<2x32xf32>
    %123 = arith.addf %119, %122 : vector<2x32xf32>
    %124 = vector.extract_strided_slice %117 {offsets = [0, 96], sizes = [2, 32], strides = [1, 1]} : vector<2x128xf32> to vector<2x32xf32>
    %125 = math.tanh %123 : vector<2x32xf32>
    %126 = arith.mulf %124, %125 : vector<2x32xf32>
    %c2_i32_46 = arith.constant 2 : i32
    %127 = arith.muli %104, %c2_i32_46 : i32
    %128 = arith.index_cast %127 : i32 to index
    %c0_47 = arith.constant 0 : index
    %129 = vector.load %arg19[%128, %c0_47] : memref<16x32xf32, #tpu.memory_space<vmem>>, vector<2x32xf32>
    tpu.vector_store %arg19[%128, %c0_47], %126 {strides = array<i32>} : memref<16x32xf32, #tpu.memory_space<vmem>>, vector<2x32xf32>,
    %c2_i32_48 = arith.constant 2 : i32
    %c2_i32_49 = arith.constant 2 : i32
    %130 = arith.muli %c2_i32_48, %c2_i32_49 : i32
    %131 = arith.index_cast %130 : i32 to index
    %c0_50 = arith.constant 0 : index
    %132 = vector.load %arg17[%131, %c0_50] : memref<16x256xf32, #tpu.memory_space<vmem>>, vector<2x256xf32>
    %133 = vector.extract_strided_slice %132 {offsets = [0, 0], sizes = [2, 128], strides = [1, 1]} : vector<2x256xf32> to vector<2x128xf32>
    %cst_51 = arith.constant dense<0.000000e+00> : vector<2x128xf32>
    %134 = tpu.matmul %100, %25, %cst_51 {dimension_numbers = #tpu.dot_dimension_numbers<[1], [0], [0], [1], [0, 0, 1, 1], [], []>} : vector<2x32xf32>, vector<32x128xf32>, vector<2x128xf32> -> vector<2x128xf32>
    %135 = arith.addf %133, %134 : vector<2x128xf32>
    %136 = math.tanh %135 : vector<2x128xf32>
    %137 = arith.negf %135 : vector<2x128xf32>
    %138 = math.exp %137 : vector<2x128xf32>
    %cst_52 = arith.constant 1.000000e+00 : f32
    %139 = vector.broadcast %cst_52 : f32 to vector<2x128xf32>
    %140 = arith.addf %139, %138 : vector<2x128xf32>
    %141 = arith.divf %139, %140 : vector<2x128xf32>
    %142 = arith.select %17, %136, %141 : vector<2x128xi1>, vector<2x128xf32>
    %143 = vector.extract_strided_slice %142 {offsets = [0, 32], sizes = [2, 32], strides = [1, 1]} : vector<2x128xf32> to vector<2x32xf32>
    %144 = arith.mulf %143, %97 : vector<2x32xf32>
    %145 = vector.extract_strided_slice %142 {offsets = [0, 0], sizes = [2, 32], strides = [1, 1]} : vector<2x128xf32> to vector<2x32xf32>
    %146 = vector.extract_strided_slice %142 {offsets = [0, 64], sizes = [2, 32], strides = [1, 1]} : vector<2x128xf32> to vector<2x32xf32>
    %147 = arith.mulf %145, %146 : vector<2x32xf32>
    %148 = arith.addf %144, %147 : vector<2x32xf32>
    %149 = vector.extract_strided_slice %142 {offsets = [0, 96], sizes = [2, 32], strides = [1, 1]} : vector<2x128xf32> to vector<2x32xf32>
    %150 = math.tanh %148 : vector<2x32xf32>
    %151 = arith.mulf %149, %150 : vector<2x32xf32>
    %c2_i32_53 = arith.constant 2 : i32
    %152 = arith.muli %c2_i32_48, %c2_i32_53 : i32
    %153 = arith.index_cast %152 : i32 to index
    %c0_54 = arith.constant 0 : index
    %154 = vector.load %arg18[%153, %c0_54] : memref<16x32xf32, #tpu.memory_space<vmem>>, vector<2x32xf32>
    tpu.vector_store %arg18[%153, %c0_54], %151 {strides = array<i32>} : memref<16x32xf32, #tpu.memory_space<vmem>>, vector<2x32xf32>,
    %c7_i32_55 = arith.constant 7 : i32
    %155 = arith.subi %c7_i32_55, %c2_i32_48 : i32
    %c2_i32_56 = arith.constant 2 : i32
    %156 = arith.muli %155, %c2_i32_56 : i32
    %157 = arith.index_cast %156 : i32 to index
    %c0_57 = arith.constant 0 : index
    %158 = vector.load %arg17[%157, %c0_57] : memref<16x256xf32, #tpu.memory_space<vmem>>, vector<2x256xf32>
    %159 = vector.extract_strided_slice %158 {offsets = [0, 128], sizes = [2, 128], strides = [1, 1]} : vector<2x256xf32> to vector<2x128xf32>
    %cst_58 = arith.constant dense<0.000000e+00> : vector<2x128xf32>
    %160 = tpu.matmul %126, %27, %cst_58 {dimension_numbers = #tpu.dot_dimension_numbers<[1], [0], [0], [1], [0, 0, 1, 1], [], []>} : vector<2x32xf32>, vector<32x128xf32>, vector<2x128xf32> -> vector<2x128xf32>
    %161 = arith.addf %159, %160 : vector<2x128xf32>
    %162 = math.tanh %161 : vector<2x128xf32>
    %163 = arith.negf %161 : vector<2x128xf32>
    %164 = math.exp %163 : vector<2x128xf32>
    %cst_59 = arith.constant 1.000000e+00 : f32
    %165 = vector.broadcast %cst_59 : f32 to vector<2x128xf32>
    %166 = arith.addf %165, %164 : vector<2x128xf32>
    %167 = arith.divf %165, %166 : vector<2x128xf32>
    %168 = arith.select %17, %162, %167 : vector<2x128xi1>, vector<2x128xf32>
    %169 = vector.extract_strided_slice %168 {offsets = [0, 32], sizes = [2, 32], strides = [1, 1]} : vector<2x128xf32> to vector<2x32xf32>
    %170 = arith.mulf %169, %123 : vector<2x32xf32>
    %171 = vector.extract_strided_slice %168 {offsets = [0, 0], sizes = [2, 32], strides = [1, 1]} : vector<2x128xf32> to vector<2x32xf32>
    %172 = vector.extract_strided_slice %168 {offsets = [0, 64], sizes = [2, 32], strides = [1, 1]} : vector<2x128xf32> to vector<2x32xf32>
    %173 = arith.mulf %171, %172 : vector<2x32xf32>
    %174 = arith.addf %170, %173 : vector<2x32xf32>
    %175 = vector.extract_strided_slice %168 {offsets = [0, 96], sizes = [2, 32], strides = [1, 1]} : vector<2x128xf32> to vector<2x32xf32>
    %176 = math.tanh %174 : vector<2x32xf32>
    %177 = arith.mulf %175, %176 : vector<2x32xf32>
    %c2_i32_60 = arith.constant 2 : i32
    %178 = arith.muli %155, %c2_i32_60 : i32
    %179 = arith.index_cast %178 : i32 to index
    %c0_61 = arith.constant 0 : index
    %180 = vector.load %arg19[%179, %c0_61] : memref<16x32xf32, #tpu.memory_space<vmem>>, vector<2x32xf32>
    tpu.vector_store %arg19[%179, %c0_61], %177 {strides = array<i32>} : memref<16x32xf32, #tpu.memory_space<vmem>>, vector<2x32xf32>,
    %c3_i32 = arith.constant 3 : i32
    %c2_i32_62 = arith.constant 2 : i32
    %181 = arith.muli %c3_i32, %c2_i32_62 : i32
    %182 = arith.index_cast %181 : i32 to index
    %c0_63 = arith.constant 0 : index
    %183 = vector.load %arg17[%182, %c0_63] : memref<16x256xf32, #tpu.memory_space<vmem>>, vector<2x256xf32>
    %184 = vector.extract_strided_slice %183 {offsets = [0, 0], sizes = [2, 128], strides = [1, 1]} : vector<2x256xf32> to vector<2x128xf32>
    %cst_64 = arith.constant dense<0.000000e+00> : vector<2x128xf32>
    %185 = tpu.matmul %151, %25, %cst_64 {dimension_numbers = #tpu.dot_dimension_numbers<[1], [0], [0], [1], [0, 0, 1, 1], [], []>} : vector<2x32xf32>, vector<32x128xf32>, vector<2x128xf32> -> vector<2x128xf32>
    %186 = arith.addf %184, %185 : vector<2x128xf32>
    %187 = math.tanh %186 : vector<2x128xf32>
    %188 = arith.negf %186 : vector<2x128xf32>
    %189 = math.exp %188 : vector<2x128xf32>
    %cst_65 = arith.constant 1.000000e+00 : f32
    %190 = vector.broadcast %cst_65 : f32 to vector<2x128xf32>
    %191 = arith.addf %190, %189 : vector<2x128xf32>
    %192 = arith.divf %190, %191 : vector<2x128xf32>
    %193 = arith.select %17, %187, %192 : vector<2x128xi1>, vector<2x128xf32>
    %194 = vector.extract_strided_slice %193 {offsets = [0, 32], sizes = [2, 32], strides = [1, 1]} : vector<2x128xf32> to vector<2x32xf32>
    %195 = arith.mulf %194, %148 : vector<2x32xf32>
    %196 = vector.extract_strided_slice %193 {offsets = [0, 0], sizes = [2, 32], strides = [1, 1]} : vector<2x128xf32> to vector<2x32xf32>
    %197 = vector.extract_strided_slice %193 {offsets = [0, 64], sizes = [2, 32], strides = [1, 1]} : vector<2x128xf32> to vector<2x32xf32>
    %198 = arith.mulf %196, %197 : vector<2x32xf32>
    %199 = arith.addf %195, %198 : vector<2x32xf32>
    %200 = vector.extract_strided_slice %193 {offsets = [0, 96], sizes = [2, 32], strides = [1, 1]} : vector<2x128xf32> to vector<2x32xf32>
    %201 = math.tanh %199 : vector<2x32xf32>
    %202 = arith.mulf %200, %201 : vector<2x32xf32>
    %c2_i32_66 = arith.constant 2 : i32
    %203 = arith.muli %c3_i32, %c2_i32_66 : i32
    %204 = arith.index_cast %203 : i32 to index
    %c0_67 = arith.constant 0 : index
    %205 = vector.load %arg18[%204, %c0_67] : memref<16x32xf32, #tpu.memory_space<vmem>>, vector<2x32xf32>
    tpu.vector_store %arg18[%204, %c0_67], %202 {strides = array<i32>} : memref<16x32xf32, #tpu.memory_space<vmem>>, vector<2x32xf32>,
    %c7_i32_68 = arith.constant 7 : i32
    %206 = arith.subi %c7_i32_68, %c3_i32 : i32
    %c2_i32_69 = arith.constant 2 : i32
    %207 = arith.muli %206, %c2_i32_69 : i32
    %208 = arith.index_cast %207 : i32 to index
    %c0_70 = arith.constant 0 : index
    %209 = vector.load %arg17[%208, %c0_70] : memref<16x256xf32, #tpu.memory_space<vmem>>, vector<2x256xf32>
    %210 = vector.extract_strided_slice %209 {offsets = [0, 128], sizes = [2, 128], strides = [1, 1]} : vector<2x256xf32> to vector<2x128xf32>
    %cst_71 = arith.constant dense<0.000000e+00> : vector<2x128xf32>
    %211 = tpu.matmul %177, %27, %cst_71 {dimension_numbers = #tpu.dot_dimension_numbers<[1], [0], [0], [1], [0, 0, 1, 1], [], []>} : vector<2x32xf32>, vector<32x128xf32>, vector<2x128xf32> -> vector<2x128xf32>
    %212 = arith.addf %210, %211 : vector<2x128xf32>
    %213 = math.tanh %212 : vector<2x128xf32>
    %214 = arith.negf %212 : vector<2x128xf32>
    %215 = math.exp %214 : vector<2x128xf32>
    %cst_72 = arith.constant 1.000000e+00 : f32
    %216 = vector.broadcast %cst_72 : f32 to vector<2x128xf32>
    %217 = arith.addf %216, %215 : vector<2x128xf32>
    %218 = arith.divf %216, %217 : vector<2x128xf32>
    %219 = arith.select %17, %213, %218 : vector<2x128xi1>, vector<2x128xf32>
    %220 = vector.extract_strided_slice %219 {offsets = [0, 32], sizes = [2, 32], strides = [1, 1]} : vector<2x128xf32> to vector<2x32xf32>
    %221 = arith.mulf %220, %174 : vector<2x32xf32>
    %222 = vector.extract_strided_slice %219 {offsets = [0, 0], sizes = [2, 32], strides = [1, 1]} : vector<2x128xf32> to vector<2x32xf32>
    %223 = vector.extract_strided_slice %219 {offsets = [0, 64], sizes = [2, 32], strides = [1, 1]} : vector<2x128xf32> to vector<2x32xf32>
    %224 = arith.mulf %222, %223 : vector<2x32xf32>
    %225 = arith.addf %221, %224 : vector<2x32xf32>
    %226 = vector.extract_strided_slice %219 {offsets = [0, 96], sizes = [2, 32], strides = [1, 1]} : vector<2x128xf32> to vector<2x32xf32>
    %227 = math.tanh %225 : vector<2x32xf32>
    %228 = arith.mulf %226, %227 : vector<2x32xf32>
    %c2_i32_73 = arith.constant 2 : i32
    %229 = arith.muli %206, %c2_i32_73 : i32
    %230 = arith.index_cast %229 : i32 to index
    %c0_74 = arith.constant 0 : index
    %231 = vector.load %arg19[%230, %c0_74] : memref<16x32xf32, #tpu.memory_space<vmem>>, vector<2x32xf32>
    tpu.vector_store %arg19[%230, %c0_74], %228 {strides = array<i32>} : memref<16x32xf32, #tpu.memory_space<vmem>>, vector<2x32xf32>,
    %c4_i32 = arith.constant 4 : i32
    %c2_i32_75 = arith.constant 2 : i32
    %232 = arith.muli %c4_i32, %c2_i32_75 : i32
    %233 = arith.index_cast %232 : i32 to index
    %c0_76 = arith.constant 0 : index
    %234 = vector.load %arg17[%233, %c0_76] : memref<16x256xf32, #tpu.memory_space<vmem>>, vector<2x256xf32>
    %235 = vector.extract_strided_slice %234 {offsets = [0, 0], sizes = [2, 128], strides = [1, 1]} : vector<2x256xf32> to vector<2x128xf32>
    %cst_77 = arith.constant dense<0.000000e+00> : vector<2x128xf32>
    %236 = tpu.matmul %202, %25, %cst_77 {dimension_numbers = #tpu.dot_dimension_numbers<[1], [0], [0], [1], [0, 0, 1, 1], [], []>} : vector<2x32xf32>, vector<32x128xf32>, vector<2x128xf32> -> vector<2x128xf32>
    %237 = arith.addf %235, %236 : vector<2x128xf32>
    %238 = math.tanh %237 : vector<2x128xf32>
    %239 = arith.negf %237 : vector<2x128xf32>
    %240 = math.exp %239 : vector<2x128xf32>
    %cst_78 = arith.constant 1.000000e+00 : f32
    %241 = vector.broadcast %cst_78 : f32 to vector<2x128xf32>
    %242 = arith.addf %241, %240 : vector<2x128xf32>
    %243 = arith.divf %241, %242 : vector<2x128xf32>
    %244 = arith.select %17, %238, %243 : vector<2x128xi1>, vector<2x128xf32>
    %245 = vector.extract_strided_slice %244 {offsets = [0, 32], sizes = [2, 32], strides = [1, 1]} : vector<2x128xf32> to vector<2x32xf32>
    %246 = arith.mulf %245, %199 : vector<2x32xf32>
    %247 = vector.extract_strided_slice %244 {offsets = [0, 0], sizes = [2, 32], strides = [1, 1]} : vector<2x128xf32> to vector<2x32xf32>
    %248 = vector.extract_strided_slice %244 {offsets = [0, 64], sizes = [2, 32], strides = [1, 1]} : vector<2x128xf32> to vector<2x32xf32>
    %249 = arith.mulf %247, %248 : vector<2x32xf32>
    %250 = arith.addf %246, %249 : vector<2x32xf32>
    %251 = vector.extract_strided_slice %244 {offsets = [0, 96], sizes = [2, 32], strides = [1, 1]} : vector<2x128xf32> to vector<2x32xf32>
    %252 = math.tanh %250 : vector<2x32xf32>
    %253 = arith.mulf %251, %252 : vector<2x32xf32>
    %c2_i32_79 = arith.constant 2 : i32
    %254 = arith.muli %c4_i32, %c2_i32_79 : i32
    %255 = arith.index_cast %254 : i32 to index
    %c0_80 = arith.constant 0 : index
    %256 = vector.load %arg18[%255, %c0_80] : memref<16x32xf32, #tpu.memory_space<vmem>>, vector<2x32xf32>
    tpu.vector_store %arg18[%255, %c0_80], %253 {strides = array<i32>} : memref<16x32xf32, #tpu.memory_space<vmem>>, vector<2x32xf32>,
    %c7_i32_81 = arith.constant 7 : i32
    %257 = arith.subi %c7_i32_81, %c4_i32 : i32
    %c2_i32_82 = arith.constant 2 : i32
    %258 = arith.muli %257, %c2_i32_82 : i32
    %259 = arith.index_cast %258 : i32 to index
    %c0_83 = arith.constant 0 : index
    %260 = vector.load %arg17[%259, %c0_83] : memref<16x256xf32, #tpu.memory_space<vmem>>, vector<2x256xf32>
    %261 = vector.extract_strided_slice %260 {offsets = [0, 128], sizes = [2, 128], strides = [1, 1]} : vector<2x256xf32> to vector<2x128xf32>
    %cst_84 = arith.constant dense<0.000000e+00> : vector<2x128xf32>
    %262 = tpu.matmul %228, %27, %cst_84 {dimension_numbers = #tpu.dot_dimension_numbers<[1], [0], [0], [1], [0, 0, 1, 1], [], []>} : vector<2x32xf32>, vector<32x128xf32>, vector<2x128xf32> -> vector<2x128xf32>
    %263 = arith.addf %261, %262 : vector<2x128xf32>
    %264 = math.tanh %263 : vector<2x128xf32>
    %265 = arith.negf %263 : vector<2x128xf32>
    %266 = math.exp %265 : vector<2x128xf32>
    %cst_85 = arith.constant 1.000000e+00 : f32
    %267 = vector.broadcast %cst_85 : f32 to vector<2x128xf32>
    %268 = arith.addf %267, %266 : vector<2x128xf32>
    %269 = arith.divf %267, %268 : vector<2x128xf32>
    %270 = arith.select %17, %264, %269 : vector<2x128xi1>, vector<2x128xf32>
    %271 = vector.extract_strided_slice %270 {offsets = [0, 32], sizes = [2, 32], strides = [1, 1]} : vector<2x128xf32> to vector<2x32xf32>
    %272 = arith.mulf %271, %225 : vector<2x32xf32>
    %273 = vector.extract_strided_slice %270 {offsets = [0, 0], sizes = [2, 32], strides = [1, 1]} : vector<2x128xf32> to vector<2x32xf32>
    %274 = vector.extract_strided_slice %270 {offsets = [0, 64], sizes = [2, 32], strides = [1, 1]} : vector<2x128xf32> to vector<2x32xf32>
    %275 = arith.mulf %273, %274 : vector<2x32xf32>
    %276 = arith.addf %272, %275 : vector<2x32xf32>
    %277 = vector.extract_strided_slice %270 {offsets = [0, 96], sizes = [2, 32], strides = [1, 1]} : vector<2x128xf32> to vector<2x32xf32>
    %278 = math.tanh %276 : vector<2x32xf32>
    %279 = arith.mulf %277, %278 : vector<2x32xf32>
    %c2_i32_86 = arith.constant 2 : i32
    %280 = arith.muli %257, %c2_i32_86 : i32
    %281 = arith.index_cast %280 : i32 to index
    %c0_87 = arith.constant 0 : index
    %282 = vector.load %arg19[%281, %c0_87] : memref<16x32xf32, #tpu.memory_space<vmem>>, vector<2x32xf32>
    tpu.vector_store %arg19[%281, %c0_87], %279 {strides = array<i32>} : memref<16x32xf32, #tpu.memory_space<vmem>>, vector<2x32xf32>,
    %c5_i32 = arith.constant 5 : i32
    %c2_i32_88 = arith.constant 2 : i32
    %283 = arith.muli %c5_i32, %c2_i32_88 : i32
    %284 = arith.index_cast %283 : i32 to index
    %c0_89 = arith.constant 0 : index
    %285 = vector.load %arg17[%284, %c0_89] : memref<16x256xf32, #tpu.memory_space<vmem>>, vector<2x256xf32>
    %286 = vector.extract_strided_slice %285 {offsets = [0, 0], sizes = [2, 128], strides = [1, 1]} : vector<2x256xf32> to vector<2x128xf32>
    %cst_90 = arith.constant dense<0.000000e+00> : vector<2x128xf32>
    %287 = tpu.matmul %253, %25, %cst_90 {dimension_numbers = #tpu.dot_dimension_numbers<[1], [0], [0], [1], [0, 0, 1, 1], [], []>} : vector<2x32xf32>, vector<32x128xf32>, vector<2x128xf32> -> vector<2x128xf32>
    %288 = arith.addf %286, %287 : vector<2x128xf32>
    %289 = math.tanh %288 : vector<2x128xf32>
    %290 = arith.negf %288 : vector<2x128xf32>
    %291 = math.exp %290 : vector<2x128xf32>
    %cst_91 = arith.constant 1.000000e+00 : f32
    %292 = vector.broadcast %cst_91 : f32 to vector<2x128xf32>
    %293 = arith.addf %292, %291 : vector<2x128xf32>
    %294 = arith.divf %292, %293 : vector<2x128xf32>
    %295 = arith.select %17, %289, %294 : vector<2x128xi1>, vector<2x128xf32>
    %296 = vector.extract_strided_slice %295 {offsets = [0, 32], sizes = [2, 32], strides = [1, 1]} : vector<2x128xf32> to vector<2x32xf32>
    %297 = arith.mulf %296, %250 : vector<2x32xf32>
    %298 = vector.extract_strided_slice %295 {offsets = [0, 0], sizes = [2, 32], strides = [1, 1]} : vector<2x128xf32> to vector<2x32xf32>
    %299 = vector.extract_strided_slice %295 {offsets = [0, 64], sizes = [2, 32], strides = [1, 1]} : vector<2x128xf32> to vector<2x32xf32>
    %300 = arith.mulf %298, %299 : vector<2x32xf32>
    %301 = arith.addf %297, %300 : vector<2x32xf32>
    %302 = vector.extract_strided_slice %295 {offsets = [0, 96], sizes = [2, 32], strides = [1, 1]} : vector<2x128xf32> to vector<2x32xf32>
    %303 = math.tanh %301 : vector<2x32xf32>
    %304 = arith.mulf %302, %303 : vector<2x32xf32>
    %c2_i32_92 = arith.constant 2 : i32
    %305 = arith.muli %c5_i32, %c2_i32_92 : i32
    %306 = arith.index_cast %305 : i32 to index
    %c0_93 = arith.constant 0 : index
    %307 = vector.load %arg18[%306, %c0_93] : memref<16x32xf32, #tpu.memory_space<vmem>>, vector<2x32xf32>
    tpu.vector_store %arg18[%306, %c0_93], %304 {strides = array<i32>} : memref<16x32xf32, #tpu.memory_space<vmem>>, vector<2x32xf32>,
    %c7_i32_94 = arith.constant 7 : i32
    %308 = arith.subi %c7_i32_94, %c5_i32 : i32
    %c2_i32_95 = arith.constant 2 : i32
    %309 = arith.muli %308, %c2_i32_95 : i32
    %310 = arith.index_cast %309 : i32 to index
    %c0_96 = arith.constant 0 : index
    %311 = vector.load %arg17[%310, %c0_96] : memref<16x256xf32, #tpu.memory_space<vmem>>, vector<2x256xf32>
    %312 = vector.extract_strided_slice %311 {offsets = [0, 128], sizes = [2, 128], strides = [1, 1]} : vector<2x256xf32> to vector<2x128xf32>
    %cst_97 = arith.constant dense<0.000000e+00> : vector<2x128xf32>
    %313 = tpu.matmul %279, %27, %cst_97 {dimension_numbers = #tpu.dot_dimension_numbers<[1], [0], [0], [1], [0, 0, 1, 1], [], []>} : vector<2x32xf32>, vector<32x128xf32>, vector<2x128xf32> -> vector<2x128xf32>
    %314 = arith.addf %312, %313 : vector<2x128xf32>
    %315 = math.tanh %314 : vector<2x128xf32>
    %316 = arith.negf %314 : vector<2x128xf32>
    %317 = math.exp %316 : vector<2x128xf32>
    %cst_98 = arith.constant 1.000000e+00 : f32
    %318 = vector.broadcast %cst_98 : f32 to vector<2x128xf32>
    %319 = arith.addf %318, %317 : vector<2x128xf32>
    %320 = arith.divf %318, %319 : vector<2x128xf32>
    %321 = arith.select %17, %315, %320 : vector<2x128xi1>, vector<2x128xf32>
    %322 = vector.extract_strided_slice %321 {offsets = [0, 32], sizes = [2, 32], strides = [1, 1]} : vector<2x128xf32> to vector<2x32xf32>
    %323 = arith.mulf %322, %276 : vector<2x32xf32>
    %324 = vector.extract_strided_slice %321 {offsets = [0, 0], sizes = [2, 32], strides = [1, 1]} : vector<2x128xf32> to vector<2x32xf32>
    %325 = vector.extract_strided_slice %321 {offsets = [0, 64], sizes = [2, 32], strides = [1, 1]} : vector<2x128xf32> to vector<2x32xf32>
    %326 = arith.mulf %324, %325 : vector<2x32xf32>
    %327 = arith.addf %323, %326 : vector<2x32xf32>
    %328 = vector.extract_strided_slice %321 {offsets = [0, 96], sizes = [2, 32], strides = [1, 1]} : vector<2x128xf32> to vector<2x32xf32>
    %329 = math.tanh %327 : vector<2x32xf32>
    %330 = arith.mulf %328, %329 : vector<2x32xf32>
    %c2_i32_99 = arith.constant 2 : i32
    %331 = arith.muli %308, %c2_i32_99 : i32
    %332 = arith.index_cast %331 : i32 to index
    %c0_100 = arith.constant 0 : index
    %333 = vector.load %arg19[%332, %c0_100] : memref<16x32xf32, #tpu.memory_space<vmem>>, vector<2x32xf32>
    tpu.vector_store %arg19[%332, %c0_100], %330 {strides = array<i32>} : memref<16x32xf32, #tpu.memory_space<vmem>>, vector<2x32xf32>,
    %c6_i32 = arith.constant 6 : i32
    %c2_i32_101 = arith.constant 2 : i32
    %334 = arith.muli %c6_i32, %c2_i32_101 : i32
    %335 = arith.index_cast %334 : i32 to index
    %c0_102 = arith.constant 0 : index
    %336 = vector.load %arg17[%335, %c0_102] : memref<16x256xf32, #tpu.memory_space<vmem>>, vector<2x256xf32>
    %337 = vector.extract_strided_slice %336 {offsets = [0, 0], sizes = [2, 128], strides = [1, 1]} : vector<2x256xf32> to vector<2x128xf32>
    %cst_103 = arith.constant dense<0.000000e+00> : vector<2x128xf32>
    %338 = tpu.matmul %304, %25, %cst_103 {dimension_numbers = #tpu.dot_dimension_numbers<[1], [0], [0], [1], [0, 0, 1, 1], [], []>} : vector<2x32xf32>, vector<32x128xf32>, vector<2x128xf32> -> vector<2x128xf32>
    %339 = arith.addf %337, %338 : vector<2x128xf32>
    %340 = math.tanh %339 : vector<2x128xf32>
    %341 = arith.negf %339 : vector<2x128xf32>
    %342 = math.exp %341 : vector<2x128xf32>
    %cst_104 = arith.constant 1.000000e+00 : f32
    %343 = vector.broadcast %cst_104 : f32 to vector<2x128xf32>
    %344 = arith.addf %343, %342 : vector<2x128xf32>
    %345 = arith.divf %343, %344 : vector<2x128xf32>
    %346 = arith.select %17, %340, %345 : vector<2x128xi1>, vector<2x128xf32>
    %347 = vector.extract_strided_slice %346 {offsets = [0, 32], sizes = [2, 32], strides = [1, 1]} : vector<2x128xf32> to vector<2x32xf32>
    %348 = arith.mulf %347, %301 : vector<2x32xf32>
    %349 = vector.extract_strided_slice %346 {offsets = [0, 0], sizes = [2, 32], strides = [1, 1]} : vector<2x128xf32> to vector<2x32xf32>
    %350 = vector.extract_strided_slice %346 {offsets = [0, 64], sizes = [2, 32], strides = [1, 1]} : vector<2x128xf32> to vector<2x32xf32>
    %351 = arith.mulf %349, %350 : vector<2x32xf32>
    %352 = arith.addf %348, %351 : vector<2x32xf32>
    %353 = vector.extract_strided_slice %346 {offsets = [0, 96], sizes = [2, 32], strides = [1, 1]} : vector<2x128xf32> to vector<2x32xf32>
    %354 = math.tanh %352 : vector<2x32xf32>
    %355 = arith.mulf %353, %354 : vector<2x32xf32>
    %c2_i32_105 = arith.constant 2 : i32
    %356 = arith.muli %c6_i32, %c2_i32_105 : i32
    %357 = arith.index_cast %356 : i32 to index
    %c0_106 = arith.constant 0 : index
    %358 = vector.load %arg18[%357, %c0_106] : memref<16x32xf32, #tpu.memory_space<vmem>>, vector<2x32xf32>
    tpu.vector_store %arg18[%357, %c0_106], %355 {strides = array<i32>} : memref<16x32xf32, #tpu.memory_space<vmem>>, vector<2x32xf32>,
    %c7_i32_107 = arith.constant 7 : i32
    %359 = arith.subi %c7_i32_107, %c6_i32 : i32
    %c2_i32_108 = arith.constant 2 : i32
    %360 = arith.muli %359, %c2_i32_108 : i32
    %361 = arith.index_cast %360 : i32 to index
    %c0_109 = arith.constant 0 : index
    %362 = vector.load %arg17[%361, %c0_109] : memref<16x256xf32, #tpu.memory_space<vmem>>, vector<2x256xf32>
    %363 = vector.extract_strided_slice %362 {offsets = [0, 128], sizes = [2, 128], strides = [1, 1]} : vector<2x256xf32> to vector<2x128xf32>
    %cst_110 = arith.constant dense<0.000000e+00> : vector<2x128xf32>
    %364 = tpu.matmul %330, %27, %cst_110 {dimension_numbers = #tpu.dot_dimension_numbers<[1], [0], [0], [1], [0, 0, 1, 1], [], []>} : vector<2x32xf32>, vector<32x128xf32>, vector<2x128xf32> -> vector<2x128xf32>
    %365 = arith.addf %363, %364 : vector<2x128xf32>
    %366 = math.tanh %365 : vector<2x128xf32>
    %367 = arith.negf %365 : vector<2x128xf32>
    %368 = math.exp %367 : vector<2x128xf32>
    %cst_111 = arith.constant 1.000000e+00 : f32
    %369 = vector.broadcast %cst_111 : f32 to vector<2x128xf32>
    %370 = arith.addf %369, %368 : vector<2x128xf32>
    %371 = arith.divf %369, %370 : vector<2x128xf32>
    %372 = arith.select %17, %366, %371 : vector<2x128xi1>, vector<2x128xf32>
    %373 = vector.extract_strided_slice %372 {offsets = [0, 32], sizes = [2, 32], strides = [1, 1]} : vector<2x128xf32> to vector<2x32xf32>
    %374 = arith.mulf %373, %327 : vector<2x32xf32>
    %375 = vector.extract_strided_slice %372 {offsets = [0, 0], sizes = [2, 32], strides = [1, 1]} : vector<2x128xf32> to vector<2x32xf32>
    %376 = vector.extract_strided_slice %372 {offsets = [0, 64], sizes = [2, 32], strides = [1, 1]} : vector<2x128xf32> to vector<2x32xf32>
    %377 = arith.mulf %375, %376 : vector<2x32xf32>
    %378 = arith.addf %374, %377 : vector<2x32xf32>
    %379 = vector.extract_strided_slice %372 {offsets = [0, 96], sizes = [2, 32], strides = [1, 1]} : vector<2x128xf32> to vector<2x32xf32>
    %380 = math.tanh %378 : vector<2x32xf32>
    %381 = arith.mulf %379, %380 : vector<2x32xf32>
    %c2_i32_112 = arith.constant 2 : i32
    %382 = arith.muli %359, %c2_i32_112 : i32
    %383 = arith.index_cast %382 : i32 to index
    %c0_113 = arith.constant 0 : index
    %384 = vector.load %arg19[%383, %c0_113] : memref<16x32xf32, #tpu.memory_space<vmem>>, vector<2x32xf32>
    tpu.vector_store %arg19[%383, %c0_113], %381 {strides = array<i32>} : memref<16x32xf32, #tpu.memory_space<vmem>>, vector<2x32xf32>,
    %c7_i32_114 = arith.constant 7 : i32
    %c2_i32_115 = arith.constant 2 : i32
    %385 = arith.muli %c7_i32_114, %c2_i32_115 : i32
    %386 = arith.index_cast %385 : i32 to index
    %c0_116 = arith.constant 0 : index
    %387 = vector.load %arg17[%386, %c0_116] : memref<16x256xf32, #tpu.memory_space<vmem>>, vector<2x256xf32>
    %388 = vector.extract_strided_slice %387 {offsets = [0, 0], sizes = [2, 128], strides = [1, 1]} : vector<2x256xf32> to vector<2x128xf32>
    %cst_117 = arith.constant dense<0.000000e+00> : vector<2x128xf32>
    %389 = tpu.matmul %355, %25, %cst_117 {dimension_numbers = #tpu.dot_dimension_numbers<[1], [0], [0], [1], [0, 0, 1, 1], [], []>} : vector<2x32xf32>, vector<32x128xf32>, vector<2x128xf32> -> vector<2x128xf32>
    %390 = arith.addf %388, %389 : vector<2x128xf32>
    %391 = math.tanh %390 : vector<2x128xf32>
    %392 = arith.negf %390 : vector<2x128xf32>
    %393 = math.exp %392 : vector<2x128xf32>
    %cst_118 = arith.constant 1.000000e+00 : f32
    %394 = vector.broadcast %cst_118 : f32 to vector<2x128xf32>
    %395 = arith.addf %394, %393 : vector<2x128xf32>
    %396 = arith.divf %394, %395 : vector<2x128xf32>
    %397 = arith.select %17, %391, %396 : vector<2x128xi1>, vector<2x128xf32>
    %398 = vector.extract_strided_slice %397 {offsets = [0, 32], sizes = [2, 32], strides = [1, 1]} : vector<2x128xf32> to vector<2x32xf32>
    %399 = arith.mulf %398, %352 : vector<2x32xf32>
    %400 = vector.extract_strided_slice %397 {offsets = [0, 0], sizes = [2, 32], strides = [1, 1]} : vector<2x128xf32> to vector<2x32xf32>
    %401 = vector.extract_strided_slice %397 {offsets = [0, 64], sizes = [2, 32], strides = [1, 1]} : vector<2x128xf32> to vector<2x32xf32>
    %402 = arith.mulf %400, %401 : vector<2x32xf32>
    %403 = arith.addf %399, %402 : vector<2x32xf32>
    %404 = vector.extract_strided_slice %397 {offsets = [0, 96], sizes = [2, 32], strides = [1, 1]} : vector<2x128xf32> to vector<2x32xf32>
    %405 = math.tanh %403 : vector<2x32xf32>
    %406 = arith.mulf %404, %405 : vector<2x32xf32>
    %c2_i32_119 = arith.constant 2 : i32
    %407 = arith.muli %c7_i32_114, %c2_i32_119 : i32
    %408 = arith.index_cast %407 : i32 to index
    %c0_120 = arith.constant 0 : index
    %409 = vector.load %arg18[%408, %c0_120] : memref<16x32xf32, #tpu.memory_space<vmem>>, vector<2x32xf32>
    tpu.vector_store %arg18[%408, %c0_120], %406 {strides = array<i32>} : memref<16x32xf32, #tpu.memory_space<vmem>>, vector<2x32xf32>,
    %c7_i32_121 = arith.constant 7 : i32
    %410 = arith.subi %c7_i32_121, %c7_i32_114 : i32
    %c2_i32_122 = arith.constant 2 : i32
    %411 = arith.muli %410, %c2_i32_122 : i32
    %412 = arith.index_cast %411 : i32 to index
    %c0_123 = arith.constant 0 : index
    %413 = vector.load %arg17[%412, %c0_123] : memref<16x256xf32, #tpu.memory_space<vmem>>, vector<2x256xf32>
    %414 = vector.extract_strided_slice %413 {offsets = [0, 128], sizes = [2, 128], strides = [1, 1]} : vector<2x256xf32> to vector<2x128xf32>
    %cst_124 = arith.constant dense<0.000000e+00> : vector<2x128xf32>
    %415 = tpu.matmul %381, %27, %cst_124 {dimension_numbers = #tpu.dot_dimension_numbers<[1], [0], [0], [1], [0, 0, 1, 1], [], []>} : vector<2x32xf32>, vector<32x128xf32>, vector<2x128xf32> -> vector<2x128xf32>
    %416 = arith.addf %414, %415 : vector<2x128xf32>
    %417 = math.tanh %416 : vector<2x128xf32>
    %418 = arith.negf %416 : vector<2x128xf32>
    %419 = math.exp %418 : vector<2x128xf32>
    %cst_125 = arith.constant 1.000000e+00 : f32
    %420 = vector.broadcast %cst_125 : f32 to vector<2x128xf32>
    %421 = arith.addf %420, %419 : vector<2x128xf32>
    %422 = arith.divf %420, %421 : vector<2x128xf32>
    %423 = arith.select %17, %417, %422 : vector<2x128xi1>, vector<2x128xf32>
    %424 = vector.extract_strided_slice %423 {offsets = [0, 32], sizes = [2, 32], strides = [1, 1]} : vector<2x128xf32> to vector<2x32xf32>
    %425 = arith.mulf %424, %378 : vector<2x32xf32>
    %426 = vector.extract_strided_slice %423 {offsets = [0, 0], sizes = [2, 32], strides = [1, 1]} : vector<2x128xf32> to vector<2x32xf32>
    %427 = vector.extract_strided_slice %423 {offsets = [0, 64], sizes = [2, 32], strides = [1, 1]} : vector<2x128xf32> to vector<2x32xf32>
    %428 = arith.mulf %426, %427 : vector<2x32xf32>
    %429 = arith.addf %425, %428 : vector<2x32xf32>
    %430 = vector.extract_strided_slice %423 {offsets = [0, 96], sizes = [2, 32], strides = [1, 1]} : vector<2x128xf32> to vector<2x32xf32>
    %431 = math.tanh %429 : vector<2x32xf32>
    %432 = arith.mulf %430, %431 : vector<2x32xf32>
    %c2_i32_126 = arith.constant 2 : i32
    %433 = arith.muli %410, %c2_i32_126 : i32
    %434 = arith.index_cast %433 : i32 to index
    %c0_127 = arith.constant 0 : index
    %435 = vector.load %arg19[%434, %c0_127] : memref<16x32xf32, #tpu.memory_space<vmem>>, vector<2x32xf32>
    tpu.vector_store %arg19[%434, %c0_127], %432 {strides = array<i32>} : memref<16x32xf32, #tpu.memory_space<vmem>>, vector<2x32xf32>,
    %c8_i32 = arith.constant 8 : i32
    %c0_128 = arith.constant 0 : index
    %c0_129 = arith.constant 0 : index
    %436 = vector.load %arg18[%c0_128, %c0_129] : memref<16x32xf32, #tpu.memory_space<vmem>>, vector<16x32xf32>
    %c0_130 = arith.constant 0 : index
    %c0_131 = arith.constant 0 : index
    %437 = vector.load %arg12[%c0_130, %c0_131] : memref<64x256xf32, #tpu.memory_space<vmem>>, vector<32x256xf32>
    %cst_132 = arith.constant dense<0.000000e+00> : vector<16x256xf32>
    %438 = tpu.matmul %436, %437, %cst_132 {dimension_numbers = #tpu.dot_dimension_numbers<[1], [0], [0], [1], [0, 0, 1, 1], [], []>} : vector<16x32xf32>, vector<32x256xf32>, vector<16x256xf32> -> vector<16x256xf32>
    %c0_133 = arith.constant 0 : index
    %c0_134 = arith.constant 0 : index
    %439 = vector.load %arg19[%c0_133, %c0_134] : memref<16x32xf32, #tpu.memory_space<vmem>>, vector<16x32xf32>
    %c32 = arith.constant 32 : index
    %c0_135 = arith.constant 0 : index
    %440 = vector.load %arg12[%c32, %c0_135] : memref<64x256xf32, #tpu.memory_space<vmem>>, vector<32x256xf32>
    %cst_136 = arith.constant dense<0.000000e+00> : vector<16x256xf32>
    %441 = tpu.matmul %439, %440, %cst_136 {dimension_numbers = #tpu.dot_dimension_numbers<[1], [0], [0], [1], [0, 0, 1, 1], [], []>} : vector<16x32xf32>, vector<32x256xf32>, vector<16x256xf32> -> vector<16x256xf32>
    %442 = arith.addf %438, %441 : vector<16x256xf32>
    %c0_137 = arith.constant 0 : index
    %c0_138 = arith.constant 0 : index
    %443 = vector.load %arg14[%c0_137, %c0_138] : memref<1x256xf32, #tpu.memory_space<vmem>>, vector<1x256xf32>
    %444 = vector.broadcast %443 : vector<1x256xf32> to vector<16x256xf32>
    %445 = arith.addf %442, %444 : vector<16x256xf32>
    %c0_139 = arith.constant 0 : index
    %c0_140 = arith.constant 0 : index
    %446 = vector.load %arg17[%c0_139, %c0_140] : memref<16x256xf32, #tpu.memory_space<vmem>>, vector<16x256xf32>
    tpu.vector_store %arg17[%c0_139, %c0_140], %445 {strides = array<i32>} : memref<16x256xf32, #tpu.memory_space<vmem>>, vector<16x256xf32>,
    %c0_141 = arith.constant 0 : index
    %c0_142 = arith.constant 0 : index
    %c0_143 = arith.constant 0 : index
    %447 = vector.load %arg13[%c0_141, %c0_142, %c0_143] : memref<2x32x128xf32, #tpu.memory_space<vmem>>, vector<1x32x128xf32>
    %448 = vector.shape_cast %447 : vector<1x32x128xf32> to vector<32x128xf32>
    %c1_144 = arith.constant 1 : index
    %c0_145 = arith.constant 0 : index
    %c0_146 = arith.constant 0 : index
    %449 = vector.load %arg13[%c1_144, %c0_145, %c0_146] : memref<2x32x128xf32, #tpu.memory_space<vmem>>, vector<1x32x128xf32>
    %450 = vector.shape_cast %449 : vector<1x32x128xf32> to vector<32x128xf32>
    %c0_i32_147 = arith.constant 0 : i32
    %c2_i32_148 = arith.constant 2 : i32
    %451 = arith.muli %c0_i32_147, %c2_i32_148 : i32
    %452 = arith.index_cast %451 : i32 to index
    %c0_149 = arith.constant 0 : index
    %453 = vector.load %arg17[%452, %c0_149] : memref<16x256xf32, #tpu.memory_space<vmem>>, vector<2x256xf32>
    %454 = vector.extract_strided_slice %453 {offsets = [0, 0], sizes = [2, 128], strides = [1, 1]} : vector<2x256xf32> to vector<2x128xf32>
    %cst_150 = arith.constant dense<0.000000e+00> : vector<2x128xf32>
    %455 = tpu.matmul %5, %448, %cst_150 {dimension_numbers = #tpu.dot_dimension_numbers<[1], [0], [0], [1], [0, 0, 1, 1], [], []>} : vector<2x32xf32>, vector<32x128xf32>, vector<2x128xf32> -> vector<2x128xf32>
    %456 = arith.addf %454, %455 : vector<2x128xf32>
    %457 = math.tanh %456 : vector<2x128xf32>
    %458 = arith.negf %456 : vector<2x128xf32>
    %459 = math.exp %458 : vector<2x128xf32>
    %cst_151 = arith.constant 1.000000e+00 : f32
    %460 = vector.broadcast %cst_151 : f32 to vector<2x128xf32>
    %461 = arith.addf %460, %459 : vector<2x128xf32>
    %462 = arith.divf %460, %461 : vector<2x128xf32>
    %463 = arith.select %17, %457, %462 : vector<2x128xi1>, vector<2x128xf32>
    %464 = vector.extract_strided_slice %463 {offsets = [0, 32], sizes = [2, 32], strides = [1, 1]} : vector<2x128xf32> to vector<2x32xf32>
    %465 = arith.mulf %464, %5 : vector<2x32xf32>
    %466 = vector.extract_strided_slice %463 {offsets = [0, 0], sizes = [2, 32], strides = [1, 1]} : vector<2x128xf32> to vector<2x32xf32>
    %467 = vector.extract_strided_slice %463 {offsets = [0, 64], sizes = [2, 32], strides = [1, 1]} : vector<2x128xf32> to vector<2x32xf32>
    %468 = arith.mulf %466, %467 : vector<2x32xf32>
    %469 = arith.addf %465, %468 : vector<2x32xf32>
    %470 = vector.extract_strided_slice %463 {offsets = [0, 96], sizes = [2, 32], strides = [1, 1]} : vector<2x128xf32> to vector<2x32xf32>
    %471 = math.tanh %469 : vector<2x32xf32>
    %472 = arith.mulf %470, %471 : vector<2x32xf32>
    %c2_i32_152 = arith.constant 2 : i32
    %473 = arith.muli %c0_i32_147, %c2_i32_152 : i32
    %474 = arith.index_cast %473 : i32 to index
    %c0_153 = arith.constant 0 : index
    %475 = vector.load %arg18[%474, %c0_153] : memref<16x32xf32, #tpu.memory_space<vmem>>, vector<2x32xf32>
    tpu.vector_store %arg18[%474, %c0_153], %472 {strides = array<i32>} : memref<16x32xf32, #tpu.memory_space<vmem>>, vector<2x32xf32>,
    %c7_i32_154 = arith.constant 7 : i32
    %476 = arith.subi %c7_i32_154, %c0_i32_147 : i32
    %c2_i32_155 = arith.constant 2 : i32
    %477 = arith.muli %476, %c2_i32_155 : i32
    %478 = arith.index_cast %477 : i32 to index
    %c0_156 = arith.constant 0 : index
    %479 = vector.load %arg17[%478, %c0_156] : memref<16x256xf32, #tpu.memory_space<vmem>>, vector<2x256xf32>
    %480 = vector.extract_strided_slice %479 {offsets = [0, 128], sizes = [2, 128], strides = [1, 1]} : vector<2x256xf32> to vector<2x128xf32>
    %cst_157 = arith.constant dense<0.000000e+00> : vector<2x128xf32>
    %481 = tpu.matmul %5, %450, %cst_157 {dimension_numbers = #tpu.dot_dimension_numbers<[1], [0], [0], [1], [0, 0, 1, 1], [], []>} : vector<2x32xf32>, vector<32x128xf32>, vector<2x128xf32> -> vector<2x128xf32>
    %482 = arith.addf %480, %481 : vector<2x128xf32>
    %483 = math.tanh %482 : vector<2x128xf32>
    %484 = arith.negf %482 : vector<2x128xf32>
    %485 = math.exp %484 : vector<2x128xf32>
    %cst_158 = arith.constant 1.000000e+00 : f32
    %486 = vector.broadcast %cst_158 : f32 to vector<2x128xf32>
    %487 = arith.addf %486, %485 : vector<2x128xf32>
    %488 = arith.divf %486, %487 : vector<2x128xf32>
    %489 = arith.select %17, %483, %488 : vector<2x128xi1>, vector<2x128xf32>
    %490 = vector.extract_strided_slice %489 {offsets = [0, 32], sizes = [2, 32], strides = [1, 1]} : vector<2x128xf32> to vector<2x32xf32>
    %491 = arith.mulf %490, %5 : vector<2x32xf32>
    %492 = vector.extract_strided_slice %489 {offsets = [0, 0], sizes = [2, 32], strides = [1, 1]} : vector<2x128xf32> to vector<2x32xf32>
    %493 = vector.extract_strided_slice %489 {offsets = [0, 64], sizes = [2, 32], strides = [1, 1]} : vector<2x128xf32> to vector<2x32xf32>
    %494 = arith.mulf %492, %493 : vector<2x32xf32>
    %495 = arith.addf %491, %494 : vector<2x32xf32>
    %496 = vector.extract_strided_slice %489 {offsets = [0, 96], sizes = [2, 32], strides = [1, 1]} : vector<2x128xf32> to vector<2x32xf32>
    %497 = math.tanh %495 : vector<2x32xf32>
    %498 = arith.mulf %496, %497 : vector<2x32xf32>
    %c2_i32_159 = arith.constant 2 : i32
    %499 = arith.muli %476, %c2_i32_159 : i32
    %500 = arith.index_cast %499 : i32 to index
    %c0_160 = arith.constant 0 : index
    %501 = vector.load %arg19[%500, %c0_160] : memref<16x32xf32, #tpu.memory_space<vmem>>, vector<2x32xf32>
    tpu.vector_store %arg19[%500, %c0_160], %498 {strides = array<i32>} : memref<16x32xf32, #tpu.memory_space<vmem>>, vector<2x32xf32>,
    %c1_i32_161 = arith.constant 1 : i32
    %c2_i32_162 = arith.constant 2 : i32
    %502 = arith.muli %c1_i32_161, %c2_i32_162 : i32
    %503 = arith.index_cast %502 : i32 to index
    %c0_163 = arith.constant 0 : index
    %504 = vector.load %arg17[%503, %c0_163] : memref<16x256xf32, #tpu.memory_space<vmem>>, vector<2x256xf32>
    %505 = vector.extract_strided_slice %504 {offsets = [0, 0], sizes = [2, 128], strides = [1, 1]} : vector<2x256xf32> to vector<2x128xf32>
    %cst_164 = arith.constant dense<0.000000e+00> : vector<2x128xf32>
    %506 = tpu.matmul %472, %448, %cst_164 {dimension_numbers = #tpu.dot_dimension_numbers<[1], [0], [0], [1], [0, 0, 1, 1], [], []>} : vector<2x32xf32>, vector<32x128xf32>, vector<2x128xf32> -> vector<2x128xf32>
    %507 = arith.addf %505, %506 : vector<2x128xf32>
    %508 = math.tanh %507 : vector<2x128xf32>
    %509 = arith.negf %507 : vector<2x128xf32>
    %510 = math.exp %509 : vector<2x128xf32>
    %cst_165 = arith.constant 1.000000e+00 : f32
    %511 = vector.broadcast %cst_165 : f32 to vector<2x128xf32>
    %512 = arith.addf %511, %510 : vector<2x128xf32>
    %513 = arith.divf %511, %512 : vector<2x128xf32>
    %514 = arith.select %17, %508, %513 : vector<2x128xi1>, vector<2x128xf32>
    %515 = vector.extract_strided_slice %514 {offsets = [0, 32], sizes = [2, 32], strides = [1, 1]} : vector<2x128xf32> to vector<2x32xf32>
    %516 = arith.mulf %515, %469 : vector<2x32xf32>
    %517 = vector.extract_strided_slice %514 {offsets = [0, 0], sizes = [2, 32], strides = [1, 1]} : vector<2x128xf32> to vector<2x32xf32>
    %518 = vector.extract_strided_slice %514 {offsets = [0, 64], sizes = [2, 32], strides = [1, 1]} : vector<2x128xf32> to vector<2x32xf32>
    %519 = arith.mulf %517, %518 : vector<2x32xf32>
    %520 = arith.addf %516, %519 : vector<2x32xf32>
    %521 = vector.extract_strided_slice %514 {offsets = [0, 96], sizes = [2, 32], strides = [1, 1]} : vector<2x128xf32> to vector<2x32xf32>
    %522 = math.tanh %520 : vector<2x32xf32>
    %523 = arith.mulf %521, %522 : vector<2x32xf32>
    %c2_i32_166 = arith.constant 2 : i32
    %524 = arith.muli %c1_i32_161, %c2_i32_166 : i32
    %525 = arith.index_cast %524 : i32 to index
    %c0_167 = arith.constant 0 : index
    %526 = vector.load %arg18[%525, %c0_167] : memref<16x32xf32, #tpu.memory_space<vmem>>, vector<2x32xf32>
    tpu.vector_store %arg18[%525, %c0_167], %523 {strides = array<i32>} : memref<16x32xf32, #tpu.memory_space<vmem>>, vector<2x32xf32>,
    %c7_i32_168 = arith.constant 7 : i32
    %527 = arith.subi %c7_i32_168, %c1_i32_161 : i32
    %c2_i32_169 = arith.constant 2 : i32
    %528 = arith.muli %527, %c2_i32_169 : i32
    %529 = arith.index_cast %528 : i32 to index
    %c0_170 = arith.constant 0 : index
    %530 = vector.load %arg17[%529, %c0_170] : memref<16x256xf32, #tpu.memory_space<vmem>>, vector<2x256xf32>
    %531 = vector.extract_strided_slice %530 {offsets = [0, 128], sizes = [2, 128], strides = [1, 1]} : vector<2x256xf32> to vector<2x128xf32>
    %cst_171 = arith.constant dense<0.000000e+00> : vector<2x128xf32>
    %532 = tpu.matmul %498, %450, %cst_171 {dimension_numbers = #tpu.dot_dimension_numbers<[1], [0], [0], [1], [0, 0, 1, 1], [], []>} : vector<2x32xf32>, vector<32x128xf32>, vector<2x128xf32> -> vector<2x128xf32>
    %533 = arith.addf %531, %532 : vector<2x128xf32>
    %534 = math.tanh %533 : vector<2x128xf32>
    %535 = arith.negf %533 : vector<2x128xf32>
    %536 = math.exp %535 : vector<2x128xf32>
    %cst_172 = arith.constant 1.000000e+00 : f32
    %537 = vector.broadcast %cst_172 : f32 to vector<2x128xf32>
    %538 = arith.addf %537, %536 : vector<2x128xf32>
    %539 = arith.divf %537, %538 : vector<2x128xf32>
    %540 = arith.select %17, %534, %539 : vector<2x128xi1>, vector<2x128xf32>
    %541 = vector.extract_strided_slice %540 {offsets = [0, 32], sizes = [2, 32], strides = [1, 1]} : vector<2x128xf32> to vector<2x32xf32>
    %542 = arith.mulf %541, %495 : vector<2x32xf32>
    %543 = vector.extract_strided_slice %540 {offsets = [0, 0], sizes = [2, 32], strides = [1, 1]} : vector<2x128xf32> to vector<2x32xf32>
    %544 = vector.extract_strided_slice %540 {offsets = [0, 64], sizes = [2, 32], strides = [1, 1]} : vector<2x128xf32> to vector<2x32xf32>
    %545 = arith.mulf %543, %544 : vector<2x32xf32>
    %546 = arith.addf %542, %545 : vector<2x32xf32>
    %547 = vector.extract_strided_slice %540 {offsets = [0, 96], sizes = [2, 32], strides = [1, 1]} : vector<2x128xf32> to vector<2x32xf32>
    %548 = math.tanh %546 : vector<2x32xf32>
    %549 = arith.mulf %547, %548 : vector<2x32xf32>
    %c2_i32_173 = arith.constant 2 : i32
    %550 = arith.muli %527, %c2_i32_173 : i32
    %551 = arith.index_cast %550 : i32 to index
    %c0_174 = arith.constant 0 : index
    %552 = vector.load %arg19[%551, %c0_174] : memref<16x32xf32, #tpu.memory_space<vmem>>, vector<2x32xf32>
    tpu.vector_store %arg19[%551, %c0_174], %549 {strides = array<i32>} : memref<16x32xf32, #tpu.memory_space<vmem>>, vector<2x32xf32>,
    %c2_i32_175 = arith.constant 2 : i32
    %c2_i32_176 = arith.constant 2 : i32
    %553 = arith.muli %c2_i32_175, %c2_i32_176 : i32
    %554 = arith.index_cast %553 : i32 to index
    %c0_177 = arith.constant 0 : index
    %555 = vector.load %arg17[%554, %c0_177] : memref<16x256xf32, #tpu.memory_space<vmem>>, vector<2x256xf32>
    %556 = vector.extract_strided_slice %555 {offsets = [0, 0], sizes = [2, 128], strides = [1, 1]} : vector<2x256xf32> to vector<2x128xf32>
    %cst_178 = arith.constant dense<0.000000e+00> : vector<2x128xf32>
    %557 = tpu.matmul %523, %448, %cst_178 {dimension_numbers = #tpu.dot_dimension_numbers<[1], [0], [0], [1], [0, 0, 1, 1], [], []>} : vector<2x32xf32>, vector<32x128xf32>, vector<2x128xf32> -> vector<2x128xf32>
    %558 = arith.addf %556, %557 : vector<2x128xf32>
    %559 = math.tanh %558 : vector<2x128xf32>
    %560 = arith.negf %558 : vector<2x128xf32>
    %561 = math.exp %560 : vector<2x128xf32>
    %cst_179 = arith.constant 1.000000e+00 : f32
    %562 = vector.broadcast %cst_179 : f32 to vector<2x128xf32>
    %563 = arith.addf %562, %561 : vector<2x128xf32>
    %564 = arith.divf %562, %563 : vector<2x128xf32>
    %565 = arith.select %17, %559, %564 : vector<2x128xi1>, vector<2x128xf32>
    %566 = vector.extract_strided_slice %565 {offsets = [0, 32], sizes = [2, 32], strides = [1, 1]} : vector<2x128xf32> to vector<2x32xf32>
    %567 = arith.mulf %566, %520 : vector<2x32xf32>
    %568 = vector.extract_strided_slice %565 {offsets = [0, 0], sizes = [2, 32], strides = [1, 1]} : vector<2x128xf32> to vector<2x32xf32>
    %569 = vector.extract_strided_slice %565 {offsets = [0, 64], sizes = [2, 32], strides = [1, 1]} : vector<2x128xf32> to vector<2x32xf32>
    %570 = arith.mulf %568, %569 : vector<2x32xf32>
    %571 = arith.addf %567, %570 : vector<2x32xf32>
    %572 = vector.extract_strided_slice %565 {offsets = [0, 96], sizes = [2, 32], strides = [1, 1]} : vector<2x128xf32> to vector<2x32xf32>
    %573 = math.tanh %571 : vector<2x32xf32>
    %574 = arith.mulf %572, %573 : vector<2x32xf32>
    %c2_i32_180 = arith.constant 2 : i32
    %575 = arith.muli %c2_i32_175, %c2_i32_180 : i32
    %576 = arith.index_cast %575 : i32 to index
    %c0_181 = arith.constant 0 : index
    %577 = vector.load %arg18[%576, %c0_181] : memref<16x32xf32, #tpu.memory_space<vmem>>, vector<2x32xf32>
    tpu.vector_store %arg18[%576, %c0_181], %574 {strides = array<i32>} : memref<16x32xf32, #tpu.memory_space<vmem>>, vector<2x32xf32>,
    %c7_i32_182 = arith.constant 7 : i32
    %578 = arith.subi %c7_i32_182, %c2_i32_175 : i32
    %c2_i32_183 = arith.constant 2 : i32
    %579 = arith.muli %578, %c2_i32_183 : i32
    %580 = arith.index_cast %579 : i32 to index
    %c0_184 = arith.constant 0 : index
    %581 = vector.load %arg17[%580, %c0_184] : memref<16x256xf32, #tpu.memory_space<vmem>>, vector<2x256xf32>
    %582 = vector.extract_strided_slice %581 {offsets = [0, 128], sizes = [2, 128], strides = [1, 1]} : vector<2x256xf32> to vector<2x128xf32>
    %cst_185 = arith.constant dense<0.000000e+00> : vector<2x128xf32>
    %583 = tpu.matmul %549, %450, %cst_185 {dimension_numbers = #tpu.dot_dimension_numbers<[1], [0], [0], [1], [0, 0, 1, 1], [], []>} : vector<2x32xf32>, vector<32x128xf32>, vector<2x128xf32> -> vector<2x128xf32>
    %584 = arith.addf %582, %583 : vector<2x128xf32>
    %585 = math.tanh %584 : vector<2x128xf32>
    %586 = arith.negf %584 : vector<2x128xf32>
    %587 = math.exp %586 : vector<2x128xf32>
    %cst_186 = arith.constant 1.000000e+00 : f32
    %588 = vector.broadcast %cst_186 : f32 to vector<2x128xf32>
    %589 = arith.addf %588, %587 : vector<2x128xf32>
    %590 = arith.divf %588, %589 : vector<2x128xf32>
    %591 = arith.select %17, %585, %590 : vector<2x128xi1>, vector<2x128xf32>
    %592 = vector.extract_strided_slice %591 {offsets = [0, 32], sizes = [2, 32], strides = [1, 1]} : vector<2x128xf32> to vector<2x32xf32>
    %593 = arith.mulf %592, %546 : vector<2x32xf32>
    %594 = vector.extract_strided_slice %591 {offsets = [0, 0], sizes = [2, 32], strides = [1, 1]} : vector<2x128xf32> to vector<2x32xf32>
    %595 = vector.extract_strided_slice %591 {offsets = [0, 64], sizes = [2, 32], strides = [1, 1]} : vector<2x128xf32> to vector<2x32xf32>
    %596 = arith.mulf %594, %595 : vector<2x32xf32>
    %597 = arith.addf %593, %596 : vector<2x32xf32>
    %598 = vector.extract_strided_slice %591 {offsets = [0, 96], sizes = [2, 32], strides = [1, 1]} : vector<2x128xf32> to vector<2x32xf32>
    %599 = math.tanh %597 : vector<2x32xf32>
    %600 = arith.mulf %598, %599 : vector<2x32xf32>
    %c2_i32_187 = arith.constant 2 : i32
    %601 = arith.muli %578, %c2_i32_187 : i32
    %602 = arith.index_cast %601 : i32 to index
    %c0_188 = arith.constant 0 : index
    %603 = vector.load %arg19[%602, %c0_188] : memref<16x32xf32, #tpu.memory_space<vmem>>, vector<2x32xf32>
    tpu.vector_store %arg19[%602, %c0_188], %600 {strides = array<i32>} : memref<16x32xf32, #tpu.memory_space<vmem>>, vector<2x32xf32>,
    %c3_i32_189 = arith.constant 3 : i32
    %c2_i32_190 = arith.constant 2 : i32
    %604 = arith.muli %c3_i32_189, %c2_i32_190 : i32
    %605 = arith.index_cast %604 : i32 to index
    %c0_191 = arith.constant 0 : index
    %606 = vector.load %arg17[%605, %c0_191] : memref<16x256xf32, #tpu.memory_space<vmem>>, vector<2x256xf32>
    %607 = vector.extract_strided_slice %606 {offsets = [0, 0], sizes = [2, 128], strides = [1, 1]} : vector<2x256xf32> to vector<2x128xf32>
    %cst_192 = arith.constant dense<0.000000e+00> : vector<2x128xf32>
    %608 = tpu.matmul %574, %448, %cst_192 {dimension_numbers = #tpu.dot_dimension_numbers<[1], [0], [0], [1], [0, 0, 1, 1], [], []>} : vector<2x32xf32>, vector<32x128xf32>, vector<2x128xf32> -> vector<2x128xf32>
    %609 = arith.addf %607, %608 : vector<2x128xf32>
    %610 = math.tanh %609 : vector<2x128xf32>
    %611 = arith.negf %609 : vector<2x128xf32>
    %612 = math.exp %611 : vector<2x128xf32>
    %cst_193 = arith.constant 1.000000e+00 : f32
    %613 = vector.broadcast %cst_193 : f32 to vector<2x128xf32>
    %614 = arith.addf %613, %612 : vector<2x128xf32>
    %615 = arith.divf %613, %614 : vector<2x128xf32>
    %616 = arith.select %17, %610, %615 : vector<2x128xi1>, vector<2x128xf32>
    %617 = vector.extract_strided_slice %616 {offsets = [0, 32], sizes = [2, 32], strides = [1, 1]} : vector<2x128xf32> to vector<2x32xf32>
    %618 = arith.mulf %617, %571 : vector<2x32xf32>
    %619 = vector.extract_strided_slice %616 {offsets = [0, 0], sizes = [2, 32], strides = [1, 1]} : vector<2x128xf32> to vector<2x32xf32>
    %620 = vector.extract_strided_slice %616 {offsets = [0, 64], sizes = [2, 32], strides = [1, 1]} : vector<2x128xf32> to vector<2x32xf32>
    %621 = arith.mulf %619, %620 : vector<2x32xf32>
    %622 = arith.addf %618, %621 : vector<2x32xf32>
    %623 = vector.extract_strided_slice %616 {offsets = [0, 96], sizes = [2, 32], strides = [1, 1]} : vector<2x128xf32> to vector<2x32xf32>
    %624 = math.tanh %622 : vector<2x32xf32>
    %625 = arith.mulf %623, %624 : vector<2x32xf32>
    %c2_i32_194 = arith.constant 2 : i32
    %626 = arith.muli %c3_i32_189, %c2_i32_194 : i32
    %627 = arith.index_cast %626 : i32 to index
    %c0_195 = arith.constant 0 : index
    %628 = vector.load %arg18[%627, %c0_195] : memref<16x32xf32, #tpu.memory_space<vmem>>, vector<2x32xf32>
    tpu.vector_store %arg18[%627, %c0_195], %625 {strides = array<i32>} : memref<16x32xf32, #tpu.memory_space<vmem>>, vector<2x32xf32>,
    %c7_i32_196 = arith.constant 7 : i32
    %629 = arith.subi %c7_i32_196, %c3_i32_189 : i32
    %c2_i32_197 = arith.constant 2 : i32
    %630 = arith.muli %629, %c2_i32_197 : i32
    %631 = arith.index_cast %630 : i32 to index
    %c0_198 = arith.constant 0 : index
    %632 = vector.load %arg17[%631, %c0_198] : memref<16x256xf32, #tpu.memory_space<vmem>>, vector<2x256xf32>
    %633 = vector.extract_strided_slice %632 {offsets = [0, 128], sizes = [2, 128], strides = [1, 1]} : vector<2x256xf32> to vector<2x128xf32>
    %cst_199 = arith.constant dense<0.000000e+00> : vector<2x128xf32>
    %634 = tpu.matmul %600, %450, %cst_199 {dimension_numbers = #tpu.dot_dimension_numbers<[1], [0], [0], [1], [0, 0, 1, 1], [], []>} : vector<2x32xf32>, vector<32x128xf32>, vector<2x128xf32> -> vector<2x128xf32>
    %635 = arith.addf %633, %634 : vector<2x128xf32>
    %636 = math.tanh %635 : vector<2x128xf32>
    %637 = arith.negf %635 : vector<2x128xf32>
    %638 = math.exp %637 : vector<2x128xf32>
    %cst_200 = arith.constant 1.000000e+00 : f32
    %639 = vector.broadcast %cst_200 : f32 to vector<2x128xf32>
    %640 = arith.addf %639, %638 : vector<2x128xf32>
    %641 = arith.divf %639, %640 : vector<2x128xf32>
    %642 = arith.select %17, %636, %641 : vector<2x128xi1>, vector<2x128xf32>
    %643 = vector.extract_strided_slice %642 {offsets = [0, 32], sizes = [2, 32], strides = [1, 1]} : vector<2x128xf32> to vector<2x32xf32>
    %644 = arith.mulf %643, %597 : vector<2x32xf32>
    %645 = vector.extract_strided_slice %642 {offsets = [0, 0], sizes = [2, 32], strides = [1, 1]} : vector<2x128xf32> to vector<2x32xf32>
    %646 = vector.extract_strided_slice %642 {offsets = [0, 64], sizes = [2, 32], strides = [1, 1]} : vector<2x128xf32> to vector<2x32xf32>
    %647 = arith.mulf %645, %646 : vector<2x32xf32>
    %648 = arith.addf %644, %647 : vector<2x32xf32>
    %649 = vector.extract_strided_slice %642 {offsets = [0, 96], sizes = [2, 32], strides = [1, 1]} : vector<2x128xf32> to vector<2x32xf32>
    %650 = math.tanh %648 : vector<2x32xf32>
    %651 = arith.mulf %649, %650 : vector<2x32xf32>
    %c2_i32_201 = arith.constant 2 : i32
    %652 = arith.muli %629, %c2_i32_201 : i32
    %653 = arith.index_cast %652 : i32 to index
    %c0_202 = arith.constant 0 : index
    %654 = vector.load %arg19[%653, %c0_202] : memref<16x32xf32, #tpu.memory_space<vmem>>, vector<2x32xf32>
    tpu.vector_store %arg19[%653, %c0_202], %651 {strides = array<i32>} : memref<16x32xf32, #tpu.memory_space<vmem>>, vector<2x32xf32>,
    %c4_i32_203 = arith.constant 4 : i32
    %c2_i32_204 = arith.constant 2 : i32
    %655 = arith.muli %c4_i32_203, %c2_i32_204 : i32
    %656 = arith.index_cast %655 : i32 to index
    %c0_205 = arith.constant 0 : index
    %657 = vector.load %arg17[%656, %c0_205] : memref<16x256xf32, #tpu.memory_space<vmem>>, vector<2x256xf32>
    %658 = vector.extract_strided_slice %657 {offsets = [0, 0], sizes = [2, 128], strides = [1, 1]} : vector<2x256xf32> to vector<2x128xf32>
    %cst_206 = arith.constant dense<0.000000e+00> : vector<2x128xf32>
    %659 = tpu.matmul %625, %448, %cst_206 {dimension_numbers = #tpu.dot_dimension_numbers<[1], [0], [0], [1], [0, 0, 1, 1], [], []>} : vector<2x32xf32>, vector<32x128xf32>, vector<2x128xf32> -> vector<2x128xf32>
    %660 = arith.addf %658, %659 : vector<2x128xf32>
    %661 = math.tanh %660 : vector<2x128xf32>
    %662 = arith.negf %660 : vector<2x128xf32>
    %663 = math.exp %662 : vector<2x128xf32>
    %cst_207 = arith.constant 1.000000e+00 : f32
    %664 = vector.broadcast %cst_207 : f32 to vector<2x128xf32>
    %665 = arith.addf %664, %663 : vector<2x128xf32>
    %666 = arith.divf %664, %665 : vector<2x128xf32>
    %667 = arith.select %17, %661, %666 : vector<2x128xi1>, vector<2x128xf32>
    %668 = vector.extract_strided_slice %667 {offsets = [0, 32], sizes = [2, 32], strides = [1, 1]} : vector<2x128xf32> to vector<2x32xf32>
    %669 = arith.mulf %668, %622 : vector<2x32xf32>
    %670 = vector.extract_strided_slice %667 {offsets = [0, 0], sizes = [2, 32], strides = [1, 1]} : vector<2x128xf32> to vector<2x32xf32>
    %671 = vector.extract_strided_slice %667 {offsets = [0, 64], sizes = [2, 32], strides = [1, 1]} : vector<2x128xf32> to vector<2x32xf32>
    %672 = arith.mulf %670, %671 : vector<2x32xf32>
    %673 = arith.addf %669, %672 : vector<2x32xf32>
    %674 = vector.extract_strided_slice %667 {offsets = [0, 96], sizes = [2, 32], strides = [1, 1]} : vector<2x128xf32> to vector<2x32xf32>
    %675 = math.tanh %673 : vector<2x32xf32>
    %676 = arith.mulf %674, %675 : vector<2x32xf32>
    %c2_i32_208 = arith.constant 2 : i32
    %677 = arith.muli %c4_i32_203, %c2_i32_208 : i32
    %678 = arith.index_cast %677 : i32 to index
    %c0_209 = arith.constant 0 : index
    %679 = vector.load %arg18[%678, %c0_209] : memref<16x32xf32, #tpu.memory_space<vmem>>, vector<2x32xf32>
    tpu.vector_store %arg18[%678, %c0_209], %676 {strides = array<i32>} : memref<16x32xf32, #tpu.memory_space<vmem>>, vector<2x32xf32>,
    %c7_i32_210 = arith.constant 7 : i32
    %680 = arith.subi %c7_i32_210, %c4_i32_203 : i32
    %c2_i32_211 = arith.constant 2 : i32
    %681 = arith.muli %680, %c2_i32_211 : i32
    %682 = arith.index_cast %681 : i32 to index
    %c0_212 = arith.constant 0 : index
    %683 = vector.load %arg17[%682, %c0_212] : memref<16x256xf32, #tpu.memory_space<vmem>>, vector<2x256xf32>
    %684 = vector.extract_strided_slice %683 {offsets = [0, 128], sizes = [2, 128], strides = [1, 1]} : vector<2x256xf32> to vector<2x128xf32>
    %cst_213 = arith.constant dense<0.000000e+00> : vector<2x128xf32>
    %685 = tpu.matmul %651, %450, %cst_213 {dimension_numbers = #tpu.dot_dimension_numbers<[1], [0], [0], [1], [0, 0, 1, 1], [], []>} : vector<2x32xf32>, vector<32x128xf32>, vector<2x128xf32> -> vector<2x128xf32>
    %686 = arith.addf %684, %685 : vector<2x128xf32>
    %687 = math.tanh %686 : vector<2x128xf32>
    %688 = arith.negf %686 : vector<2x128xf32>
    %689 = math.exp %688 : vector<2x128xf32>
    %cst_214 = arith.constant 1.000000e+00 : f32
    %690 = vector.broadcast %cst_214 : f32 to vector<2x128xf32>
    %691 = arith.addf %690, %689 : vector<2x128xf32>
    %692 = arith.divf %690, %691 : vector<2x128xf32>
    %693 = arith.select %17, %687, %692 : vector<2x128xi1>, vector<2x128xf32>
    %694 = vector.extract_strided_slice %693 {offsets = [0, 32], sizes = [2, 32], strides = [1, 1]} : vector<2x128xf32> to vector<2x32xf32>
    %695 = arith.mulf %694, %648 : vector<2x32xf32>
    %696 = vector.extract_strided_slice %693 {offsets = [0, 0], sizes = [2, 32], strides = [1, 1]} : vector<2x128xf32> to vector<2x32xf32>
    %697 = vector.extract_strided_slice %693 {offsets = [0, 64], sizes = [2, 32], strides = [1, 1]} : vector<2x128xf32> to vector<2x32xf32>
    %698 = arith.mulf %696, %697 : vector<2x32xf32>
    %699 = arith.addf %695, %698 : vector<2x32xf32>
    %700 = vector.extract_strided_slice %693 {offsets = [0, 96], sizes = [2, 32], strides = [1, 1]} : vector<2x128xf32> to vector<2x32xf32>
    %701 = math.tanh %699 : vector<2x32xf32>
    %702 = arith.mulf %700, %701 : vector<2x32xf32>
    %c2_i32_215 = arith.constant 2 : i32
    %703 = arith.muli %680, %c2_i32_215 : i32
    %704 = arith.index_cast %703 : i32 to index
    %c0_216 = arith.constant 0 : index
    %705 = vector.load %arg19[%704, %c0_216] : memref<16x32xf32, #tpu.memory_space<vmem>>, vector<2x32xf32>
    tpu.vector_store %arg19[%704, %c0_216], %702 {strides = array<i32>} : memref<16x32xf32, #tpu.memory_space<vmem>>, vector<2x32xf32>,
    %c5_i32_217 = arith.constant 5 : i32
    %c2_i32_218 = arith.constant 2 : i32
    %706 = arith.muli %c5_i32_217, %c2_i32_218 : i32
    %707 = arith.index_cast %706 : i32 to index
    %c0_219 = arith.constant 0 : index
    %708 = vector.load %arg17[%707, %c0_219] : memref<16x256xf32, #tpu.memory_space<vmem>>, vector<2x256xf32>
    %709 = vector.extract_strided_slice %708 {offsets = [0, 0], sizes = [2, 128], strides = [1, 1]} : vector<2x256xf32> to vector<2x128xf32>
    %cst_220 = arith.constant dense<0.000000e+00> : vector<2x128xf32>
    %710 = tpu.matmul %676, %448, %cst_220 {dimension_numbers = #tpu.dot_dimension_numbers<[1], [0], [0], [1], [0, 0, 1, 1], [], []>} : vector<2x32xf32>, vector<32x128xf32>, vector<2x128xf32> -> vector<2x128xf32>
    %711 = arith.addf %709, %710 : vector<2x128xf32>
    %712 = math.tanh %711 : vector<2x128xf32>
    %713 = arith.negf %711 : vector<2x128xf32>
    %714 = math.exp %713 : vector<2x128xf32>
    %cst_221 = arith.constant 1.000000e+00 : f32
    %715 = vector.broadcast %cst_221 : f32 to vector<2x128xf32>
    %716 = arith.addf %715, %714 : vector<2x128xf32>
    %717 = arith.divf %715, %716 : vector<2x128xf32>
    %718 = arith.select %17, %712, %717 : vector<2x128xi1>, vector<2x128xf32>
    %719 = vector.extract_strided_slice %718 {offsets = [0, 32], sizes = [2, 32], strides = [1, 1]} : vector<2x128xf32> to vector<2x32xf32>
    %720 = arith.mulf %719, %673 : vector<2x32xf32>
    %721 = vector.extract_strided_slice %718 {offsets = [0, 0], sizes = [2, 32], strides = [1, 1]} : vector<2x128xf32> to vector<2x32xf32>
    %722 = vector.extract_strided_slice %718 {offsets = [0, 64], sizes = [2, 32], strides = [1, 1]} : vector<2x128xf32> to vector<2x32xf32>
    %723 = arith.mulf %721, %722 : vector<2x32xf32>
    %724 = arith.addf %720, %723 : vector<2x32xf32>
    %725 = vector.extract_strided_slice %718 {offsets = [0, 96], sizes = [2, 32], strides = [1, 1]} : vector<2x128xf32> to vector<2x32xf32>
    %726 = math.tanh %724 : vector<2x32xf32>
    %727 = arith.mulf %725, %726 : vector<2x32xf32>
    %c2_i32_222 = arith.constant 2 : i32
    %728 = arith.muli %c5_i32_217, %c2_i32_222 : i32
    %729 = arith.index_cast %728 : i32 to index
    %c0_223 = arith.constant 0 : index
    %730 = vector.load %arg18[%729, %c0_223] : memref<16x32xf32, #tpu.memory_space<vmem>>, vector<2x32xf32>
    tpu.vector_store %arg18[%729, %c0_223], %727 {strides = array<i32>} : memref<16x32xf32, #tpu.memory_space<vmem>>, vector<2x32xf32>,
    %c7_i32_224 = arith.constant 7 : i32
    %731 = arith.subi %c7_i32_224, %c5_i32_217 : i32
    %c2_i32_225 = arith.constant 2 : i32
    %732 = arith.muli %731, %c2_i32_225 : i32
    %733 = arith.index_cast %732 : i32 to index
    %c0_226 = arith.constant 0 : index
    %734 = vector.load %arg17[%733, %c0_226] : memref<16x256xf32, #tpu.memory_space<vmem>>, vector<2x256xf32>
    %735 = vector.extract_strided_slice %734 {offsets = [0, 128], sizes = [2, 128], strides = [1, 1]} : vector<2x256xf32> to vector<2x128xf32>
    %cst_227 = arith.constant dense<0.000000e+00> : vector<2x128xf32>
    %736 = tpu.matmul %702, %450, %cst_227 {dimension_numbers = #tpu.dot_dimension_numbers<[1], [0], [0], [1], [0, 0, 1, 1], [], []>} : vector<2x32xf32>, vector<32x128xf32>, vector<2x128xf32> -> vector<2x128xf32>
    %737 = arith.addf %735, %736 : vector<2x128xf32>
    %738 = math.tanh %737 : vector<2x128xf32>
    %739 = arith.negf %737 : vector<2x128xf32>
    %740 = math.exp %739 : vector<2x128xf32>
    %cst_228 = arith.constant 1.000000e+00 : f32
    %741 = vector.broadcast %cst_228 : f32 to vector<2x128xf32>
    %742 = arith.addf %741, %740 : vector<2x128xf32>
    %743 = arith.divf %741, %742 : vector<2x128xf32>
    %744 = arith.select %17, %738, %743 : vector<2x128xi1>, vector<2x128xf32>
    %745 = vector.extract_strided_slice %744 {offsets = [0, 32], sizes = [2, 32], strides = [1, 1]} : vector<2x128xf32> to vector<2x32xf32>
    %746 = arith.mulf %745, %699 : vector<2x32xf32>
    %747 = vector.extract_strided_slice %744 {offsets = [0, 0], sizes = [2, 32], strides = [1, 1]} : vector<2x128xf32> to vector<2x32xf32>
    %748 = vector.extract_strided_slice %744 {offsets = [0, 64], sizes = [2, 32], strides = [1, 1]} : vector<2x128xf32> to vector<2x32xf32>
    %749 = arith.mulf %747, %748 : vector<2x32xf32>
    %750 = arith.addf %746, %749 : vector<2x32xf32>
    %751 = vector.extract_strided_slice %744 {offsets = [0, 96], sizes = [2, 32], strides = [1, 1]} : vector<2x128xf32> to vector<2x32xf32>
    %752 = math.tanh %750 : vector<2x32xf32>
    %753 = arith.mulf %751, %752 : vector<2x32xf32>
    %c2_i32_229 = arith.constant 2 : i32
    %754 = arith.muli %731, %c2_i32_229 : i32
    %755 = arith.index_cast %754 : i32 to index
    %c0_230 = arith.constant 0 : index
    %756 = vector.load %arg19[%755, %c0_230] : memref<16x32xf32, #tpu.memory_space<vmem>>, vector<2x32xf32>
    tpu.vector_store %arg19[%755, %c0_230], %753 {strides = array<i32>} : memref<16x32xf32, #tpu.memory_space<vmem>>, vector<2x32xf32>,
    %c6_i32_231 = arith.constant 6 : i32
    %c2_i32_232 = arith.constant 2 : i32
    %757 = arith.muli %c6_i32_231, %c2_i32_232 : i32
    %758 = arith.index_cast %757 : i32 to index
    %c0_233 = arith.constant 0 : index
    %759 = vector.load %arg17[%758, %c0_233] : memref<16x256xf32, #tpu.memory_space<vmem>>, vector<2x256xf32>
    %760 = vector.extract_strided_slice %759 {offsets = [0, 0], sizes = [2, 128], strides = [1, 1]} : vector<2x256xf32> to vector<2x128xf32>
    %cst_234 = arith.constant dense<0.000000e+00> : vector<2x128xf32>
    %761 = tpu.matmul %727, %448, %cst_234 {dimension_numbers = #tpu.dot_dimension_numbers<[1], [0], [0], [1], [0, 0, 1, 1], [], []>} : vector<2x32xf32>, vector<32x128xf32>, vector<2x128xf32> -> vector<2x128xf32>
    %762 = arith.addf %760, %761 : vector<2x128xf32>
    %763 = math.tanh %762 : vector<2x128xf32>
    %764 = arith.negf %762 : vector<2x128xf32>
    %765 = math.exp %764 : vector<2x128xf32>
    %cst_235 = arith.constant 1.000000e+00 : f32
    %766 = vector.broadcast %cst_235 : f32 to vector<2x128xf32>
    %767 = arith.addf %766, %765 : vector<2x128xf32>
    %768 = arith.divf %766, %767 : vector<2x128xf32>
    %769 = arith.select %17, %763, %768 : vector<2x128xi1>, vector<2x128xf32>
    %770 = vector.extract_strided_slice %769 {offsets = [0, 32], sizes = [2, 32], strides = [1, 1]} : vector<2x128xf32> to vector<2x32xf32>
    %771 = arith.mulf %770, %724 : vector<2x32xf32>
    %772 = vector.extract_strided_slice %769 {offsets = [0, 0], sizes = [2, 32], strides = [1, 1]} : vector<2x128xf32> to vector<2x32xf32>
    %773 = vector.extract_strided_slice %769 {offsets = [0, 64], sizes = [2, 32], strides = [1, 1]} : vector<2x128xf32> to vector<2x32xf32>
    %774 = arith.mulf %772, %773 : vector<2x32xf32>
    %775 = arith.addf %771, %774 : vector<2x32xf32>
    %776 = vector.extract_strided_slice %769 {offsets = [0, 96], sizes = [2, 32], strides = [1, 1]} : vector<2x128xf32> to vector<2x32xf32>
    %777 = math.tanh %775 : vector<2x32xf32>
    %778 = arith.mulf %776, %777 : vector<2x32xf32>
    %c2_i32_236 = arith.constant 2 : i32
    %779 = arith.muli %c6_i32_231, %c2_i32_236 : i32
    %780 = arith.index_cast %779 : i32 to index
    %c0_237 = arith.constant 0 : index
    %781 = vector.load %arg18[%780, %c0_237] : memref<16x32xf32, #tpu.memory_space<vmem>>, vector<2x32xf32>
    tpu.vector_store %arg18[%780, %c0_237], %778 {strides = array<i32>} : memref<16x32xf32, #tpu.memory_space<vmem>>, vector<2x32xf32>,
    %c7_i32_238 = arith.constant 7 : i32
    %782 = arith.subi %c7_i32_238, %c6_i32_231 : i32
    %c2_i32_239 = arith.constant 2 : i32
    %783 = arith.muli %782, %c2_i32_239 : i32
    %784 = arith.index_cast %783 : i32 to index
    %c0_240 = arith.constant 0 : index
    %785 = vector.load %arg17[%784, %c0_240] : memref<16x256xf32, #tpu.memory_space<vmem>>, vector<2x256xf32>
    %786 = vector.extract_strided_slice %785 {offsets = [0, 128], sizes = [2, 128], strides = [1, 1]} : vector<2x256xf32> to vector<2x128xf32>
    %cst_241 = arith.constant dense<0.000000e+00> : vector<2x128xf32>
    %787 = tpu.matmul %753, %450, %cst_241 {dimension_numbers = #tpu.dot_dimension_numbers<[1], [0], [0], [1], [0, 0, 1, 1], [], []>} : vector<2x32xf32>, vector<32x128xf32>, vector<2x128xf32> -> vector<2x128xf32>
    %788 = arith.addf %786, %787 : vector<2x128xf32>
    %789 = math.tanh %788 : vector<2x128xf32>
    %790 = arith.negf %788 : vector<2x128xf32>
    %791 = math.exp %790 : vector<2x128xf32>
    %cst_242 = arith.constant 1.000000e+00 : f32
    %792 = vector.broadcast %cst_242 : f32 to vector<2x128xf32>
    %793 = arith.addf %792, %791 : vector<2x128xf32>
    %794 = arith.divf %792, %793 : vector<2x128xf32>
    %795 = arith.select %17, %789, %794 : vector<2x128xi1>, vector<2x128xf32>
    %796 = vector.extract_strided_slice %795 {offsets = [0, 32], sizes = [2, 32], strides = [1, 1]} : vector<2x128xf32> to vector<2x32xf32>
    %797 = arith.mulf %796, %750 : vector<2x32xf32>
    %798 = vector.extract_strided_slice %795 {offsets = [0, 0], sizes = [2, 32], strides = [1, 1]} : vector<2x128xf32> to vector<2x32xf32>
    %799 = vector.extract_strided_slice %795 {offsets = [0, 64], sizes = [2, 32], strides = [1, 1]} : vector<2x128xf32> to vector<2x32xf32>
    %800 = arith.mulf %798, %799 : vector<2x32xf32>
    %801 = arith.addf %797, %800 : vector<2x32xf32>
    %802 = vector.extract_strided_slice %795 {offsets = [0, 96], sizes = [2, 32], strides = [1, 1]} : vector<2x128xf32> to vector<2x32xf32>
    %803 = math.tanh %801 : vector<2x32xf32>
    %804 = arith.mulf %802, %803 : vector<2x32xf32>
    %c2_i32_243 = arith.constant 2 : i32
    %805 = arith.muli %782, %c2_i32_243 : i32
    %806 = arith.index_cast %805 : i32 to index
    %c0_244 = arith.constant 0 : index
    %807 = vector.load %arg19[%806, %c0_244] : memref<16x32xf32, #tpu.memory_space<vmem>>, vector<2x32xf32>
    tpu.vector_store %arg19[%806, %c0_244], %804 {strides = array<i32>} : memref<16x32xf32, #tpu.memory_space<vmem>>, vector<2x32xf32>,
    %c7_i32_245 = arith.constant 7 : i32
    %c2_i32_246 = arith.constant 2 : i32
    %808 = arith.muli %c7_i32_245, %c2_i32_246 : i32
    %809 = arith.index_cast %808 : i32 to index
    %c0_247 = arith.constant 0 : index
    %810 = vector.load %arg17[%809, %c0_247] : memref<16x256xf32, #tpu.memory_space<vmem>>, vector<2x256xf32>
    %811 = vector.extract_strided_slice %810 {offsets = [0, 0], sizes = [2, 128], strides = [1, 1]} : vector<2x256xf32> to vector<2x128xf32>
    %cst_248 = arith.constant dense<0.000000e+00> : vector<2x128xf32>
    %812 = tpu.matmul %778, %448, %cst_248 {dimension_numbers = #tpu.dot_dimension_numbers<[1], [0], [0], [1], [0, 0, 1, 1], [], []>} : vector<2x32xf32>, vector<32x128xf32>, vector<2x128xf32> -> vector<2x128xf32>
    %813 = arith.addf %811, %812 : vector<2x128xf32>
    %814 = math.tanh %813 : vector<2x128xf32>
    %815 = arith.negf %813 : vector<2x128xf32>
    %816 = math.exp %815 : vector<2x128xf32>
    %cst_249 = arith.constant 1.000000e+00 : f32
    %817 = vector.broadcast %cst_249 : f32 to vector<2x128xf32>
    %818 = arith.addf %817, %816 : vector<2x128xf32>
    %819 = arith.divf %817, %818 : vector<2x128xf32>
    %820 = arith.select %17, %814, %819 : vector<2x128xi1>, vector<2x128xf32>
    %821 = vector.extract_strided_slice %820 {offsets = [0, 32], sizes = [2, 32], strides = [1, 1]} : vector<2x128xf32> to vector<2x32xf32>
    %822 = arith.mulf %821, %775 : vector<2x32xf32>
    %823 = vector.extract_strided_slice %820 {offsets = [0, 0], sizes = [2, 32], strides = [1, 1]} : vector<2x128xf32> to vector<2x32xf32>
    %824 = vector.extract_strided_slice %820 {offsets = [0, 64], sizes = [2, 32], strides = [1, 1]} : vector<2x128xf32> to vector<2x32xf32>
    %825 = arith.mulf %823, %824 : vector<2x32xf32>
    %826 = arith.addf %822, %825 : vector<2x32xf32>
    %827 = vector.extract_strided_slice %820 {offsets = [0, 96], sizes = [2, 32], strides = [1, 1]} : vector<2x128xf32> to vector<2x32xf32>
    %828 = math.tanh %826 : vector<2x32xf32>
    %829 = arith.mulf %827, %828 : vector<2x32xf32>
    %c2_i32_250 = arith.constant 2 : i32
    %830 = arith.muli %c7_i32_245, %c2_i32_250 : i32
    %831 = arith.index_cast %830 : i32 to index
    %c0_251 = arith.constant 0 : index
    %832 = vector.load %arg18[%831, %c0_251] : memref<16x32xf32, #tpu.memory_space<vmem>>, vector<2x32xf32>
    tpu.vector_store %arg18[%831, %c0_251], %829 {strides = array<i32>} : memref<16x32xf32, #tpu.memory_space<vmem>>, vector<2x32xf32>,
    %c7_i32_252 = arith.constant 7 : i32
    %833 = arith.subi %c7_i32_252, %c7_i32_245 : i32
    %c2_i32_253 = arith.constant 2 : i32
    %834 = arith.muli %833, %c2_i32_253 : i32
    %835 = arith.index_cast %834 : i32 to index
    %c0_254 = arith.constant 0 : index
    %836 = vector.load %arg17[%835, %c0_254] : memref<16x256xf32, #tpu.memory_space<vmem>>, vector<2x256xf32>
    %837 = vector.extract_strided_slice %836 {offsets = [0, 128], sizes = [2, 128], strides = [1, 1]} : vector<2x256xf32> to vector<2x128xf32>
    %cst_255 = arith.constant dense<0.000000e+00> : vector<2x128xf32>
    %838 = tpu.matmul %804, %450, %cst_255 {dimension_numbers = #tpu.dot_dimension_numbers<[1], [0], [0], [1], [0, 0, 1, 1], [], []>} : vector<2x32xf32>, vector<32x128xf32>, vector<2x128xf32> -> vector<2x128xf32>
    %839 = arith.addf %837, %838 : vector<2x128xf32>
    %840 = math.tanh %839 : vector<2x128xf32>
    %841 = arith.negf %839 : vector<2x128xf32>
    %842 = math.exp %841 : vector<2x128xf32>
    %cst_256 = arith.constant 1.000000e+00 : f32
    %843 = vector.broadcast %cst_256 : f32 to vector<2x128xf32>
    %844 = arith.addf %843, %842 : vector<2x128xf32>
    %845 = arith.divf %843, %844 : vector<2x128xf32>
    %846 = arith.select %17, %840, %845 : vector<2x128xi1>, vector<2x128xf32>
    %847 = vector.extract_strided_slice %846 {offsets = [0, 32], sizes = [2, 32], strides = [1, 1]} : vector<2x128xf32> to vector<2x32xf32>
    %848 = arith.mulf %847, %801 : vector<2x32xf32>
    %849 = vector.extract_strided_slice %846 {offsets = [0, 0], sizes = [2, 32], strides = [1, 1]} : vector<2x128xf32> to vector<2x32xf32>
    %850 = vector.extract_strided_slice %846 {offsets = [0, 64], sizes = [2, 32], strides = [1, 1]} : vector<2x128xf32> to vector<2x32xf32>
    %851 = arith.mulf %849, %850 : vector<2x32xf32>
    %852 = arith.addf %848, %851 : vector<2x32xf32>
    %853 = vector.extract_strided_slice %846 {offsets = [0, 96], sizes = [2, 32], strides = [1, 1]} : vector<2x128xf32> to vector<2x32xf32>
    %854 = math.tanh %852 : vector<2x32xf32>
    %855 = arith.mulf %853, %854 : vector<2x32xf32>
    %c2_i32_257 = arith.constant 2 : i32
    %856 = arith.muli %833, %c2_i32_257 : i32
    %857 = arith.index_cast %856 : i32 to index
    %c0_258 = arith.constant 0 : index
    %858 = vector.load %arg19[%857, %c0_258] : memref<16x32xf32, #tpu.memory_space<vmem>>, vector<2x32xf32>
    tpu.vector_store %arg19[%857, %c0_258], %855 {strides = array<i32>} : memref<16x32xf32, #tpu.memory_space<vmem>>, vector<2x32xf32>,
    %c8_i32_259 = arith.constant 8 : i32
    %c0_260 = arith.constant 0 : index
    %c0_261 = arith.constant 0 : index
    %859 = vector.load %arg18[%c0_260, %c0_261] : memref<16x32xf32, #tpu.memory_space<vmem>>, vector<16x32xf32>
    %860 = vector.shape_cast %859 : vector<16x32xf32> to vector<8x2x32xf32>
    %c0_262 = arith.constant 0 : index
    %c0_263 = arith.constant 0 : index
    %861 = vector.load %arg19[%c0_262, %c0_263] : memref<16x32xf32, #tpu.memory_space<vmem>>, vector<16x32xf32>
    %862 = vector.shape_cast %861 : vector<16x32xf32> to vector<8x2x32xf32>
    %c0_264 = arith.constant 0 : index
    %c0_265 = arith.constant 0 : index
    %863 = vector.load %arg7[%c0_264, %c0_265] : memref<64x2xf32, #tpu.memory_space<vmem>>, vector<64x2xf32>
    %c0_266 = arith.constant 0 : index
    %c0_267 = arith.constant 0 : index
    %864 = vector.load %arg8[%c0_266, %c0_267] : memref<1x2xf32, #tpu.memory_space<vmem>>, vector<1x2xf32>
    %865 = vector.extract_strided_slice %860 {offsets = [0, 0, 0], sizes = [8, 1, 32], strides = [1, 1, 1]} : vector<8x2x32xf32> to vector<8x1x32xf32>
    %866 = vector.shape_cast %865 : vector<8x1x32xf32> to vector<8x32xf32>
    %867 = vector.extract_strided_slice %862 {offsets = [0, 0, 0], sizes = [8, 1, 32], strides = [1, 1, 1]} : vector<8x2x32xf32> to vector<8x1x32xf32>
    %868 = vector.shape_cast %867 : vector<8x1x32xf32> to vector<8x32xf32>
    %cst_268 = arith.constant dense<0.000000e+00> : vector<8x8xf32>
    %869 = tpu.matmul %866, %866, %cst_268 {dimension_numbers = #tpu.dot_dimension_numbers<[1], [1], [0], [0], [0, 0, 1, 0], [], []>} : vector<8x32xf32>, vector<8x32xf32>, vector<8x8xf32> -> vector<8x8xf32>
    %cst_269 = arith.constant dense<0.000000e+00> : vector<8x8xf32>
    %870 = tpu.matmul %868, %868, %cst_269 {dimension_numbers = #tpu.dot_dimension_numbers<[1], [1], [0], [0], [0, 0, 1, 0], [], []>} : vector<8x32xf32>, vector<8x32xf32>, vector<8x8xf32> -> vector<8x8xf32>
    %871 = arith.addf %869, %870 : vector<8x8xf32>
    %cst_270 = arith.constant 1.250000e-01 : f32
    %872 = vector.broadcast %cst_270 : f32 to vector<8x8xf32>
    %873 = arith.mulf %871, %872 : vector<8x8xf32>
    %cst_271 = arith.constant dense<0xFF800000> : vector<8xf32>
    %874 = vector.multi_reduction <maximumf>, %873, %cst_271 [1] : vector<8x8xf32> to vector<8xf32>
    %875 = vector.shape_cast %874 : vector<8xf32> to vector<8x1xf32>
    %876 = vector.broadcast %875 : vector<8x1xf32> to vector<8x8xf32>
    %877 = arith.subf %873, %876 : vector<8x8xf32>
    %878 = math.exp %877 : vector<8x8xf32>
    %cst_272 = arith.constant dense<0.000000e+00> : vector<8xf32>
    %879 = vector.multi_reduction <add>, %878, %cst_272 [1] : vector<8x8xf32> to vector<8xf32>
    %880 = vector.shape_cast %879 : vector<8xf32> to vector<8x1xf32>
    %881 = tpu.reciprocal %880 {approx = true} : vector<8x1xf32> -> vector<8x1xf32>
    %882 = vector.broadcast %881 : vector<8x1xf32> to vector<8x8xf32>
    %883 = arith.mulf %878, %882 : vector<8x8xf32>
    %c0_273 = arith.constant 0 : index
    %c0_274 = arith.constant 0 : index
    %c0_275 = arith.constant 0 : index
    %884 = vector.load %arg16[%c0_273, %c0_274, %c0_275] : memref<2x8x8xf32, #tpu.memory_space<vmem>>, vector<1x8x8xf32>
    %885 = vector.shape_cast %884 : vector<1x8x8xf32> to vector<8x8xf32>
    %886 = vector.shape_cast %883 : vector<8x8xf32> to vector<1x8x8xf32>
    tpu.vector_store %arg16[%c0_273, %c0_274, %c0_275], %886 {strides = array<i32>} : memref<2x8x8xf32, #tpu.memory_space<vmem>>, vector<1x8x8xf32>,
    %cst_276 = arith.constant dense<0.000000e+00> : vector<8xf32>
    %887 = vector.multi_reduction <add>, %883, %cst_276 [0] : vector<8x8xf32> to vector<8xf32>
    %888 = vector.shape_cast %887 : vector<8xf32> to vector<1x8xf32>
    %cst_277 = arith.constant dense<0.000000e+00> : vector<1x32xf32>
    %889 = tpu.matmul %888, %866, %cst_277 {dimension_numbers = #tpu.dot_dimension_numbers<[1], [0], [0], [1], [0, 0, 1, 1], [], []>} : vector<1x8xf32>, vector<8x32xf32>, vector<1x32xf32> -> vector<1x32xf32>
    %cst_278 = arith.constant dense<0.000000e+00> : vector<1x32xf32>
    %890 = tpu.matmul %888, %868, %cst_278 {dimension_numbers = #tpu.dot_dimension_numbers<[1], [0], [0], [1], [0, 0, 1, 1], [], []>} : vector<1x8xf32>, vector<8x32xf32>, vector<1x32xf32> -> vector<1x32xf32>
    %891 = vector.extract_strided_slice %863 {offsets = [0, 0], sizes = [32, 2], strides = [1, 1]} : vector<64x2xf32> to vector<32x2xf32>
    %cst_279 = arith.constant dense<0.000000e+00> : vector<1x2xf32>
    %892 = tpu.matmul %889, %891, %cst_279 {dimension_numbers = #tpu.dot_dimension_numbers<[1], [0], [0], [1], [0, 0, 1, 1], [], []>} : vector<1x32xf32>, vector<32x2xf32>, vector<1x2xf32> -> vector<1x2xf32>
    %893 = vector.extract_strided_slice %863 {offsets = [32, 0], sizes = [32, 2], strides = [1, 1]} : vector<64x2xf32> to vector<32x2xf32>
    %cst_280 = arith.constant dense<0.000000e+00> : vector<1x2xf32>
    %894 = tpu.matmul %890, %893, %cst_280 {dimension_numbers = #tpu.dot_dimension_numbers<[1], [0], [0], [1], [0, 0, 1, 1], [], []>} : vector<1x32xf32>, vector<32x2xf32>, vector<1x2xf32> -> vector<1x2xf32>
    %895 = arith.addf %892, %894 : vector<1x2xf32>
    %896 = arith.addf %895, %864 : vector<1x2xf32>
    %c0_281 = arith.constant 0 : index
    %c0_282 = arith.constant 0 : index
    %897 = vector.load %arg15[%c0_281, %c0_282] : memref<2x2xf32, #tpu.memory_space<vmem>>, vector<1x2xf32>
    tpu.vector_store %arg15[%c0_281, %c0_282], %896 {strides = array<i32>} : memref<2x2xf32, #tpu.memory_space<vmem>>, vector<1x2xf32>,
    %898 = vector.extract_strided_slice %860 {offsets = [0, 1, 0], sizes = [8, 1, 32], strides = [1, 1, 1]} : vector<8x2x32xf32> to vector<8x1x32xf32>
    %899 = vector.shape_cast %898 : vector<8x1x32xf32> to vector<8x32xf32>
    %900 = vector.extract_strided_slice %862 {offsets = [0, 1, 0], sizes = [8, 1, 32], strides = [1, 1, 1]} : vector<8x2x32xf32> to vector<8x1x32xf32>
    %901 = vector.shape_cast %900 : vector<8x1x32xf32> to vector<8x32xf32>
    %cst_283 = arith.constant dense<0.000000e+00> : vector<8x8xf32>
    %902 = tpu.matmul %899, %899, %cst_283 {dimension_numbers = #tpu.dot_dimension_numbers<[1], [1], [0], [0], [0, 0, 1, 0], [], []>} : vector<8x32xf32>, vector<8x32xf32>, vector<8x8xf32> -> vector<8x8xf32>
    %cst_284 = arith.constant dense<0.000000e+00> : vector<8x8xf32>
    %903 = tpu.matmul %901, %901, %cst_284 {dimension_numbers = #tpu.dot_dimension_numbers<[1], [1], [0], [0], [0, 0, 1, 0], [], []>} : vector<8x32xf32>, vector<8x32xf32>, vector<8x8xf32> -> vector<8x8xf32>
    %904 = arith.addf %902, %903 : vector<8x8xf32>
    %cst_285 = arith.constant 1.250000e-01 : f32
    %905 = vector.broadcast %cst_285 : f32 to vector<8x8xf32>
    %906 = arith.mulf %904, %905 : vector<8x8xf32>
    %cst_286 = arith.constant dense<0xFF800000> : vector<8xf32>
    %907 = vector.multi_reduction <maximumf>, %906, %cst_286 [1] : vector<8x8xf32> to vector<8xf32>
    %908 = vector.shape_cast %907 : vector<8xf32> to vector<8x1xf32>
    %909 = vector.broadcast %908 : vector<8x1xf32> to vector<8x8xf32>
    %910 = arith.subf %906, %909 : vector<8x8xf32>
    %911 = math.exp %910 : vector<8x8xf32>
    %cst_287 = arith.constant dense<0.000000e+00> : vector<8xf32>
    %912 = vector.multi_reduction <add>, %911, %cst_287 [1] : vector<8x8xf32> to vector<8xf32>
    %913 = vector.shape_cast %912 : vector<8xf32> to vector<8x1xf32>
    %914 = tpu.reciprocal %913 {approx = true} : vector<8x1xf32> -> vector<8x1xf32>
    %915 = vector.broadcast %914 : vector<8x1xf32> to vector<8x8xf32>
    %916 = arith.mulf %911, %915 : vector<8x8xf32>
    %c1_288 = arith.constant 1 : index
    %c0_289 = arith.constant 0 : index
    %c0_290 = arith.constant 0 : index
    %917 = vector.load %arg16[%c1_288, %c0_289, %c0_290] : memref<2x8x8xf32, #tpu.memory_space<vmem>>, vector<1x8x8xf32>
    %918 = vector.shape_cast %917 : vector<1x8x8xf32> to vector<8x8xf32>
    %919 = vector.shape_cast %916 : vector<8x8xf32> to vector<1x8x8xf32>
    tpu.vector_store %arg16[%c1_288, %c0_289, %c0_290], %919 {strides = array<i32>} : memref<2x8x8xf32, #tpu.memory_space<vmem>>, vector<1x8x8xf32>,
    %cst_291 = arith.constant dense<0.000000e+00> : vector<8xf32>
    %920 = vector.multi_reduction <add>, %916, %cst_291 [0] : vector<8x8xf32> to vector<8xf32>
    %921 = vector.shape_cast %920 : vector<8xf32> to vector<1x8xf32>
    %cst_292 = arith.constant dense<0.000000e+00> : vector<1x32xf32>
    %922 = tpu.matmul %921, %899, %cst_292 {dimension_numbers = #tpu.dot_dimension_numbers<[1], [0], [0], [1], [0, 0, 1, 1], [], []>} : vector<1x8xf32>, vector<8x32xf32>, vector<1x32xf32> -> vector<1x32xf32>
    %cst_293 = arith.constant dense<0.000000e+00> : vector<1x32xf32>
    %923 = tpu.matmul %921, %901, %cst_293 {dimension_numbers = #tpu.dot_dimension_numbers<[1], [0], [0], [1], [0, 0, 1, 1], [], []>} : vector<1x8xf32>, vector<8x32xf32>, vector<1x32xf32> -> vector<1x32xf32>
    %924 = vector.extract_strided_slice %863 {offsets = [0, 0], sizes = [32, 2], strides = [1, 1]} : vector<64x2xf32> to vector<32x2xf32>
    %cst_294 = arith.constant dense<0.000000e+00> : vector<1x2xf32>
    %925 = tpu.matmul %922, %924, %cst_294 {dimension_numbers = #tpu.dot_dimension_numbers<[1], [0], [0], [1], [0, 0, 1, 1], [], []>} : vector<1x32xf32>, vector<32x2xf32>, vector<1x2xf32> -> vector<1x2xf32>
    %926 = vector.extract_strided_slice %863 {offsets = [32, 0], sizes = [32, 2], strides = [1, 1]} : vector<64x2xf32> to vector<32x2xf32>
    %cst_295 = arith.constant dense<0.000000e+00> : vector<1x2xf32>
    %927 = tpu.matmul %923, %926, %cst_295 {dimension_numbers = #tpu.dot_dimension_numbers<[1], [0], [0], [1], [0, 0, 1, 1], [], []>} : vector<1x32xf32>, vector<32x2xf32>, vector<1x2xf32> -> vector<1x2xf32>
    %928 = arith.addf %925, %927 : vector<1x2xf32>
    %929 = arith.addf %928, %864 : vector<1x2xf32>
    %c1_296 = arith.constant 1 : index
    %c0_297 = arith.constant 0 : index
    %930 = vector.load %arg15[%c1_296, %c0_297] : memref<2x2xf32, #tpu.memory_space<vmem>>, vector<1x2xf32>
    tpu.vector_store %arg15[%c1_296, %c0_297], %929 {strides = array<i32>} : memref<2x2xf32, #tpu.memory_space<vmem>>, vector<1x2xf32>,
    return
  }
  func.func @transform_0(%arg0: i32) -> (i32, i32) {
    %c0_i32 = arith.constant 0 : i32
    %c0_i32_0 = arith.constant 0 : i32
    %c0_i32_1 = arith.constant 0 : i32
    return %c0_i32, %c0_i32_0 : i32, i32
  }
  func.func @transform_1(%arg0: i32) -> (i32, i32) {
    %c0_i32 = arith.constant 0 : i32
    %c0_i32_0 = arith.constant 0 : i32
    %c0_i32_1 = arith.constant 0 : i32
    return %c0_i32, %c0_i32_0 : i32, i32
  }
  func.func @transform_2(%arg0: i32) -> (i32, i32) {
    %c0_i32 = arith.constant 0 : i32
    %c0_i32_0 = arith.constant 0 : i32
    %c0_i32_1 = arith.constant 0 : i32
    return %c0_i32, %c0_i32_0 : i32, i32
  }
  func.func @transform_3(%arg0: i32) -> (i32, i32) {
    %c0_i32 = arith.constant 0 : i32
    %c0_i32_0 = arith.constant 0 : i32
    %c0_i32_1 = arith.constant 0 : i32
    return %c0_i32, %c0_i32_0 : i32, i32
  }
  func.func @transform_4(%arg0: i32) -> (i32, i32) {
    %c0_i32 = arith.constant 0 : i32
    %c0_i32_0 = arith.constant 0 : i32
    %c0_i32_1 = arith.constant 0 : i32
    return %c0_i32, %c0_i32_0 : i32, i32
  }
  func.func @transform_5(%arg0: i32) -> (i32, i32) {
    %c0_i32 = arith.constant 0 : i32
    %c0_i32_0 = arith.constant 0 : i32
    %c0_i32_1 = arith.constant 0 : i32
    return %c0_i32, %c0_i32_0 : i32, i32
  }
  func.func @transform_6(%arg0: i32) -> (i32, i32) {
    %c0_i32 = arith.constant 0 : i32
    %c0_i32_0 = arith.constant 0 : i32
    %c0_i32_1 = arith.constant 0 : i32
    return %c0_i32, %c0_i32_0 : i32, i32
  }
  func.func @transform_7(%arg0: i32) -> (i32, i32) {
    %c0_i32 = arith.constant 0 : i32
    %c0_i32_0 = arith.constant 0 : i32
    %c0_i32_1 = arith.constant 0 : i32
    return %c0_i32, %c0_i32_0 : i32, i32
  }
  func.func @transform_8(%arg0: i32) -> (i32, i32) {
    %c0_i32 = arith.constant 0 : i32
    %c0_i32_0 = arith.constant 0 : i32
    %c0_i32_1 = arith.constant 0 : i32
    return %c0_i32, %c0_i32_0 : i32, i32
  }
  func.func @transform_9(%arg0: i32) -> (i32, i32, i32) {
    %c0_i32 = arith.constant 0 : i32
    %c0_i32_0 = arith.constant 0 : i32
    %c0_i32_1 = arith.constant 0 : i32
    %c0_i32_2 = arith.constant 0 : i32
    return %c0_i32, %c0_i32_0, %c0_i32_1 : i32, i32, i32
  }
  func.func @transform_10(%arg0: i32) -> (i32, i32) {
    %c0_i32 = arith.constant 0 : i32
    %c0_i32_0 = arith.constant 0 : i32
    %c0_i32_1 = arith.constant 0 : i32
    return %c0_i32, %c0_i32_0 : i32, i32
  }
  func.func @transform_11(%arg0: i32) -> (i32, i32) {
    %c0_i32 = arith.constant 0 : i32
    %c0_i32_0 = arith.constant 0 : i32
    %c0_i32_1 = arith.constant 0 : i32
    return %c0_i32, %c0_i32_0 : i32, i32
  }
  func.func @transform_12(%arg0: i32) -> (i32, i32, i32) {
    %c0_i32 = arith.constant 0 : i32
    %c0_i32_0 = arith.constant 0 : i32
    %c0_i32_1 = arith.constant 0 : i32
    %c0_i32_2 = arith.constant 0 : i32
    return %c0_i32, %c0_i32_0, %c0_i32_1 : i32, i32, i32
  }
  func.func @transform_13(%arg0: i32) -> (i32, i32) {
    %c0_i32 = arith.constant 0 : i32
    %c0_i32_0 = arith.constant 0 : i32
    %c0_i32_1 = arith.constant 0 : i32
    return %c0_i32, %c0_i32_0 : i32, i32
  }
  func.func @transform_14(%arg0: i32) -> (i32, i32) {
    %c0_i32 = arith.constant 0 : i32
    %c0_i32_0 = arith.constant 0 : i32
    %c0_i32_1 = arith.constant 0 : i32
    return %c0_i32, %c0_i32_0 : i32, i32
  }
  func.func @transform_15(%arg0: i32) -> (i32, i32, i32) {
    %c0_i32 = arith.constant 0 : i32
    %c0_i32_0 = arith.constant 0 : i32
    %c0_i32_1 = arith.constant 0 : i32
    %c0_i32_2 = arith.constant 0 : i32
    return %c0_i32, %c0_i32_0, %c0_i32_1 : i32, i32, i32
  }
}

</mosaic_0001>

<bundles_post_ra>
// kernel: forward.1
= control target key start
LH: loop header
LB: loop body
LE: loop exit
PB: predicated region body
PF: predicated region fallthrough
CT: control target
= control target key end

     0   :  { %21 = vsyncpa [#allocation6], 0  ;;  %v7114_v43 = vmov 1983009808   ;;  %v162_v45 = vlaneseq  ;;  %vm418_vm0 = vcmask 1043456   ;;  %vm411_vm1 = vcmask 162816   ;;  %s8613_s0 = inlined_call_operand.vmem [shape: f32[2,768], index: 0, kind: input, shape index: {}]   ;;  %s8614_s1 = inlined_call_operand.vmem [shape: f32[16,20], index: 1, kind: input, shape index: {}]   ;;  %s8615_s2 = inlined_call_operand.vmem [shape: f32[768,32], index: 2, kind: input, shape index: {}]   ;;  %s8616_s3 = inlined_call_operand.vmem [shape: f32[1,32], index: 3, kind: input, shape index: {}]   ;;  %s8617_s4 = inlined_call_operand.vmem [shape: f32[20,40], index: 4, kind: input, shape index: {}]   ;;  %s8618_s5 = inlined_call_operand.vmem [shape: f32[1,40], index: 5, kind: input, shape index: {}]   ;;  %s8619_s6 = inlined_call_operand.vmem [shape: f32[64,2], index: 6, kind: input, shape index: {}]   ;;  %s8620_s7 = inlined_call_operand.vmem [shape: f32[1,2], index: 7, kind: input, shape index: {}]   ;;  %s8621_s8 = inlined_call_operand.vmem [shape: f32[40,256], index: 8, kind: input, shape index: {}]   ;;  %s8622_s9 = inlined_call_operand.vmem [shape: f32[2,32,128], index: 9, kind: input, shape index: {}]   ;;  %s8623_s10 = inlined_call_operand.vmem [shape: f32[1,256], index: 10, kind: input, shape index: {}]   ;;  %s8624_s11 = inlined_call_operand.vmem [shape: f32[64,256], index: 11, kind: input, shape index: {}]   ;;  %s8625_s12 = inlined_call_operand.vmem [shape: f32[2,32,128], index: 12, kind: input, shape index: {}]   ;;  %s8626_s13 = inlined_call_operand.vmem [shape: f32[1,256], index: 13, kind: input, shape index: {}]   ;;  %s8627_s14 = inlined_call_operand.hbm [shape: f32[2,2], index: 14, kind: output, shape index: {0}]   ;;  %s8628_s15 = inlined_call_operand.hbm [shape: f32[2,8,8], index: 15, kind: output, shape index: {1}]  }
   0x1   :  { %v69_v0 = vld [vmem:[%s8615_s2 + $0x80] sm:$0xff]  ;;  %v70_v1 = vld [vmem:[%s8615_s2 + $0x88] sm:$0xff]  ;;  %v71_v11 = vld [vmem:[%s8615_s2 + $0x90] sm:$0xff]  ;;  %v160_v44 = vunpack.c.l.s4 %v7114_v43 }
   0x2   :  { %v53_v2 = vld [vmem:[%s8615_s2] sm:$0xff]  ;;  %v6439_v3 = vpack.c.bf16 %v70_v1, %v69_v0  ;;  %v54_v4 = vld [vmem:[%s8615_s2 + $0x8] sm:$0xff]  ;;  %v72_v13 = vld [vmem:[%s8615_s2 + $0x98] sm:$0xff]  ;;  %v7322_v60 = vshrl.u32 %v162_v45, 7 }
   0x3   :  { %v101_v5 = vld [vmem:[%s8615_s2 + $0x180] sm:$0xff]  ;;  %v102_v6 = vld [vmem:[%s8615_s2 + $0x188] sm:$0xff]  ;;  %v6441_v7 = vpack.c.bf16 %v54_v4, %v53_v2  ;;  %v55_v14 = vld [vmem:[%s8615_s2 + $0x10] sm:$0xff]  ;;  %v6443_v16 = vpack.c.bf16 %v72_v13, %v71_v11  ;;  %v161_v59 = vunpack.c.0.s8 %v160_v44 }
   0x4   :  { %v6471_v8 = vpack.c.bf16 %v102_v6, %v101_v5  ;;  %v85_v9 = vld [vmem:[%s8615_s2 + $0x100] sm:$0xff]  ;;  %v86_v10 = vld [vmem:[%s8615_s2 + $0x108] sm:$0xff]  ;;  %6440 = vmatprep.subr.bf16.mxu0 %v6439_v3  ;;  %v56_v15 = vld [vmem:[%s8615_s2 + $0x18] sm:$0xff] }
   0x5   :  { %v6473_v12 = vpack.c.bf16 %v86_v10, %v85_v9  ;;  %6442 = vmatpush3.bf16.msra.mxu0 %v6441_v7  ;;  %v6445_v17 = vpack.c.bf16 %v56_v15, %v55_v14  ;;  %v103_v18 = vld [vmem:[%s8615_s2 + $0x190] sm:$0xff]  ;;  %v104_v19 = vld [vmem:[%s8615_s2 + $0x198] sm:$0xff]  ;;  %v73_v23 = vld [vmem:[%s8615_s2 + $0xa0] sm:$0xff]  ;;  %v7352_v10 = vsub.s32 %v161_v59, %v7322_v60 }
   0x6   :  { %6472 = vmatprep.subr.bf16.mxu1 %v6471_v8  ;;  %v87_v20 = vld [vmem:[%s8615_s2 + $0x110] sm:$0xff]  ;;  %v6475_v21 = vpack.c.bf16 %v104_v19, %v103_v18  ;;  %v88_v22 = vld [vmem:[%s8615_s2 + $0x118] sm:$0xff]  ;;  %v74_v24 = vld [vmem:[%s8615_s2 + $0xa8] sm:$0xff]  ;;  %6444 = vmatprep.subr.bf16.mxu0 %v6443_v16 }
   0x7   :  { %6474 = vmatpush3.bf16.msra.mxu1 %v6473_v12  ;;  %v6477_v25 = vpack.c.bf16 %v88_v22, %v87_v20  ;;  %v6447_v26 = vpack.c.bf16 %v74_v24, %v73_v23  ;;  %v57_v27 = vld [vmem:[%s8615_s2 + $0x20] sm:$0xff]  ;;  %v58_v28 = vld [vmem:[%s8615_s2 + $0x28] sm:$0xff]  ;;  %v75_v35 = vld [vmem:[%s8615_s2 + $0xb0] sm:$0xff] }
   0x8   :  { %v105_v29 = vld [vmem:[%s8615_s2 + $0x1a0] sm:$0xff]  ;;  %6476 = vmatprep.subr.bf16.mxu1 %v6475_v21  ;;  %v106_v30 = vld [vmem:[%s8615_s2 + $0x1a8] sm:$0xff]  ;;  %v6449_v33 = vpack.c.bf16 %v58_v28, %v57_v27  ;;  %v76_v36 = vld [vmem:[%s8615_s2 + $0xb8] sm:$0xff] }
   0x9   :  { %v89_v31 = vld [vmem:[%s8615_s2 + $0x120] sm:$0xff]  ;;  %v90_v32 = vld [vmem:[%s8615_s2 + $0x128] sm:$0xff]  ;;  %6446 = vmatpush3.bf16.msra.mxu0 %v6445_v17  ;;  %v6479_v34 = vpack.c.bf16 %v106_v30, %v105_v29  ;;  %v59_v37 = vld [vmem:[%s8615_s2 + $0x30] sm:$0xff]  ;;  %v6451_v39 = vpack.c.bf16 %v76_v36, %v75_v35 }
   0xa   :  { %6448 = vmatprep.subr.bf16.mxu0 %v6447_v26  ;;  %v6481_v38 = vpack.c.bf16 %v90_v32, %v89_v31  ;;  %v60_v40 = vld [vmem:[%s8615_s2 + $0x38] sm:$0xff]  ;;  %v107_v41 = vld [vmem:[%s8615_s2 + $0x1b0] sm:$0xff]  ;;  %v77_v49 = vld [vmem:[%s8615_s2 + $0xc0] sm:$0xff] }
   0xb   :  { %6478 = vmatpush3.bf16.msra.mxu1 %v6477_v25  ;;  %v108_v42 = vld [vmem:[%s8615_s2 + $0x1b8] sm:$0xff]  ;;  %v91_v47 = vld [vmem:[%s8615_s2 + $0x130] sm:$0xff]  ;;  %v78_v50 = vld [vmem:[%s8615_s2 + $0xc8] sm:$0xff]  ;;  %v6453_v51 = vpack.c.bf16 %v60_v40, %v59_v37 }
   0xc   :  { %6480 = vmatprep.subr.bf16.mxu1 %v6479_v34  ;;  %v6483_v46 = vpack.c.bf16 %v108_v42, %v107_v41  ;;  %v92_v48 = vld [vmem:[%s8615_s2 + $0x138] sm:$0xff]  ;;  %v109_v52 = vld [vmem:[%s8615_s2 + $0x1c0] sm:$0xff]  ;;  %v110_v53 = vld [vmem:[%s8615_s2 + $0x1c8] sm:$0xff]  ;;  %v6455_v55 = vpack.c.bf16 %v78_v50, %v77_v49 }
   0xd   :  { %6450 = vmatpush3.bf16.msra.mxu0 %v6449_v33  ;;  %v6485_v54 = vpack.c.bf16 %v92_v48, %v91_v47  ;;  %v61_v56 = vld [vmem:[%s8615_s2 + $0x40] sm:$0xff]  ;;  %v62_v57 = vld [vmem:[%s8615_s2 + $0x48] sm:$0xff]  ;;  %v6487_v61 = vpack.c.bf16 %v110_v53, %v109_v52  ;;  %v79_v63 = vld [vmem:[%s8615_s2 + $0xd0] sm:$0xff] }
   0xe   :  { %6452 = vmatprep.subr.bf16.mxu0 %v6451_v39  ;;  %v93_v58 = vld [vmem:[%s8615_s2 + $0x140] sm:$0xff]  ;;  %v94_v62 = vld [vmem:[%s8615_s2 + $0x148] sm:$0xff]  ;;  %v80_v0 = vld [vmem:[%s8615_s2 + $0xd8] sm:$0xff]  ;;  %v6457_v3 = vpack.c.bf16 %v62_v57, %v61_v56 }
   0xf   :  { %6482 = vmatpush3.bf16.msra.mxu1 %v6481_v38  ;;  %v111_v1 = vld [vmem:[%s8615_s2 + $0x1d0] sm:$0xff]  ;;  %v112_v2 = vld [vmem:[%s8615_s2 + $0x1d8] sm:$0xff]  ;;  %v6489_v5 = vpack.c.bf16 %v94_v62, %v93_v58  ;;  %v6459_v6 = vpack.c.bf16 %v80_v0, %v79_v63  ;;  %v81_v12 = vld [vmem:[%s8615_s2 + $0xe0] sm:$0xff] }
  0x10   :  { %6484 = vmatprep.subr.bf16.mxu1 %v6483_v46  ;;  %v63_v4 = vld [vmem:[%s8615_s2 + $0x50] sm:$0xff]  ;;  %v64_v7 = vld [vmem:[%s8615_s2 + $0x58] sm:$0xff]  ;;  %v6491_v11 = vpack.c.bf16 %v112_v2, %v111_v1  ;;  %v82_v13 = vld [vmem:[%s8615_s2 + $0xe8] sm:$0xff] }
  0x11   :  { %6454 = vmatpush3.bf16.msra.mxu0 %v6453_v51  ;;  %v95_v8 = vld [vmem:[%s8615_s2 + $0x150] sm:$0xff]  ;;  %v96_v9 = vld [vmem:[%s8615_s2 + $0x158] sm:$0xff]  ;;  %v113_v14 = vld [vmem:[%s8615_s2 + $0x1e0] sm:$0xff]  ;;  %v6461_v16 = vpack.c.bf16 %v64_v7, %v63_v4  ;;  %v6463_v19 = vpack.c.bf16 %v82_v13, %v81_v12 }
  0x12   :  { %6456 = vmatprep.subr.bf16.mxu0 %v6455_v55  ;;  %v114_v15 = vld [vmem:[%s8615_s2 + $0x1e8] sm:$0xff]  ;;  %v6493_v17 = vpack.c.bf16 %v96_v9, %v95_v8  ;;  %v51_v18 = vld [vmem:[%s8613_s0] sm:$0xff]  ;;  %v83_v27 = vld [vmem:[%s8615_s2 + $0xf0] sm:$0xff] }
  0x13   :  { %6486 = vmatpush3.bf16.msra.mxu1 %v6485_v54  ;;  %v65_v20 = vld [vmem:[%s8615_s2 + $0x60] sm:$0xff]  ;;  %v66_v21 = vld [vmem:[%s8615_s2 + $0x68] sm:$0xff]  ;;  %v165_v23 = vrot.slane %v51_v18, %v7352_v10  ;;  %v158_v24 = vcombine.high %v51_v18, %v51_v18  ;;  %v6495_v25 = vpack.c.bf16 %v114_v15, %v113_v14  ;;  %v84_v28 = vld [vmem:[%s8615_s2 + $0xf8] sm:$0xff] }
  0x14   :  { %6488 = vmatprep.subr.bf16.mxu1 %v6487_v61  ;;  %v97_v22 = vld [vmem:[%s8615_s2 + $0x160] sm:$0xff]  ;;  %v98_v26 = vld [vmem:[%s8615_s2 + $0x168] sm:$0xff]  ;;  %v115_v29 = vld [vmem:[%s8615_s2 + $0x1f0] sm:$0xff]  ;;  %v6465_v33 = vpack.c.bf16 %v66_v21, %v65_v20  ;;  %v6467_v35 = vpack.c.bf16 %v84_v28, %v83_v27 }
  0x15   :  { %6458 = vmatpush3.bf16.msra.mxu0 %v6457_v3  ;;  %v116_v30 = vld [vmem:[%s8615_s2 + $0x1f8] sm:$0xff]  ;;  %v173_v31 = vcombine.high %v165_v23, %v165_v23  ;;  %v172_v32 = vrot.slane %v158_v24, %v7352_v10  ;;  %v6497_v34 = vpack.c.bf16 %v98_v26, %v97_v22  ;;  %v67_v36 = vld [vmem:[%s8615_s2 + $0x70] sm:$0xff]  ;;  %v133_v42 = vld [vmem:[%s8615_s2 + $0x280] sm:$0xff] }
  0x16   :  { %6460 = vmatprep.subr.bf16.mxu0 %v6459_v6  ;;  %v68_v37 = vld [vmem:[%s8615_s2 + $0x78] sm:$0xff]  ;;  %v99_v38 = vld [vmem:[%s8615_s2 + $0x170] sm:$0xff]  ;;  %v6499_v40 = vpack.c.bf16 %v116_v30, %v115_v29  ;;  %v134_v43 = vld [vmem:[%s8615_s2 + $0x288] sm:$0xff] }
  0x17   :  { %6490 = vmatpush3.bf16.msra.mxu1 %v6489_v5  ;;  %v174_v39 = vcombine.high %v172_v32, %v172_v32  ;;  %253 = vmatprep.mubr.f32.mxu0 %v173_v31  ;;  %v100_v41 = vld [vmem:[%s8615_s2 + $0x178] sm:$0xff]  ;;  %v401_v44 = vld [vmem:[%s8617_s4] sm:$0xff]  ;;  %v402_v46 = vld [vmem:[%s8617_s4 + $0x8] sm:$0xff]  ;;  %v6469_v47 = vpack.c.bf16 %v68_v37, %v67_v36  ;;  %v6503_v49 = vpack.c.bf16 %v134_v43, %v133_v42 }
  0x18   :  { %6492 = vmatprep.subr.bf16.mxu1 %v6491_v11  ;;  %v6501_v48 = vpack.c.bf16 %v100_v41, %v99_v38  ;;  %v117_v50 = vld [vmem:[%s8615_s2 + $0x200] sm:$0xff]  ;;  %v118_v51 = vld [vmem:[%s8615_s2 + $0x208] sm:$0xff]  ;;  %v135_v52 = vld [vmem:[%s8615_s2 + $0x290] sm:$0xff]  ;;  %v6535_v54 = vpack.c.bf16 %v402_v46, %v401_v44 }
  0x19   :  { %6462 = vmatpush3.bf16.msra.mxu0 %v6461_v16  ;;  %323 = vmatprep.mubr.f32.mxu1 %v174_v39  ;;  %v136_v53 = vld [vmem:[%s8615_s2 + $0x298] sm:$0xff]  ;;  %v6505_v55 = vpack.c.bf16 %v118_v51, %v117_v50  ;;  %v119_v57 = vld [vmem:[%s8615_s2 + $0x210] sm:$0xff]  ;;  %v137_v59 = vld [vmem:[%s8615_s2 + $0x2a0] sm:$0xff] }
  0x1a   :  { %6464 = vmatprep.subr.bf16.mxu0 %v6463_v19  ;;  %v6507_v56 = vpack.c.bf16 %v136_v53, %v135_v52  ;;  %v120_v58 = vld [vmem:[%s8615_s2 + $0x218] sm:$0xff]  ;;  %v138_v61 = vld [vmem:[%s8615_s2 + $0x2a8] sm:$0xff]  ;;  %v403_v63 = vld [vmem:[%s8617_s4 + $0x10] sm:$0xf] }
  0x1b   :  { %6494 = vmatpush3.bf16.msra.mxu1 %v6493_v17  ;;  %v7446_v62 = vld.sshfl [vmem:[%s8613_s0 + $0x8] sm:$0x33 pattern:$0x76325410]  ;;  %v399_v0 = vld [vmem:[%s8614_s1] sm:$0xff] }
  0x1c   :  { %6496 = vmatprep.subr.bf16.mxu1 %v6495_v25  ;;  %v182_v1 = vcombine.high %v7446_v62, %v7446_v62 }
  0x1d   :  { %6466 = vmatpush3.bf16.msra.mxu0 %v6465_v33 }
  0x1e   :  { %6468 = vmatprep.subr.bf16.mxu0 %v6467_v35 }
  0x1f   :  { %6498 = vmatpush3.bf16.msra.mxu1 %v6497_v34 }
  0x20   :  { %6500 = vmatprep.subr.bf16.mxu1 %v6499_v40 }
  0x21   :  { %6470 = vmatpush3.bf16.msra.mxu0 %v6469_v47 }
  0x22   :  { %6504 = vmatprep.subr.bf16.mxu0 %v6503_v49 }
  0x23   :  { %6502 = vmatpush3.bf16.msra.mxu1 %v6501_v48 }
  0x24   :  { %6536 = vmatprep.subr.bf16.mxu1 %v6535_v54  ;;  %254 = vmatmul.mubr.f32.vlgmr.msra.gmra.mrb[0].mxu0 %v165_v23 }
  0x25   :  { %22 = vsyncpa [#allocation8], 0  ;;  %6506 = vmatpush3.bf16.msra.mxu0 %v6505_v55  ;;  %v6509_v2 = vpack.c.bf16 %v120_v58, %v119_v57  ;;  %v6511_v3 = vpack.c.bf16 %v138_v61, %v137_v59  ;;  %v121_v4 = vld [vmem:[%s8615_s2 + $0x220] sm:$0xff]  ;;  %v122_v5 = vld [vmem:[%s8615_s2 + $0x228] sm:$0xff]  ;;  %393 = vmatprep.mubr.f32.mxu0 %v182_v1  ;;  %v7115_v52 = vmov 0.0   ;;  %v7116_v58 = vmov 0.0|0.0  }
  0x26   :  { %324 = vmatmul.mubr.f32.vlgmr.msra.gmra.mrb[0].mxu1 %v172_v32  ;;  %6508 = vmatprep.subr.bf16.mxu0 %v6507_v56  ;;  %v139_v6 = vld [vmem:[%s8615_s2 + $0x2b0] sm:$0xff]  ;;  %v140_v7 = vld [vmem:[%s8615_s2 + $0x2b8] sm:$0xff]  ;;  %v400_v8 = vld [vmem:[%s8614_s1 + $0x8] sm:$0xff]  ;;  %v6513_v9 = vpack.c.bf16 %v122_v5, %v121_v4  ;;  %vm7117_vm2 = vmmov 0   ;;  %vm524_vm3 = vcmask 326656   ;;  %vm622_vm4 = vcmask 261120  }
  0x27   :  { %6538 = vmatpush3.bf16.msra.mxu1 %v6535_v54  ;;  %6000 = vmatprep.mubr.msk.f32.mxu1 %vm411_vm1, %v399_v0  ;;  %v6515_v11 = vpack.c.bf16 %v140_v7, %v139_v6  ;;  %v123_v12 = vld [vmem:[%s8615_s2 + $0x230] sm:$0xff]  ;;  %v124_v13 = vld [vmem:[%s8615_s2 + $0x238] sm:$0xff]  ;;  %v141_v14 = vld [vmem:[%s8615_s2 + $0x2c0] sm:$0xff]  ;;  %s7118_s20 = smov 32   ;;  %vm729_vm8 = vcmask 254976   ;;  %vm839_vm9 = vcmask 261126  }
  0x28   :  { %5998 = vmatprep.subr.msk.mxu1 %vm418_vm0, %v403_v63  ;;  %v142_v15 = vld [vmem:[%s8615_s2 + $0x2c8] sm:$0xff]  ;;  %v6517_v16 = vpack.c.bf16 %v124_v13, %v123_v12  ;;  %v125_v18 = vld [vmem:[%s8615_s2 + $0x240] sm:$0xff]  ;;  %v143_v20 = vld [vmem:[%s8615_s2 + $0x2d0] sm:$0xff]  ;;  %vm1064_vm10 = vcmask 259076   ;;  %vm950_vm11 = vcmask 257026   ;;  %vm4510_vm12 = vcmask 1041409  }
  0x29   :  { %6510 = vmatpush3.bf16.msra.mxu0 %v6509_v2  ;;  %v6519_v17 = vpack.c.bf16 %v142_v15, %v141_v14  ;;  %v126_v19 = vld [vmem:[%s8615_s2 + $0x248] sm:$0xff]  ;;  %v144_v21 = vld [vmem:[%s8615_s2 + $0x2d8] sm:$0xff]  ;;  %v127_v24 = vld [vmem:[%s8615_s2 + $0x250] sm:$0xff]  ;;  %vm4512_vm13 = vcmask 1042434   ;;  %vm4514_vm14 = vcmask 1043459   ;;  %vm4516_vm15 = vcmask 1044484  }
  0x2a   :  { %6512 = vmatprep.subr.bf16.mxu0 %v6511_v3  ;;  %v6521_v22 = vpack.c.bf16 %v126_v19, %v125_v18  ;;  %v6523_v23 = vpack.c.bf16 %v144_v21, %v143_v20  ;;  %v128_v25 = vld [vmem:[%s8615_s2 + $0x258] sm:$0xff]  ;;  %v145_v26 = vld [vmem:[%s8615_s2 + $0x2e0] sm:$0xff]  ;;  %v146_v27 = vld [vmem:[%s8615_s2 + $0x2e8] sm:$0xff] }
  0x2b   :  { %5999 = vmatpush3.msk.msra.mxu1 %vm418_vm0, %v403_v63  ;;  %v6525_v28 = vpack.c.bf16 %v128_v25, %v127_v24  ;;  %v6527_v29 = vpack.c.bf16 %v146_v27, %v145_v26  ;;  %v129_v30 = vld [vmem:[%s8615_s2 + $0x260] sm:$0xff]  ;;  %v130_v31 = vld [vmem:[%s8615_s2 + $0x268] sm:$0xff]  ;;  %v147_v32 = vld [vmem:[%s8615_s2 + $0x2f0] sm:$0xff]  ;;  %v7635_v25 = vsub.s32 0, %v7322_v60  ;;  %v7638_v26 = vsub.s32 1, %v7322_v60 }
  0x2c   :  { %6001 = vmatmul.mubr.msk.f32.vlgmr.msra.gmra.mrb[2].mxu1 %vm411_vm1, %v400_v8  ;;  %v148_v33 = vld [vmem:[%s8615_s2 + $0x2f8] sm:$0xff]  ;;  %v6529_v34 = vpack.c.bf16 %v130_v31, %v129_v30  ;;  %v131_v36 = vld [vmem:[%s8615_s2 + $0x270] sm:$0xff]  ;;  %v503_v39 = vld [vmem:[%s8621_s8 + $0x8] sm:$0xff]  ;;  %vm4518_vm0 = vcmask 1045509   ;;  %vm4520_vm1 = vcmask 1046534  }
  0x2d   :  { %6514 = vmatpush3.bf16.msra.mxu0 %v6513_v9  ;;  %v6531_v35 = vpack.c.bf16 %v148_v33, %v147_v32  ;;  %v132_v37 = vld [vmem:[%s8615_s2 + $0x278] sm:$0xff]  ;;  %v502_v41 = vld [vmem:[%s8621_s8] sm:$0xff]  ;;  %v504_v43 = vld [vmem:[%s8621_s8 + $0x10] sm:$0xff]  ;;  %595 = vmatprep.mubr.f32.mxu1 %v7115_v52 }
  0x2e   :  { %6516 = vmatprep.subr.bf16.mxu0 %v6515_v11  ;;  %v6533_v38 = vpack.c.bf16 %v132_v37, %v131_v36  ;;  %v505_v40 = vld [vmem:[%s8621_s8 + $0x18] sm:$0xff]  ;;  %v507_v44 = vld [vmem:[%s8621_s8 + $0x28] sm:$0xff]  ;;  %v6541_v47 = vpack.c.bf16 %v504_v43, %v502_v41  ;;  %v506_v49 = vld [vmem:[%s8621_s8 + $0x20] sm:$0xff] }
  0x2f   :  { %v6539_v42 = vpack.c.bf16 %v505_v40, %v503_v39  ;;  %v509_v46 = vld [vmem:[%s8621_s8 + $0x38] sm:$0xff]  ;;  %v508_v50 = vld [vmem:[%s8621_s8 + $0x30] sm:$0xff]  ;;  %v511_v53 = vld [vmem:[%s8621_s8 + $0x48] sm:$0xff] }
  0x30   :  { %v6543_v48 = vpack.c.bf16 %v509_v46, %v507_v44  ;;  %v6545_v51 = vpack.c.bf16 %v508_v50, %v506_v49  ;;  %v510_v54 = vld [vmem:[%s8621_s8 + $0x40] sm:$0xff]  ;;  %v613_v56 = vld [vmem:[%s8622_s9 + $0x8] sm:$0xff]  ;;  %v614_v59 = vld [vmem:[%s8622_s9 + $0x10] sm:$0xff] }
  0x31   :  { %6518 = vmatpush3.bf16.msra.mxu0 %v6517_v16  ;;  %6540 = vmatprep.subr.bf16.mxu1 %v6539_v42  ;;  %v612_v55 = vld [vmem:[%s8622_s9] sm:$0xff]  ;;  %v615_v61 = vld [vmem:[%s8622_s9 + $0x18] sm:$0xff]  ;;  %v5597_v16 = vld [vmem:[%s8622_s9 + $0x28] sm:$0xff] }
  0x32   :  { %6520 = vmatprep.subr.bf16.mxu0 %v6519_v17  ;;  %6542 = vmatpush1.bf16.msra.mxu1 %v6541_v47  ;;  %v7567_v57 = vpack.c.bf16 %v613_v56, %v612_v55  ;;  %v5588_v0 = vld [vmem:[%s8616_s3] ss:$0 sm:$0xff]  ;;  %v5598_v21 = vld [vmem:[%s8622_s9 + $0x30] sm:$0xff] }
  0x33   :  { %6544 = vmatprep.subr.bf16.mxu1 %v6543_v48  ;;  %v5590_v8 = vld [vmem:[%s8618_s5] ss:$0 sm:$0xff] }
  0x34   :  { %v5596_v15 = vld [vmem:[%s8622_s9 + $0x20] sm:$0xff] }
  0x35   :  { %6522 = vmatpush3.bf16.msra.mxu0 %v6521_v22  ;;  %v7604_v19 = vpack.c.bf16 %v5597_v16, %v5596_v15  ;;  %v5599_v22 = vld [vmem:[%s8622_s9 + $0x38] sm:$0xff]  ;;  %v512_v27 = vld [vmem:[%s8623_s10] sm:$0x3]  ;;  %s7119_s10 = smov 64  }
  0x36   :  { %6524 = vmatprep.subr.bf16.mxu0 %v6523_v23  ;;  %6546 = vmatpush1.bf16.msra.mxu1 %v6545_v51  ;;  %v7618_v24 = vpack.c.bf16 %v5599_v22, %v5598_v21 }
  0x37   :  { %539 = vmatprep.subr.mxu1 %v511_v53 }
  0x39   :  { %6526 = vmatpush3.bf16.msra.mxu0 %v6525_v28  ;;  %v517_v28 = vrot.slane %v512_v27, %v7635_v25 }
  0x3a   :  { %6528 = vmatprep.subr.bf16.mxu0 %v6527_v29  ;;  %540 = vmatpush1.msra.mxu1 %v510_v54  ;;  %v521_v29 = vrot.slane %v512_v27, %v7638_v26  ;;  %v498_v54 = vand.u32 127, %v162_v45 }
  0x3b   :  { %6547 = vmatprep.subr.bf16.mxu1 %v7116_v58 }
  0x3c   :  { %vm499_vm5 = vcmp.ge.s32.totalorder %v498_v54, 64  ;;  %vm500_vm6 = vcmp.lt.s32.totalorder %v498_v54, 96 }
  0x3d   :  { %6530 = vmatpush3.bf16.msra.mxu0 %v6529_v34  ;;  %vm7646_vm7 = vmand %vm499_vm5, %vm500_vm6  ;;  %vm4708_vm5 = vcmask 64512   ;;  %vm5020_vm6 = vcmask 8192  }
  0x3e   :  { %6532 = vmatprep.subr.bf16.mxu0 %v6531_v35 }
  0x41   :  { %6534 = vmatpush3.bf16.msra.mxu0 %v6533_v38 }
  0x42   :  { %6559 = vmatprep.subr.bf16.mxu0 %v7116_v58 }
  0x44   :  { %394 = vmatmul.mubr.f32.vlgmr.msra.gmra.mrb[2].mxu0 %v7446_v62  ;;  %v7579_v62 = vpack.c.bf16 %v615_v61, %v614_v59 }
  0x45   :  { %6561 = vmatpush3.bf16.msra.mxu0 %v7567_v57  ;;  %6033 = vmatprep.mubr.msk.f32.mxu0 %vm7117_vm2, %v7115_v52 }
  0x46   :  { %6562 = vmatprep.subr.bf16.mxu0 %v7116_v58 }
  0x49   :  { %6564 = vmatpush3.bf16.msra.mxu0 %v7579_v62 }
  0x4a   :  { %6571 = vmatprep.subr.bf16.mxu0 %v7116_v58 }
  0xf7   :  { %v5720_v63 = vpop.f32.mrb[0].mxu0 }
  0xf8   :  { %v5721_v1 = vpop.f32.mrb[1].mxu0 }
  0xf9   :  { %v5755_v2 = vpop.f32.mrb[0].mxu1  ;;  %v5722_v3 = vadd.f32 %v5721_v1, %v5720_v63 }
  0xfa   :  { %v5756_v4 = vpop.f32.mrb[1].mxu1 }
  0xfb   :  { %v5757_v5 = vadd.f32 %v5756_v4, %v5755_v2  ;;  %v256_v6 = vadd.f32 %v5722_v3, %v5588_v0 }
  0xfd   :  { %v326_v7 = vadd.f32 %v5757_v5, %v256_v6 }
  0xff   :  { %v6002_v9 = vpop.f32.mrb[2].mxu1 }
 0x100   :  { %v488_v11 = vpop.f32.mrb[3].mxu1  ;;  %v494_v13 = vadd.f32 %v6002_v9, %v5590_v8 }
 0x101   :  { %v489_v12 = vadd.f32 %v5590_v8, %v488_v11 }
 0x103   :  { %5594 = vmatmul.mubr.msk.f32.vlgmr.msra.gmra.mrb[4].mxu1 %vm524_vm3, %v489_v12 }
 0x104   :  { %601 = vmatprep.mubr.f32.mxu1 %v7115_v52  ;;  %6549 = vmatpush3.bf16.msra.mxu1 %v7567_v57 }
 0x105   :  { %6550 = vmatprep.subr.bf16.mxu1 %v7116_v58 }
 0x107   :  { %5595 = vmatmul.mubr.msk.f32.gmra.mrb[6].mxu1 %vm524_vm3, %v494_v13  ;;  %vm4522_vm3 = vcmask 1047559  }
 0x108   :  { %6552 = vmatpush3.bf16.msra.mxu1 %v7579_v62  ;;  %6011 = vmatprep.mubr.msk.f32.mxu1 %vm7117_vm2, %v7115_v52 }
 0x109   :  { %6553 = vmatprep.subr.bf16.mxu1 %v7116_v58 }
 0x117   :  { %v5790_v14 = vpop.f32.mrb[2].mxu0 }
 0x118   :  { %v5791_v17 = vpop.f32.mrb[3].mxu0 }
 0x119   :  { %v5792_v18 = vadd.f32 %v5791_v17, %v5790_v14 }
 0x11b   :  { %v7606_v20 = vadd.f32 %v5792_v18, %v326_v7 }
 0x11d   :  { %6012 = vmatmul.mubr.msk.f32.vlgmr.msra.gmra.mrb[8].mxu1 %vm622_vm4, %v7606_v20  ;;  %v814_v23 = vrot.slane %v7606_v20, 2 }
 0x11e   :  { %6555 = vmatpush3.bf16.msra.mxu1 %v7604_v19  ;;  %6022 = vmatprep.mubr.msk.f32.mxu1 %vm7117_vm2, %v7115_v52 }
 0x11f   :  { %815 = vrot.lane.b32.xlu1 %v814_v23, %s7118_s20  ;;  %6556 = vmatprep.subr.bf16.mxu1 %v7116_v58 }
 0x122   :  { %6558 = vmatpush3.bf16.msra.mxu1 %v7618_v24 }
 0x123   :  { %6565 = vmatprep.subr.bf16.mxu1 %v7116_v58 }
 0x125   :  { %6023 = vmatmul.mubr.msk.f32.vlgmr.msra.gmra.mrb[10].mxu1 %vm622_vm4, %v7606_v20 }
 0x126   :  { %6567 = vmatpush3.bf16.msra.mxu1 %v7604_v19  ;;  %6044 = vmatprep.mubr.msk.f32.mxu1 %vm7117_vm2, %v7115_v52 }
 0x127   :  { %6568 = vmatprep.subr.bf16.mxu1 %v7116_v58 }
 0x12a   :  { %6570 = vmatpush3.bf16.msra.mxu1 %v7618_v24 }
 0x12b   :  { %6577 = vmatprep.subr.bf16.mxu1 %v7116_v58 }
 0x191   :  { %v7660_v5 = vpop.permute.xlu1 %815 }
 0x1d6   :  { %v597_v30 = vpop.f32.mrb[4].mxu1 }
 0x1d7   :  { %v598_v31 = vadd.f32 %v597_v30, %v517_v28  ;;  %v599_v32 = vpop.f32.mrb[5].mxu1 }
 0x1d8   :  { %v600_v33 = vadd.f32 %v599_v32, %v521_v29 }
 0x1d9   :  { %608 = vst [vmem:[#allocation2] sm:$0xff] %v598_v31 }
 0x1da   :  { %609 = vst [vmem:[#allocation2 + $0x8] sm:$0xff] %v600_v33  ;;  %v603_v34 = vpop.f32.mrb[6].mxu1 }
 0x1db   :  { %v604_v35 = vadd.f32 %v603_v34, %v517_v28  ;;  %v605_v36 = vpop.f32.mrb[7].mxu1 }
 0x1dc   :  { %v606_v37 = vadd.f32 %v605_v36, %v521_v29 }
 0x1dd   :  { %610 = vst [vmem:[#allocation2 + $0x10] sm:$0xff] %v604_v35 }
 0x1de   :  { %611 = vst [vmem:[#allocation2 + $0x18] sm:$0xff] %v606_v37 }
 0x1e0   :  { %v621_v39 = vld [vmem:[#allocation2] sm:$0x3]  ;;  %v841_v36 = vld [vmem:[#allocation2] sm:$0xc] }
 0x1e5   :  { %v731_v46 = vld [vmem:[#allocation2 + $0x18] sm:$0xc0]  ;;  %v952_v31 = vld [vmem:[#allocation2 + $0x18] sm:$0x30] }
 0x1f0   :  { %v692_v60 = vpop.f32.mrb[8].mxu1 }
 0x1f1   :  { %v6013_v38 = vpop.f32.mrb[9].mxu1  ;;  %v696_v40 = vadd.f32 %v692_v60, %v621_v39 }
 0x1f3   :  { %v5601_v42 = vmul.f32 -1.442695, %v696_v40 }
 0x1f5   :  { %6802 = vpow2.f32 %v5601_v42 }
 0x1f8   :  { %v798_v41 = vpop.f32.mrb[10].mxu1 }
 0x1f9   :  { %v803_v43 = vrot.slane %v798_v41, 2  ;;  %v6024_v44 = vpop.f32.mrb[11].mxu1 }
 0x1fb   :  { %v805_v47 = vadd.f32 %v803_v43, %v731_v46 }
 0x1fd   :  { %v5603_v48 = vmul.f32 -1.442695, %v805_v47 }
 0x1ff   :  { %6804 = vpow2.f32 %v5603_v48  ;;  %v6803_v49 = vpop.eup %6802 }
 0x200   :  { %v701_v51 = vadd.f32 1.0, %v6803_v49  ;;  %6806 = vtanh.f32 %v805_v47 }
 0x209   :  { %v6805_v50 = vpop.eup %6804 }
 0x20a   :  { %v810_v53 = vadd.f32 1.0, %v6805_v50  ;;  %v6807_v55 = vpop.eup %6806 }
 0x20c   :  { %6808 = vrcp.f32 %v810_v53 }
 0x20d   :  { %6810 = vrcp.f32 %v701_v51 }
 0x20e   :  { %6812 = vtanh.f32 %v696_v40 }
 0x216   :  { %v6809_v56 = vpop.eup %6808 }
 0x217   :  { %v813_v61 = vsel %vm7646_vm7, %v6807_v55, %v6809_v56  ;;  %v6811_v63 = vpop.eup %6810 }
 0x218   :  { %820 = vrot.lane.b32.xlu0 %v813_v61, %s7119_s10  ;;  %v6813_v0 = vpop.eup %6812  ;;  %v818_v6 = vmul.f32 %v7660_v5, %v813_v61 }
 0x219   :  { %v704_v45 = vsel %vm7646_vm7, %v6813_v0, %v6811_v63 }
 0x21c   :  { %710 = vrot.lane.b32.xlu0 %v704_v45, %s7119_s10 }
 0x220   :  { %705 = vrot.lane.b32.xlu0 %v7606_v20, %s7118_s20 }
 0x28a   :  { %v821_v1 = vpop.permute.xlu0 %820 }
 0x28b   :  { %v823_v2 = vmul.f32 %v821_v1, %v813_v61 }
 0x28d   :  { %825 = vrot.lane.b32.xlu1 %v823_v2, %s7118_s20 }
 0x28e   :  { %v711_v3 = vpop.permute.xlu0 %710 }
 0x28f   :  { %v713_v4 = vmul.f32 %v711_v3, %v704_v45 }
 0x291   :  { %715 = vrot.lane.b32.xlu1 %v713_v4, %s7118_s20 }
 0x292   :  { %v7663_v7 = vpop.permute.xlu0 %705 }
 0x293   :  { %v708_v11 = vmul.f32 %v7663_v7, %v704_v45 }
 0x2ff   :  { %v826_v8 = vpop.permute.xlu1 %825 }
 0x300   :  { %v7665_v9 = vadd.f32 %v826_v8, %v818_v6 }
 0x302   :  { %6814 = vtanh.f32 %v7665_v9  ;;  %v1041_v55 = vrot.slane %v7665_v9, 2 }
 0x303   :  { %v716_v12 = vpop.permute.xlu1 %715 }
 0x304   :  { %v7669_v13 = vadd.f32 %v716_v12, %v708_v11 }
 0x306   :  { %6816 = vtanh.f32 %v7669_v13  ;;  %v927_v56 = vrot.slane %v7669_v13, 6 }
 0x30c   :  { %v6815_v14 = vpop.eup %6814 }
 0x30d   :  { %831 = vrot.lane.b32.xlu0 %v6815_v14, %s7119_s10 }
 0x310   :  { %v6817_v15 = vpop.eup %6816 }
 0x311   :  { %721 = vrot.lane.b32.xlu1 %v6817_v15, %s7119_s10 }
 0x37f   :  { %v832_v16 = vpop.permute.xlu0 %831 }
 0x380   :  { %v7674_v17 = vmul.f32 %v832_v16, %v813_v61 }
 0x382   :  { %v953_v18 = vrot.slane %v7674_v17, 6 }
 0x383   :  { %v722_v21 = vpop.permute.xlu1 %721 }
 0x384   :  { %v724_v22 = vmul.f32 %v722_v21, %v704_v45  ;;  %954 = vrot.lane.b32.xlu0 %v953_v18, %s7118_s20 }
 0x386   :  { %726 = vrot.lane.b32.xlu1 %v724_v22, %s7118_s20  ;;  %v1179_v22 = vld [vmem:[#allocation2 + $0x18] sm:$0xc] }
 0x3f6   :  { %v955_v23 = vpop.permute.xlu0 %954 }
 0x3f7   :  { %6045 = vmatmul.mubr.msk.f32.vlgmr.msra.gmra.mrb[12].mxu1 %vm622_vm4, %v955_v23 }
 0x3f8   :  { %v727_v27 = vpop.permute.xlu1 %726  ;;  %6579 = vmatpush3.bf16.msra.mxu1 %v7604_v19  ;;  %6066 = vmatprep.mubr.msk.f32.mxu1 %vm7117_vm2, %v7115_v52 }
 0x3f9   :  { %730 = vst.msk [vmem:[#allocation3] sm:$0x3] %vm729_vm8, %v727_v27  ;;  %6034 = vmatmul.mubr.msk.f32.vlgmr.msra.gmra.mrb[4].mxu0 %vm622_vm4, %v727_v27  ;;  %6580 = vmatprep.subr.bf16.mxu1 %v7116_v58 }
 0x3fa   :  { %6573 = vmatpush3.bf16.msra.mxu0 %v7567_v57  ;;  %6055 = vmatprep.mubr.msk.f32.mxu0 %vm7117_vm2, %v7115_v52 }
 0x3fb   :  { %6574 = vmatprep.subr.bf16.mxu0 %v7116_v58 }
 0x3fc   :  { %6582 = vmatpush3.bf16.msra.mxu1 %v7618_v24 }
 0x3fd   :  { %6589 = vmatprep.subr.bf16.mxu1 %v7116_v58 }
 0x3fe   :  { %6576 = vmatpush3.bf16.msra.mxu0 %v7579_v62 }
 0x3ff   :  { %6583 = vmatprep.subr.bf16.mxu0 %v7116_v58 }
 0x4ca   :  { %v1024_v28 = vpop.f32.mrb[12].mxu1 }
 0x4cb   :  { %v1029_v29 = vrot.slane %v1024_v28, 4  ;;  %v6046_v30 = vpop.f32.mrb[13].mxu1 }
 0x4cc   :  { %v910_v32 = vpop.f32.mrb[4].mxu0  ;;  %v1066_v30 = vld [vmem:[#allocation2] sm:$0x30] }
 0x4cd   :  { %v1031_v33 = vadd.f32 %v1029_v29, %v952_v31  ;;  %v915_v34 = vrot.slane %v910_v32, 6  ;;  %v6035_v35 = vpop.f32.mrb[5].mxu0 }
 0x4cf   :  { %v5607_v37 = vmul.f32 -1.442695, %v1031_v33  ;;  %v917_v60 = vadd.f32 %v915_v34, %v841_v36 }
 0x4d1   :  { %6818 = vpow2.f32 %v5607_v37  ;;  %v5605_v38 = vmul.f32 -1.442695, %v917_v60 }
 0x4d3   :  { %6820 = vpow2.f32 %v5605_v38 }
 0x4d4   :  { %6822 = vtanh.f32 %v1031_v33 }
 0x4db   :  { %v6819_v39 = vpop.eup %6818 }
 0x4dc   :  { %v1036_v40 = vadd.f32 1.0, %v6819_v39 }
 0x4dd   :  { %v6821_v41 = vpop.eup %6820 }
 0x4de   :  { %6824 = vrcp.f32 %v1036_v40  ;;  %v922_v42 = vadd.f32 1.0, %v6821_v41  ;;  %v6823_v43 = vpop.eup %6822 }
 0x4df   :  { %6826 = vtanh.f32 %v917_v60 }
 0x4e0   :  { %6828 = vrcp.f32 %v922_v42 }
 0x4e8   :  { %v6825_v44 = vpop.eup %6824 }
 0x4e9   :  { %v6827_v46 = vpop.eup %6826  ;;  %v1039_v47 = vsel %vm7646_vm7, %v6823_v43, %v6825_v44 }
 0x4ea   :  { %v6829_v48 = vpop.eup %6828  ;;  %1045 = vrot.lane.b32.xlu0 %v1039_v47, %s7119_s10  ;;  %v1043_v61 = vmul.f32 %v1041_v55, %v1039_v47 }
 0x4eb   :  { %v925_v49 = vsel %vm7646_vm7, %v6827_v46, %v6829_v48 }
 0x4ec   :  { %931 = vrot.lane.b32.xlu1 %v925_v49, %s7119_s10  ;;  %v929_v45 = vmul.f32 %v927_v56, %v925_v49 }
 0x55c   :  { %v1046_v50 = vpop.permute.xlu0 %1045 }
 0x55d   :  { %v1048_v51 = vmul.f32 %v1046_v50, %v1039_v47 }
 0x55e   :  { %v932_v53 = vpop.permute.xlu1 %931 }
 0x55f   :  { %v934_v54 = vmul.f32 %v932_v53, %v925_v49  ;;  %1050 = vrot.lane.b32.xlu0 %v1048_v51, %s7118_s20 }
 0x561   :  { %936 = vrot.lane.b32.xlu1 %v934_v54, %s7118_s20 }
 0x5d1   :  { %v1051_v63 = vpop.permute.xlu0 %1050 }
 0x5d2   :  { %v7704_v0 = vadd.f32 %v1051_v63, %v1043_v61 }
 0x5d3   :  { %v937_v1 = vpop.permute.xlu1 %936 }
 0x5d4   :  { %6830 = vtanh.f32 %v7704_v0  ;;  %v7707_v2 = vadd.f32 %v937_v1, %v929_v45  ;;  %v1268_v48 = vrot.slane %v7704_v0, 2 }
 0x5d6   :  { %6832 = vtanh.f32 %v7707_v2 }
 0x5de   :  { %v6831_v3 = vpop.eup %6830 }
 0x5df   :  { %1056 = vrot.lane.b32.xlu0 %v6831_v3, %s7119_s10 }
 0x5e0   :  { %v6833_v4 = vpop.eup %6832 }
 0x5e1   :  { %942 = vrot.lane.b32.xlu1 %v6833_v4, %s7119_s10 }
 0x651   :  { %v1057_v6 = vpop.permute.xlu0 %1056 }
 0x652   :  { %v7712_v8 = vmul.f32 %v1057_v6, %v1039_v47 }
 0x653   :  { %v943_v9 = vpop.permute.xlu1 %942 }
 0x654   :  { %v1180_v11 = vrot.slane %v7712_v8, 4  ;;  %v7715_v12 = vmul.f32 %v943_v9, %v925_v49  ;;  %v1155_v49 = vrot.slane %v7707_v2, 6 }
 0x656   :  { %v1067_v13 = vrot.slane %v7715_v12, 2  ;;  %1181 = vrot.lane.b32.xlu0 %v1180_v11, %s7118_s20  ;;  %v1405_v11 = vld [vmem:[#allocation2 + $0x18] sm:$0x3] }
 0x658   :  { %1068 = vrot.lane.b32.xlu1 %v1067_v13, %s7118_s20 }
 0x6c8   :  { %v1182_v14 = vpop.permute.xlu0 %1181 }
 0x6c9   :  { %6067 = vmatmul.mubr.msk.f32.vlgmr.msra.gmra.mrb[14].mxu1 %vm622_vm4, %v1182_v14 }
 0x6ca   :  { %v1069_v15 = vpop.permute.xlu1 %1068  ;;  %6591 = vmatpush3.bf16.msra.mxu1 %v7604_v19  ;;  %6088 = vmatprep.mubr.msk.f32.mxu1 %vm7117_vm2, %v7115_v52 }
 0x6cb   :  { %6056 = vmatmul.mubr.msk.f32.vlgmr.msra.gmra.mrb[6].mxu0 %vm622_vm4, %v1069_v15  ;;  %6592 = vmatprep.subr.bf16.mxu1 %v7116_v58 }
 0x6cc   :  { %6585 = vmatpush3.bf16.msra.mxu0 %v7567_v57  ;;  %6077 = vmatprep.mubr.msk.f32.mxu0 %vm7117_vm2, %v7115_v52 }
 0x6cd   :  { %6586 = vmatprep.subr.bf16.mxu0 %v7116_v58 }
 0x6ce   :  { %6594 = vmatpush3.bf16.msra.mxu1 %v7618_v24 }
 0x6cf   :  { %6601 = vmatprep.subr.bf16.mxu1 %v7116_v58 }
 0x6d0   :  { %6588 = vmatpush3.bf16.msra.mxu0 %v7579_v62 }
 0x6d1   :  { %6595 = vmatprep.subr.bf16.mxu0 %v7116_v58 }
 0x79c   :  { %v1251_v16 = vpop.f32.mrb[14].mxu1 }
 0x79d   :  { %v1256_v18 = vrot.slane %v1251_v16, 6  ;;  %v6068_v21 = vpop.f32.mrb[15].mxu1 }
 0x79e   :  { %v1138_v23 = vpop.f32.mrb[6].mxu0 }
 0x79f   :  { %v1258_v27 = vadd.f32 %v1256_v18, %v1179_v22  ;;  %v1143_v28 = vrot.slane %v1138_v23, 4  ;;  %v6057_v29 = vpop.f32.mrb[7].mxu0  ;;  %v1292_v23 = vld [vmem:[#allocation2] sm:$0xc0] }
 0x7a1   :  { %v5611_v31 = vmul.f32 -1.442695, %v1258_v27  ;;  %v1145_v32 = vadd.f32 %v1143_v28, %v1066_v30 }
 0x7a3   :  { %6834 = vpow2.f32 %v5611_v31  ;;  %v5609_v33 = vmul.f32 -1.442695, %v1145_v32 }
 0x7a5   :  { %6836 = vpow2.f32 %v5609_v33 }
 0x7a6   :  { %6838 = vtanh.f32 %v1258_v27 }
 0x7ad   :  { %v6835_v34 = vpop.eup %6834 }
 0x7ae   :  { %v1263_v35 = vadd.f32 1.0, %v6835_v34 }
 0x7af   :  { %v6837_v36 = vpop.eup %6836 }
 0x7b0   :  { %6840 = vrcp.f32 %v1263_v35  ;;  %v1150_v37 = vadd.f32 1.0, %v6837_v36  ;;  %v6839_v60 = vpop.eup %6838 }
 0x7b1   :  { %6842 = vtanh.f32 %v1145_v32 }
 0x7b2   :  { %6844 = vrcp.f32 %v1150_v37 }
 0x7ba   :  { %v6841_v38 = vpop.eup %6840 }
 0x7bb   :  { %v6843_v39 = vpop.eup %6842  ;;  %v1266_v40 = vsel %vm7646_vm7, %v6839_v60, %v6841_v38 }
 0x7bc   :  { %v6845_v41 = vpop.eup %6844  ;;  %1272 = vrot.lane.b32.xlu0 %v1266_v40, %s7119_s10  ;;  %v1270_v50 = vmul.f32 %v1268_v48, %v1266_v40 }
 0x7bd   :  { %v1153_v42 = vsel %vm7646_vm7, %v6843_v39, %v6845_v41 }
 0x7be   :  { %1159 = vrot.lane.b32.xlu1 %v1153_v42, %s7119_s10  ;;  %v1157_v54 = vmul.f32 %v1155_v49, %v1153_v42 }
 0x82e   :  { %v1273_v43 = vpop.permute.xlu0 %1272 }
 0x82f   :  { %v1275_v44 = vmul.f32 %v1273_v43, %v1266_v40 }
 0x830   :  { %v1160_v46 = vpop.permute.xlu1 %1159 }
 0x831   :  { %v1162_v47 = vmul.f32 %v1160_v46, %v1153_v42  ;;  %1277 = vrot.lane.b32.xlu0 %v1275_v44, %s7118_s20 }
 0x833   :  { %1164 = vrot.lane.b32.xlu1 %v1162_v47, %s7118_s20 }
 0x8a3   :  { %v1278_v51 = vpop.permute.xlu0 %1277 }
 0x8a4   :  { %v7744_v53 = vadd.f32 %v1278_v51, %v1270_v50 }
 0x8a5   :  { %v1165_v55 = vpop.permute.xlu1 %1164 }
 0x8a6   :  { %6846 = vtanh.f32 %v7744_v53  ;;  %v7747_v56 = vadd.f32 %v1165_v55, %v1157_v54 }
 0x8a8   :  { %6848 = vtanh.f32 %v7747_v56  ;;  %v1381_v46 = vrot.slane %v7747_v56, 6 }
 0x8b0   :  { %v6847_v61 = vpop.eup %6846 }
 0x8b1   :  { %1283 = vrot.lane.b32.xlu0 %v6847_v61, %s7119_s10 }
 0x8b2   :  { %v6849_v63 = vpop.eup %6848 }
 0x8b3   :  { %1170 = vrot.lane.b32.xlu1 %v6849_v63, %s7119_s10 }
 0x923   :  { %v1284_v0 = vpop.permute.xlu0 %1283 }
 0x924   :  { %v7752_v45 = vmul.f32 %v1284_v0, %v1266_v40 }
 0x925   :  { %v1171_v1 = vpop.permute.xlu1 %1170 }
 0x926   :  { %v1406_v2 = vrot.slane %v7752_v45, 2  ;;  %v7755_v3 = vmul.f32 %v1171_v1, %v1153_v42  ;;  %v1491_v42 = vrot.slane %v7744_v53, 2 }
 0x928   :  { %v1293_v4 = vrot.slane %v7755_v3, 4  ;;  %1407 = vrot.lane.b32.xlu0 %v1406_v2, %s7118_s20 }
 0x92a   :  { %1294 = vrot.lane.b32.xlu1 %v1293_v4, %s7118_s20 }
 0x99a   :  { %v1408_v6 = vpop.permute.xlu0 %1407 }
 0x99b   :  { %6089 = vmatmul.mubr.msk.f32.vlgmr.msra.gmra.mrb[16].mxu1 %vm622_vm4, %v1408_v6 }
 0x99c   :  { %v1295_v9 = vpop.permute.xlu1 %1294  ;;  %6603 = vmatpush3.bf16.msra.mxu1 %v7604_v19  ;;  %6110 = vmatprep.mubr.msk.f32.mxu1 %vm7117_vm2, %v7115_v52 }
 0x99d   :  { %6078 = vmatmul.mubr.msk.f32.vlgmr.msra.gmra.mrb[8].mxu0 %vm622_vm4, %v1295_v9  ;;  %6604 = vmatprep.subr.bf16.mxu1 %v7116_v58  ;;  %v1625_v9 = vld [vmem:[#allocation2 + $0x8] sm:$0xc0] }
 0x99e   :  { %6597 = vmatpush3.bf16.msra.mxu0 %v7567_v57  ;;  %6099 = vmatprep.mubr.msk.f32.mxu0 %vm7117_vm2, %v7115_v52 }
 0x99f   :  { %6598 = vmatprep.subr.bf16.mxu0 %v7116_v58 }
 0x9a0   :  { %6606 = vmatpush3.bf16.msra.mxu1 %v7618_v24 }
 0x9a1   :  { %6613 = vmatprep.subr.bf16.mxu1 %v7116_v58 }
 0x9a2   :  { %6600 = vmatpush3.bf16.msra.mxu0 %v7579_v62 }
 0x9a3   :  { %6607 = vmatprep.subr.bf16.mxu0 %v7116_v58 }
 0xa6e   :  { %v1477_v13 = vpop.f32.mrb[16].mxu1 }
 0xa6f   :  { %v1481_v14 = vadd.f32 %v1477_v13, %v1405_v11  ;;  %v6090_v15 = vpop.f32.mrb[17].mxu1 }
 0xa70   :  { %v1364_v16 = vpop.f32.mrb[8].mxu0 }
 0xa71   :  { %v5615_v18 = vmul.f32 -1.442695, %v1481_v14  ;;  %v1369_v21 = vrot.slane %v1364_v16, 2  ;;  %v6079_v22 = vpop.f32.mrb[9].mxu0 }
 0xa73   :  { %6850 = vpow2.f32 %v5615_v18  ;;  %v1371_v27 = vadd.f32 %v1369_v21, %v1292_v23 }
 0xa75   :  { %v5613_v28 = vmul.f32 -1.442695, %v1371_v27 }
 0xa77   :  { %6852 = vpow2.f32 %v5613_v28 }
 0xa78   :  { %6854 = vtanh.f32 %v1481_v14  ;;  %v1515_v14 = vld [vmem:[#allocation2 + $0x10] sm:$0x3] }
 0xa7d   :  { %v6851_v29 = vpop.eup %6850 }
 0xa7e   :  { %v1486_v30 = vadd.f32 1.0, %v6851_v29 }
 0xa80   :  { %6856 = vrcp.f32 %v1486_v30 }
 0xa81   :  { %v6853_v31 = vpop.eup %6852  ;;  %6858 = vtanh.f32 %v1371_v27 }
 0xa82   :  { %v1376_v32 = vadd.f32 1.0, %v6853_v31  ;;  %v6855_v33 = vpop.eup %6854 }
 0xa84   :  { %6860 = vrcp.f32 %v1376_v32 }
 0xa8a   :  { %v6857_v34 = vpop.eup %6856 }
 0xa8b   :  { %v1489_v35 = vsel %vm7646_vm7, %v6855_v33, %v6857_v34  ;;  %v6859_v36 = vpop.eup %6858 }
 0xa8c   :  { %1495 = vrot.lane.b32.xlu0 %v1489_v35, %s7119_s10  ;;  %v1493_v43 = vmul.f32 %v1491_v42, %v1489_v35 }
 0xa8e   :  { %v6861_v37 = vpop.eup %6860 }
 0xa8f   :  { %v1379_v60 = vsel %vm7646_vm7, %v6859_v36, %v6861_v37 }
 0xa90   :  { %1385 = vrot.lane.b32.xlu1 %v1379_v60, %s7119_s10  ;;  %v1383_v48 = vmul.f32 %v1381_v46, %v1379_v60 }
 0xafe   :  { %v1496_v38 = vpop.permute.xlu0 %1495 }
 0xaff   :  { %v1498_v39 = vmul.f32 %v1496_v38, %v1489_v35 }
 0xb01   :  { %1500 = vrot.lane.b32.xlu0 %v1498_v39, %s7118_s20 }
 0xb02   :  { %v1386_v40 = vpop.permute.xlu1 %1385 }
 0xb03   :  { %v1388_v41 = vmul.f32 %v1386_v40, %v1379_v60 }
 0xb05   :  { %1390 = vrot.lane.b32.xlu1 %v1388_v41, %s7118_s20 }
 0xb73   :  { %v1501_v44 = vpop.permute.xlu0 %1500 }
 0xb74   :  { %v7784_v47 = vadd.f32 %v1501_v44, %v1493_v43 }
 0xb76   :  { %6862 = vtanh.f32 %v7784_v47  ;;  %v1711_v38 = vrot.slane %v7784_v47, 2 }
 0xb77   :  { %v1391_v49 = vpop.permute.xlu1 %1390 }
 0xb78   :  { %v7787_v50 = vadd.f32 %v1391_v49, %v1383_v48 }
 0xb7a   :  { %6864 = vtanh.f32 %v7787_v50  ;;  %v1601_v41 = vrot.slane %v7787_v50, 6 }
 0xb80   :  { %v6863_v51 = vpop.eup %6862 }
 0xb81   :  { %1506 = vrot.lane.b32.xlu0 %v6863_v51, %s7119_s10 }
 0xb84   :  { %v6865_v54 = vpop.eup %6864 }
 0xb85   :  { %1396 = vrot.lane.b32.xlu1 %v6865_v54, %s7119_s10 }
 0xbf3   :  { %v1507_v53 = vpop.permute.xlu0 %1506 }
 0xbf4   :  { %v1509_v55 = vmul.f32 %v1507_v53, %v1489_v35 }
 0xbf6   :  { %1511 = vrot.lane.b32.xlu0 %v1509_v55, %s7118_s20 }
 0xbf7   :  { %v1397_v56 = vpop.permute.xlu1 %1396 }
 0xbf8   :  { %v7793_v61 = vmul.f32 %v1397_v56, %v1379_v60 }
 0xbfa   :  { %v1516_v63 = vrot.slane %v7793_v61, 6 }
 0xbfc   :  { %1517 = vrot.lane.b32.xlu1 %v1516_v63, %s7118_s20 }
 0xc68   :  { %v1512_v0 = vpop.permute.xlu0 %1511 }
 0xc69   :  { %1514 = vst.msk [vmem:[#allocation4 + $0x8] sm:$0x3] %vm729_vm8, %v1512_v0  ;;  %6111 = vmatmul.mubr.msk.f32.vlgmr.msra.gmra.mrb[18].mxu1 %vm622_vm4, %v1512_v0 }
 0xc6a   :  { %6615 = vmatpush3.bf16.msra.mxu1 %v7604_v19  ;;  %6132 = vmatprep.mubr.msk.f32.mxu1 %vm7117_vm2, %v7115_v52 }
 0xc6b   :  { %6616 = vmatprep.subr.bf16.mxu1 %v7116_v58 }
 0xc6e   :  { %v1518_v1 = vpop.permute.xlu1 %1517  ;;  %6618 = vmatpush3.bf16.msra.mxu1 %v7618_v24 }
 0xc6f   :  { %6100 = vmatmul.mubr.msk.f32.vlgmr.msra.gmra.mrb[10].mxu0 %vm622_vm4, %v1518_v1  ;;  %6625 = vmatprep.subr.bf16.mxu1 %v7116_v58 }
 0xc70   :  { %6609 = vmatpush3.bf16.msra.mxu0 %v7567_v57  ;;  %6121 = vmatprep.mubr.msk.f32.mxu0 %vm7117_vm2, %v7115_v52 }
 0xc71   :  { %6610 = vmatprep.subr.bf16.mxu0 %v7116_v58 }
 0xc74   :  { %6612 = vmatpush3.bf16.msra.mxu0 %v7579_v62 }
 0xc75   :  { %6619 = vmatprep.subr.bf16.mxu0 %v7116_v58 }
 0xd3c   :  { %v1694_v2 = vpop.f32.mrb[18].mxu1 }
 0xd3d   :  { %v1699_v4 = vrot.slane %v1694_v2, 2  ;;  %v6112_v6 = vpop.f32.mrb[19].mxu1  ;;  %v1845_v2 = vld [vmem:[#allocation2 + $0x8] sm:$0x30] }
 0xd3f   :  { %v1701_v11 = vadd.f32 %v1699_v4, %v1625_v9 }
 0xd41   :  { %v5619_v13 = vmul.f32 -1.442695, %v1701_v11 }
 0xd42   :  { %v1587_v15 = vpop.f32.mrb[10].mxu0 }
 0xd43   :  { %6866 = vpow2.f32 %v5619_v13  ;;  %v1591_v16 = vadd.f32 %v1587_v15, %v1515_v14  ;;  %v6101_v18 = vpop.f32.mrb[11].mxu0  ;;  %v1735_v13 = vld [vmem:[#allocation2 + $0x10] sm:$0xc] }
 0xd45   :  { %v5617_v21 = vmul.f32 -1.442695, %v1591_v16 }
 0xd47   :  { %6868 = vpow2.f32 %v5617_v21 }
 0xd48   :  { %6870 = vtanh.f32 %v1701_v11 }
 0xd4d   :  { %v6867_v22 = vpop.eup %6866 }
 0xd4e   :  { %v1706_v23 = vadd.f32 1.0, %v6867_v22 }
 0xd50   :  { %6872 = vrcp.f32 %v1706_v23 }
 0xd51   :  { %v6869_v27 = vpop.eup %6868  ;;  %6874 = vtanh.f32 %v1591_v16 }
 0xd52   :  { %v1596_v28 = vadd.f32 1.0, %v6869_v27  ;;  %v6871_v29 = vpop.eup %6870 }
 0xd54   :  { %6876 = vrcp.f32 %v1596_v28 }
 0xd5a   :  { %v6873_v30 = vpop.eup %6872 }
 0xd5b   :  { %v1709_v31 = vsel %vm7646_vm7, %v6871_v29, %v6873_v30  ;;  %v6875_v32 = vpop.eup %6874 }
 0xd5c   :  { %1715 = vrot.lane.b32.xlu0 %v1709_v31, %s7119_s10  ;;  %v1713_v39 = vmul.f32 %v1711_v38, %v1709_v31 }
 0xd5e   :  { %v6877_v33 = vpop.eup %6876 }
 0xd5f   :  { %v1599_v34 = vsel %vm7646_vm7, %v6875_v32, %v6877_v33 }
 0xd60   :  { %1605 = vrot.lane.b32.xlu1 %v1599_v34, %s7119_s10  ;;  %v1603_v43 = vmul.f32 %v1601_v41, %v1599_v34 }
 0xdce   :  { %v1716_v35 = vpop.permute.xlu0 %1715 }
 0xdcf   :  { %v1718_v36 = vmul.f32 %v1716_v35, %v1709_v31 }
 0xdd1   :  { %1720 = vrot.lane.b32.xlu0 %v1718_v36, %s7118_s20 }
 0xdd2   :  { %v1606_v37 = vpop.permute.xlu1 %1605 }
 0xdd3   :  { %v1608_v60 = vmul.f32 %v1606_v37, %v1599_v34 }
 0xdd5   :  { %1610 = vrot.lane.b32.xlu1 %v1608_v60, %s7118_s20 }
 0xe43   :  { %v1721_v40 = vpop.permute.xlu0 %1720 }
 0xe44   :  { %v7822_v42 = vadd.f32 %v1721_v40, %v1713_v39 }
 0xe46   :  { %6878 = vtanh.f32 %v7822_v42  ;;  %v1934_v37 = vrot.slane %v7822_v42, 2 }
 0xe47   :  { %v1611_v44 = vpop.permute.xlu1 %1610 }
 0xe48   :  { %v7825_v46 = vadd.f32 %v1611_v44, %v1603_v43 }
 0xe4a   :  { %6880 = vtanh.f32 %v7825_v46  ;;  %v1821_v60 = vrot.slane %v7825_v46, 6 }
 0xe50   :  { %v6879_v48 = vpop.eup %6878 }
 0xe51   :  { %1726 = vrot.lane.b32.xlu0 %v6879_v48, %s7119_s10 }
 0xe54   :  { %v6881_v49 = vpop.eup %6880 }
 0xe55   :  { %1616 = vrot.lane.b32.xlu1 %v6881_v49, %s7119_s10 }
 0xec3   :  { %v1727_v47 = vpop.permute.xlu0 %1726 }
 0xec4   :  { %v7830_v51 = vmul.f32 %v1727_v47, %v1709_v31 }
 0xec6   :  { %v1846_v50 = vrot.slane %v7830_v51, 6 }
 0xec7   :  { %v1617_v54 = vpop.permute.xlu1 %1616 }
 0xec8   :  { %v1619_v53 = vmul.f32 %v1617_v54, %v1599_v34  ;;  %1847 = vrot.lane.b32.xlu0 %v1846_v50, %s7118_s20 }
 0xeca   :  { %1621 = vrot.lane.b32.xlu1 %v1619_v53, %s7118_s20 }
 0xf3a   :  { %v1848_v55 = vpop.permute.xlu0 %1847 }
 0xf3b   :  { %6133 = vmatmul.mubr.msk.f32.vlgmr.msra.gmra.mrb[20].mxu1 %vm622_vm4, %v1848_v55 }
 0xf3c   :  { %v1622_v56 = vpop.permute.xlu1 %1621  ;;  %6627 = vmatpush3.bf16.msra.mxu1 %v7604_v19  ;;  %6154 = vmatprep.mubr.msk.f32.mxu1 %vm7117_vm2, %v7115_v52 }
 0xf3d   :  { %1624 = vst.msk [vmem:[#allocation3 + $0x8] sm:$0x3] %vm729_vm8, %v1622_v56  ;;  %6122 = vmatmul.mubr.msk.f32.vlgmr.msra.gmra.mrb[12].mxu0 %vm622_vm4, %v1622_v56  ;;  %6628 = vmatprep.subr.bf16.mxu1 %v7116_v58 }
 0xf3e   :  { %6621 = vmatpush3.bf16.msra.mxu0 %v7567_v57  ;;  %6143 = vmatprep.mubr.msk.f32.mxu0 %vm7117_vm2, %v7115_v52 }
 0xf3f   :  { %6622 = vmatprep.subr.bf16.mxu0 %v7116_v58 }
 0xf40   :  { %6630 = vmatpush3.bf16.msra.mxu1 %v7618_v24 }
 0xf41   :  { %6637 = vmatprep.subr.bf16.mxu1 %v7116_v58 }
 0xf42   :  { %6624 = vmatpush3.bf16.msra.mxu0 %v7579_v62 }
 0xf43   :  { %6631 = vmatprep.subr.bf16.mxu0 %v7116_v58 }
0x100e   :  { %v1917_v63 = vpop.f32.mrb[20].mxu1 }
0x100f   :  { %v1922_v0 = vrot.slane %v1917_v63, 4  ;;  %v6134_v1 = vpop.f32.mrb[21].mxu1 }
0x1010   :  { %v1804_v4 = vpop.f32.mrb[12].mxu0  ;;  %v2071_v1 = vld [vmem:[#allocation2 + $0x8] sm:$0xc] }
0x1011   :  { %v1924_v6 = vadd.f32 %v1922_v0, %v1845_v2  ;;  %v1809_v9 = vrot.slane %v1804_v4, 6  ;;  %v6123_v11 = vpop.f32.mrb[13].mxu0 }
0x1013   :  { %v5623_v14 = vmul.f32 -1.442695, %v1924_v6  ;;  %v1811_v15 = vadd.f32 %v1809_v9, %v1735_v13 }
0x1015   :  { %6882 = vpow2.f32 %v5623_v14  ;;  %v5621_v16 = vmul.f32 -1.442695, %v1811_v15 }
0x1017   :  { %6884 = vpow2.f32 %v5621_v16 }
0x1018   :  { %6886 = vtanh.f32 %v1924_v6 }
0x101f   :  { %v6883_v18 = vpop.eup %6882 }
0x1020   :  { %v1929_v21 = vadd.f32 1.0, %v6883_v18 }
0x1021   :  { %v6885_v22 = vpop.eup %6884 }
0x1022   :  { %6888 = vrcp.f32 %v1929_v21  ;;  %v1816_v23 = vadd.f32 1.0, %v6885_v22  ;;  %v6887_v27 = vpop.eup %6886 }
0x1023   :  { %6890 = vtanh.f32 %v1811_v15 }
0x1024   :  { %6892 = vrcp.f32 %v1816_v23 }
0x102c   :  { %v6889_v28 = vpop.eup %6888 }
0x102d   :  { %v6891_v29 = vpop.eup %6890  ;;  %v1932_v30 = vsel %vm7646_vm7, %v6887_v27, %v6889_v28 }
0x102e   :  { %v6893_v31 = vpop.eup %6892  ;;  %1938 = vrot.lane.b32.xlu0 %v1932_v30, %s7119_s10  ;;  %v1936_v38 = vmul.f32 %v1934_v37, %v1932_v30 }
0x102f   :  { %v1819_v32 = vsel %vm7646_vm7, %v6891_v29, %v6893_v31 }
0x1030   :  { %1825 = vrot.lane.b32.xlu1 %v1819_v32, %s7119_s10  ;;  %v1823_v41 = vmul.f32 %v1821_v60, %v1819_v32 }
0x10a0   :  { %v1939_v33 = vpop.permute.xlu0 %1938 }
0x10a1   :  { %v1941_v34 = vmul.f32 %v1939_v33, %v1932_v30 }
0x10a2   :  { %v1826_v35 = vpop.permute.xlu1 %1825 }
0x10a3   :  { %v1828_v36 = vmul.f32 %v1826_v35, %v1819_v32  ;;  %1943 = vrot.lane.b32.xlu0 %v1941_v34, %s7118_s20 }
0x10a5   :  { %1830 = vrot.lane.b32.xlu1 %v1828_v36, %s7118_s20 }
0x1115   :  { %v1944_v39 = vpop.permute.xlu0 %1943 }
0x1116   :  { %v7860_v40 = vadd.f32 %v1944_v39, %v1936_v38 }
0x1117   :  { %v1831_v43 = vpop.permute.xlu1 %1830 }
0x1118   :  { %6894 = vtanh.f32 %v7860_v40  ;;  %v7863_v44 = vadd.f32 %v1831_v43, %v1823_v41  ;;  %v2160_v33 = vrot.slane %v7860_v40, 2 }
0x111a   :  { %6896 = vtanh.f32 %v7863_v44  ;;  %v2047_v34 = vrot.slane %v7863_v44, 6 }
0x1122   :  { %v6895_v48 = vpop.eup %6894 }
0x1123   :  { %1949 = vrot.lane.b32.xlu0 %v6895_v48, %s7119_s10 }
0x1124   :  { %v6897_v49 = vpop.eup %6896 }
0x1125   :  { %1836 = vrot.lane.b32.xlu1 %v6897_v49, %s7119_s10 }
0x1195   :  { %v1950_v42 = vpop.permute.xlu0 %1949 }
0x1196   :  { %v7868_v46 = vmul.f32 %v1950_v42, %v1932_v30 }
0x1197   :  { %v1837_v47 = vpop.permute.xlu1 %1836 }
0x1198   :  { %v2072_v50 = vrot.slane %v7868_v46, 4  ;;  %v7871_v54 = vmul.f32 %v1837_v47, %v1819_v32 }
0x119a   :  { %v1959_v53 = vrot.slane %v7871_v54, 2  ;;  %2073 = vrot.lane.b32.xlu0 %v2072_v50, %s7118_s20  ;;  %v2613_v50 = vld [vmem:[%s8625_s12] sm:$0xff] }
0x119c   :  { %1960 = vrot.lane.b32.xlu1 %v1959_v53, %s7118_s20  ;;  %v2614_v53 = vld [vmem:[%s8625_s12 + $0x8] sm:$0xff] }
0x120c   :  { %v2074_v55 = vpop.permute.xlu0 %2073 }
0x120d   :  { %6155 = vmatmul.mubr.msk.f32.vlgmr.msra.gmra.mrb[22].mxu1 %vm622_vm4, %v2074_v55  ;;  %v7921_v55 = vpack.c.bf16 %v2614_v53, %v2613_v50 }
0x120e   :  { %v1961_v56 = vpop.permute.xlu1 %1960  ;;  %6639 = vmatpush3.bf16.msra.mxu1 %v7604_v19  ;;  %6176 = vmatprep.mubr.msk.f32.mxu1 %vm7117_vm2, %v7115_v52 }
0x120f   :  { %6144 = vmatmul.mubr.msk.f32.vlgmr.msra.gmra.mrb[14].mxu0 %vm622_vm4, %v1961_v56  ;;  %6640 = vmatprep.subr.bf16.mxu1 %v7116_v58  ;;  %v2615_v56 = vld [vmem:[%s8625_s12 + $0x10] sm:$0xff] }
0x1210   :  { %6633 = vmatpush3.bf16.msra.mxu0 %v7567_v57  ;;  %6165 = vmatprep.mubr.msk.f32.mxu0 %vm7117_vm2, %v7115_v52  ;;  %v1958_v57 = vld [vmem:[#allocation2 + $0x10] sm:$0x30] }
0x1211   :  { %6634 = vmatprep.subr.bf16.mxu0 %v7116_v58 }
0x1212   :  { %6642 = vmatpush3.bf16.msra.mxu1 %v7618_v24 }
0x1213   :  { %6659 = vmatprep.subr.bf16.mxu1 %v7116_v58 }
0x1214   :  { %6636 = vmatpush3.bf16.msra.mxu0 %v7579_v62 }
0x12e0   :  { %v2143_v19 = vpop.f32.mrb[22].mxu1 }
0x12e1   :  { %v2148_v63 = vrot.slane %v2143_v19, 6  ;;  %v6156_v0 = vpop.f32.mrb[23].mxu1  ;;  %v2616_v19 = vld [vmem:[%s8625_s12 + $0x18] sm:$0xff] }
0x12e2   :  { %v2030_v2 = vpop.f32.mrb[14].mxu0 }
0x12e3   :  { %v2150_v4 = vadd.f32 %v2148_v63, %v2071_v1  ;;  %v2035_v6 = vrot.slane %v2030_v2, 4  ;;  %v6145_v9 = vpop.f32.mrb[15].mxu0  ;;  %v7931_v1 = vpack.c.bf16 %v2616_v19, %v2615_v56  ;;  %v5636_v2 = vld [vmem:[%s8625_s12 + $0x20] sm:$0xff] }
0x12e4   :  { %v5638_v9 = vld [vmem:[%s8625_s12 + $0x30] sm:$0xff] }
0x12e5   :  { %v5627_v11 = vmul.f32 -1.442695, %v2150_v4  ;;  %v2037_v13 = vadd.f32 %v2035_v6, %v1958_v57  ;;  %v5639_v57 = vld [vmem:[%s8625_s12 + $0x38] sm:$0xff] }
0x12e7   :  { %6898 = vpow2.f32 %v5627_v11  ;;  %v5625_v14 = vmul.f32 -1.442695, %v2037_v13  ;;  %v7957_v11 = vpack.c.bf16 %v5639_v57, %v5638_v9 }
0x12e9   :  { %6900 = vpow2.f32 %v5625_v14 }
0x12ea   :  { %6902 = vtanh.f32 %v2150_v4  ;;  %v5637_v4 = vld [vmem:[%s8625_s12 + $0x28] sm:$0xff] }
0x12eb   :  { %v7945_v6 = vpack.c.bf16 %v5637_v4, %v5636_v2 }
0x12f1   :  { %v6899_v15 = vpop.eup %6898 }
0x12f2   :  { %v2155_v24 = vadd.f32 1.0, %v6899_v15 }
0x12f3   :  { %v6901_v16 = vpop.eup %6900 }
0x12f4   :  { %6904 = vrcp.f32 %v2155_v24  ;;  %v2042_v62 = vadd.f32 1.0, %v6901_v16  ;;  %v6903_v18 = vpop.eup %6902 }
0x12f5   :  { %6906 = vtanh.f32 %v2037_v13  ;;  %v2297_v13 = vld [vmem:[#allocation2 + $0x8] sm:$0x3] }
0x12f6   :  { %6908 = vrcp.f32 %v2042_v62 }
0x12fe   :  { %v6905_v21 = vpop.eup %6904 }
0x12ff   :  { %v6907_v22 = vpop.eup %6906  ;;  %v2158_v23 = vsel %vm7646_vm7, %v6903_v18, %v6905_v21 }
0x1300   :  { %v6909_v27 = vpop.eup %6908  ;;  %2164 = vrot.lane.b32.xlu0 %v2158_v23, %s7119_s10  ;;  %v2162_v35 = vmul.f32 %v2160_v33, %v2158_v23 }
0x1301   :  { %v2045_v28 = vsel %vm7646_vm7, %v6907_v22, %v6909_v27 }
0x1302   :  { %2051 = vrot.lane.b32.xlu1 %v2045_v28, %s7119_s10  ;;  %v2049_v60 = vmul.f32 %v2047_v34, %v2045_v28 }
0x1372   :  { %v2165_v29 = vpop.permute.xlu0 %2164 }
0x1373   :  { %v2167_v30 = vmul.f32 %v2165_v29, %v2158_v23 }
0x1374   :  { %v2052_v31 = vpop.permute.xlu1 %2051 }
0x1375   :  { %v2054_v32 = vmul.f32 %v2052_v31, %v2045_v28  ;;  %2169 = vrot.lane.b32.xlu0 %v2167_v30, %s7118_s20 }
0x1377   :  { %2056 = vrot.lane.b32.xlu1 %v2054_v32, %s7118_s20 }
0x13e7   :  { %v2170_v36 = vpop.permute.xlu0 %2169 }
0x13e8   :  { %v7899_v37 = vadd.f32 %v2170_v36, %v2162_v35 }
0x13e9   :  { %v2057_v38 = vpop.permute.xlu1 %2056 }
0x13ea   :  { %6910 = vtanh.f32 %v7899_v37  ;;  %v7902_v39 = vadd.f32 %v2057_v38, %v2049_v60  ;;  %v2383_v50 = vrot.slane %v7899_v37, 2  ;;  %v2426_v37 = vld [vmem:[%s8624_s11 + $0x78] sm:$0xff] }
0x13ec   :  { %6912 = vtanh.f32 %v7902_v39  ;;  %v2273_v19 = vrot.slane %v7902_v39, 6 }
0x13f4   :  { %v6911_v41 = vpop.eup %6910 }
0x13f5   :  { %2175 = vrot.lane.b32.xlu0 %v6911_v41, %s7119_s10 }
0x13f6   :  { %v6913_v43 = vpop.eup %6912 }
0x13f7   :  { %2062 = vrot.lane.b32.xlu1 %v6913_v43, %s7119_s10 }
0x1467   :  { %v2176_v40 = vpop.permute.xlu0 %2175 }
0x1468   :  { %v7907_v44 = vmul.f32 %v2176_v40, %v2158_v23 }
0x1469   :  { %v2063_v48 = vpop.permute.xlu1 %2062 }
0x146a   :  { %v2298_v49 = vrot.slane %v7907_v44, 2  ;;  %v7910_v42 = vmul.f32 %v2063_v48, %v2045_v28 }
0x146c   :  { %v2185_v47 = vrot.slane %v7910_v42, 4  ;;  %2299 = vrot.lane.b32.xlu0 %v2298_v49, %s7118_s20 }
0x146e   :  { %2186 = vrot.lane.b32.xlu1 %v2185_v47, %s7118_s20 }
0x14de   :  { %v2300_v63 = vpop.permute.xlu0 %2299 }
0x14df   :  { %6177 = vmatmul.mubr.msk.f32.vlgmr.msra.gmra.mrb[24].mxu1 %vm622_vm4, %v2300_v63 }
0x14e0   :  { %6661 = vmatpush3.bf16.msra.mxu1 %v7921_v55  ;;  %v2187_v0 = vpop.permute.xlu1 %2186  ;;  %6187 = vmatprep.mubr.msk.f32.mxu1 %vm7117_vm2, %v7115_v52 }
0x14e1   :  { %6166 = vmatmul.mubr.msk.f32.vlgmr.msra.gmra.mrb[16].mxu0 %vm622_vm4, %v2187_v0  ;;  %6662 = vmatprep.subr.bf16.mxu1 %v7116_v58 }
0x14e2   :  { %2497 = vmatprep.mubr.f32.mxu0 %v7115_v52 }
0x14e4   :  { %6664 = vmatpush3.bf16.msra.mxu1 %v7931_v1 }
0x14e5   :  { %6665 = vmatprep.subr.bf16.mxu1 %v7116_v58 }
0x14e7   :  { %6188 = vmatmul.mubr.msk.f32.vlgmr.msra.gmra.mrb[26].mxu1 %vm622_vm4, %v7606_v20 }
0x14e8   :  { %6667 = vmatpush3.bf16.msra.mxu1 %v7945_v6  ;;  %6198 = vmatprep.mubr.msk.f32.mxu1 %vm7117_vm2, %v7115_v52 }
0x14e9   :  { %6668 = vmatprep.subr.bf16.mxu1 %v7116_v58 }
0x14ec   :  { %6670 = vmatpush3.bf16.msra.mxu1 %v7957_v11 }
0x14ed   :  { %6677 = vmatprep.subr.bf16.mxu1 %v7116_v58 }
0x14ef   :  { %6199 = vmatmul.mubr.msk.f32.vlgmr.msra.gmra.mrb[28].mxu1 %vm622_vm4, %v7606_v20  ;;  %v2184_v20 = vld [vmem:[#allocation2 + $0x10] sm:$0xc0] }
0x14f0   :  { %6679 = vmatpush3.bf16.msra.mxu1 %v7945_v6  ;;  %6220 = vmatprep.mubr.msk.f32.mxu1 %vm7117_vm2, %v7115_v52 }
0x14f1   :  { %6680 = vmatprep.subr.bf16.mxu1 %v7116_v58 }
0x14f4   :  { %6682 = vmatpush3.bf16.msra.mxu1 %v7957_v11 }
0x14f5   :  { %6689 = vmatprep.subr.bf16.mxu1 %v7116_v58 }
0x15b2   :  { %v2369_v14 = vpop.f32.mrb[24].mxu1 }
0x15b3   :  { %v2373_v15 = vadd.f32 %v2369_v14, %v2297_v13  ;;  %v6178_v24 = vpop.f32.mrb[25].mxu1  ;;  %v2425_v13 = vld [vmem:[%s8624_s11 + $0x70] sm:$0xff] }
0x15b4   :  { %v2256_v16 = vpop.f32.mrb[16].mxu0  ;;  %v2412_v24 = vld [vmem:[%s8624_s11 + $0x18] sm:$0xff] }
0x15b5   :  { %v5631_v62 = vmul.f32 -1.442695, %v2373_v15  ;;  %v2261_v18 = vrot.slane %v2256_v16, 2  ;;  %v6167_v21 = vpop.f32.mrb[17].mxu0 }
0x15b7   :  { %6914 = vpow2.f32 %v5631_v62  ;;  %v2263_v22 = vadd.f32 %v2261_v18, %v2184_v20 }
0x15b9   :  { %v5629_v23 = vmul.f32 -1.442695, %v2263_v22 }
0x15ba   :  { %v7972_v27 = vpop.f32.mrb[26].mxu1 }
0x15bb   :  { %6916 = vpow2.f32 %v5629_v23  ;;  %v6189_v28 = vpop.f32.mrb[27].mxu1 }
0x15bc   :  { %6918 = vtanh.f32 %v2373_v15  ;;  %v2410_v15 = vld [vmem:[%s8624_s11 + $0x8] sm:$0xff] }
0x15bd   :  { %v6651_v16 = vpack.c.bf16 %v2412_v24, %v2410_v15 }
0x15c1   :  { %v6915_v29 = vpop.eup %6914 }
0x15c2   :  { %v2378_v30 = vadd.f32 1.0, %v6915_v29  ;;  %v7974_v31 = vpop.f32.mrb[28].mxu1 }
0x15c3   :  { %v6200_v32 = vpop.f32.mrb[29].mxu1 }
0x15c4   :  { %6920 = vrcp.f32 %v2378_v30 }
0x15c5   :  { %v6917_v33 = vpop.eup %6916  ;;  %6922 = vtanh.f32 %v2263_v22 }
0x15c6   :  { %v2268_v34 = vadd.f32 1.0, %v6917_v33  ;;  %v6919_v35 = vpop.eup %6918 }
0x15c8   :  { %6924 = vrcp.f32 %v2268_v34 }
0x15ce   :  { %v6921_v36 = vpop.eup %6920 }
0x15cf   :  { %v2381_v60 = vsel %vm7646_vm7, %v6919_v35, %v6921_v36  ;;  %v6923_v38 = vpop.eup %6922 }
0x15d0   :  { %2387 = vrot.lane.b32.xlu0 %v2381_v60, %s7119_s10  ;;  %v2385_v53 = vmul.f32 %v2383_v50, %v2381_v60 }
0x15d2   :  { %v6925_v41 = vpop.eup %6924 }
0x15d3   :  { %v2271_v43 = vsel %vm7646_vm7, %v6923_v38, %v6925_v41  ;;  %v2416_v38 = vld [vmem:[%s8624_s11 + $0x38] sm:$0xff] }
0x15d4   :  { %2277 = vrot.lane.b32.xlu1 %v2271_v43, %s7119_s10  ;;  %v2275_v0 = vmul.f32 %v2273_v19, %v2271_v43 }
0x1642   :  { %v2388_v40 = vpop.permute.xlu0 %2387 }
0x1643   :  { %v2390_v48 = vmul.f32 %v2388_v40, %v2381_v60  ;;  %v2413_v40 = vld [vmem:[%s8624_s11 + $0x20] sm:$0xff] }
0x1645   :  { %2392 = vrot.lane.b32.xlu0 %v2390_v48, %s7118_s20  ;;  %v2415_v48 = vld [vmem:[%s8624_s11 + $0x30] sm:$0xff] }
0x1646   :  { %v2278_v49 = vpop.permute.xlu1 %2277  ;;  %v6657_v50 = vpack.c.bf16 %v2415_v48, %v2413_v40 }
0x1647   :  { %v2280_v47 = vmul.f32 %v2278_v49, %v2271_v43 }
0x1649   :  { %2282 = vrot.lane.b32.xlu1 %v2280_v47, %s7118_s20 }
0x16b7   :  { %v2393_v56 = vpop.permute.xlu0 %2392 }
0x16b8   :  { %v2395_v63 = vadd.f32 %v2393_v56, %v2385_v53 }
0x16ba   :  { %6926 = vtanh.f32 %v2395_v63 }
0x16bb   :  { %v2283_v2 = vpop.permute.xlu1 %2282 }
0x16bc   :  { %v2285_v4 = vadd.f32 %v2283_v2, %v2275_v0  ;;  %v2593_v0 = vld [vmem:[%s8626_s13] sm:$0x3] }
0x16bd   :  { %v2598_v2 = vrot.slane %v2593_v0, %v7635_v25 }
0x16be   :  { %6928 = vtanh.f32 %v2285_v4  ;;  %v2602_v4 = vrot.slane %v2593_v0, %v7638_v26 }
0x16c4   :  { %v6927_v9 = vpop.eup %6926 }
0x16c5   :  { %2398 = vrot.lane.b32.xlu0 %v6927_v9, %s7119_s10 }
0x16c8   :  { %v6929_v57 = vpop.eup %6928 }
0x16c9   :  { %2288 = vrot.lane.b32.xlu1 %v6929_v57, %s7119_s10  ;;  %1731 = vrot.lane.b32.xlu0 %v7830_v51, %s7118_s20  ;;  %v2420_v51 = vld [vmem:[%s8624_s11 + $0x48] sm:$0xff] }
0x16cd   :  { %1954 = vrot.lane.b32.xlu1 %v7868_v46, %s7118_s20  ;;  %2180 = vrot.lane.b32.xlu0 %v7907_v44, %s7118_s20  ;;  %v2423_v44 = vld [vmem:[%s8624_s11 + $0x60] sm:$0xff] }
0x16ce   :  { %v6649_v14 = vpack.c.bf16 %v2425_v13, %v2423_v44  ;;  %v2796_v44 = vrot.slane %v7974_v31, 2 }
0x16d1   :  { %1061 = vrot.lane.b32.xlu1 %v7712_v8, %s7118_s20  ;;  %836 = vrot.lane.b32.xlu0 %v7674_v17, %s7118_s20  ;;  %v2422_v8 = vld [vmem:[%s8624_s11 + $0x58] sm:$0xff]  ;;  %v2419_v17 = vld [vmem:[%s8624_s11 + $0x40] sm:$0xff] }
0x16d2   :  { %v6643_v46 = vpack.c.bf16 %v2422_v8, %v2420_v51 }
0x16d4   :  { %6644 = vmatprep.subr.bf16.mxu0 %v6643_v46 }
0x16d5   :  { %1288 = vrot.lane.b32.xlu0 %v7752_v45, %s7118_s20  ;;  %v2421_v45 = vld [vmem:[%s8624_s11 + $0x50] sm:$0xff] }
0x16d9   :  { %1175 = vrot.lane.b32.xlu0 %v7755_v3, %s7118_s20  ;;  %v6645_v3 = vpack.c.bf16 %v2421_v45, %v2419_v17 }
0x16db   :  { %6646 = vmatpush1.bf16.msra.mxu0 %v6645_v3 }
0x16dd   :  { %1841 = vrot.lane.b32.xlu0 %v7871_v54, %s7118_s20  ;;  %v2424_v54 = vld [vmem:[%s8624_s11 + $0x68] sm:$0xff] }
0x16de   :  { %v6647_v39 = vpack.c.bf16 %v2426_v37, %v2424_v54 }
0x16e0   :  { %6648 = vmatprep.subr.bf16.mxu0 %v6647_v39 }
0x16e1   :  { %6650 = vmatpush1.bf16.msra.mxu0 %v6649_v14 }
0x16e2   :  { %6652 = vmatprep.subr.bf16.mxu0 %v6651_v16 }
0x1737   :  { %v2399_v62 = vpop.permute.xlu0 %2398 }
0x1738   :  { %v2401_v18 = vmul.f32 %v2399_v62, %v2381_v60  ;;  %v2414_v60 = vld [vmem:[%s8624_s11 + $0x28] sm:$0xff] }
0x173a   :  { %2403 = vrot.lane.b32.xlu1 %v2401_v18, %s7118_s20 }
0x173b   :  { %v2289_v21 = vpop.permute.xlu1 %2288  ;;  %v1732_v20 = vpop.permute.xlu0 %1731 }
0x173c   :  { %v2291_v22 = vmul.f32 %v2289_v21, %v2271_v43  ;;  %1734 = vst.msk [vmem:[#allocation4] sm:$0xc0] %vm839_vm9, %v1732_v20  ;;  %v6655_v43 = vpack.c.bf16 %v2416_v38, %v2414_v60 }
0x173e   :  { %2293 = vrot.lane.b32.xlu0 %v2291_v22, %s7118_s20  ;;  %947 = vrot.lane.b32.xlu1 %v7715_v12, %s7118_s20 }
0x173f   :  { %v1955_v23 = vpop.permute.xlu1 %1954  ;;  %v2181_v28 = vpop.permute.xlu0 %2180 }
0x1740   :  { %1957 = vst.msk [vmem:[#allocation4] sm:$0x30] %vm1064_vm10, %v1955_v23 }
0x1741   :  { %2183 = vst.msk [vmem:[#allocation4] sm:$0xc] %vm950_vm11, %v2181_v28 }
0x1742   :  { %1401 = vrot.lane.b32.xlu1 %v7793_v61, %s7118_s20  ;;  %v2409_v61 = vld [vmem:[%s8624_s11] sm:$0xff] }
0x1743   :  { %v1062_v29 = vpop.permute.xlu1 %1061  ;;  %v837_v30 = vpop.permute.xlu0 %836 }
0x1744   :  { %1065 = vst.msk [vmem:[#allocation4 + $0x8] sm:$0x30] %vm1064_vm10, %v1062_v29 }
0x1745   :  { %840 = vst.msk [vmem:[#allocation4 + $0x8] sm:$0xc0] %vm839_vm9, %v837_v30 }
0x1746   :  { %2067 = vrot.lane.b32.xlu1 %v7910_v42, %s7118_s20  ;;  %v2411_v42 = vld [vmem:[%s8624_s11 + $0x10] sm:$0xff] }
0x1747   :  { %v1289_v32 = vpop.permute.xlu0 %1288  ;;  %v6653_v41 = vpack.c.bf16 %v2411_v42, %v2409_v61 }
0x1748   :  { %1291 = vst.msk [vmem:[#allocation4 + $0x8] sm:$0xc] %vm950_vm11, %v1289_v32 }
0x174b   :  { %v1176_v12 = vpop.permute.xlu0 %1175 }
0x174c   :  { %1178 = vst.msk [vmem:[#allocation3] sm:$0x30] %vm1064_vm10, %v1176_v12 }
0x174f   :  { %v1842_v33 = vpop.permute.xlu0 %1841  ;;  %v2418_v56 = vld [vmem:[#allocation4 + $0x8] sm:$0xff] }
0x1750   :  { %1844 = vst.msk [vmem:[#allocation3 + $0x8] sm:$0xc] %vm950_vm11, %v1842_v33 }
0x17ac   :  { %v2404_v34 = vpop.permute.xlu1 %2403 }
0x17ad   :  { %2406 = vst.msk [vmem:[#allocation4] sm:$0x3] %vm729_vm8, %v2404_v34 }
0x17b0   :  { %v948_v35 = vpop.permute.xlu1 %947  ;;  %v2294_v36 = vpop.permute.xlu0 %2293 }
0x17b1   :  { %951 = vst.msk [vmem:[#allocation3] sm:$0xc] %vm950_vm11, %v948_v35 }
0x17b2   :  { %2296 = vst.msk [vmem:[#allocation3 + $0x8] sm:$0xc0] %vm839_vm9, %v2294_v36 }
0x17b4   :  { %v1402_v49 = vpop.permute.xlu1 %1401  ;;  %v2417_v47 = vld [vmem:[#allocation4] sm:$0xff] }
0x17b5   :  { %1404 = vst.msk [vmem:[#allocation3] sm:$0xc0] %vm839_vm9, %v1402_v49  ;;  %5632 = vmatmul.mubr.msk.f32.vlgmr.msra.gmra.mrb[18].mxu0 %vm622_vm4, %v2417_v47 }
0x17b6   :  { %6654 = vmatpush1.bf16.msra.mxu0 %v6653_v41  ;;  %2503 = vmatprep.mubr.f32.mxu0 %v7115_v52 }
0x17b7   :  { %6656 = vmatprep.subr.bf16.mxu0 %v6655_v43 }
0x17b8   :  { %v2068_v53 = vpop.permute.xlu1 %2067 }
0x17b9   :  { %2070 = vst.msk [vmem:[#allocation3 + $0x8] sm:$0x30] %vm1064_vm10, %v2068_v53  ;;  %5633 = vmatmul.mubr.msk.f32.gmra.mrb[20].mxu0 %vm622_vm4, %v2418_v56 }
0x17ba   :  { %6658 = vmatpush1.bf16.msra.mxu0 %v6657_v50  ;;  %2580 = vmatprep.mubr.f32.mxu0 %v7115_v52 }
0x17bb   :  { %6671 = vmatprep.subr.bf16.mxu0 %v7116_v58 }
0x17bc   :  { %v2407_v19 = vld [vmem:[#allocation3] sm:$0xff] }
0x17bd   :  { %5634 = vmatmul.mubr.msk.f32.vlgmr.msra.gmra.mrb[18].mxu0 %vm622_vm4, %v2407_v19 }
0x17be   :  { %2586 = vmatprep.mubr.f32.mxu0 %v7115_v52  ;;  %6673 = vmatpush3.bf16.msra.mxu0 %v7921_v55 }
0x17bf   :  { %6674 = vmatprep.subr.bf16.mxu0 %v7116_v58 }
0x17c0   :  { %v2408_v63 = vld [vmem:[#allocation3 + $0x8] sm:$0xff] }
0x17c1   :  { %5635 = vmatmul.mubr.msk.f32.gmra.mrb[20].mxu0 %vm622_vm4, %v2408_v63 }
0x17c2   :  { %6676 = vmatpush3.bf16.msra.mxu0 %v7931_v1  ;;  %6209 = vmatprep.mubr.msk.f32.mxu0 %vm7117_vm2, %v7115_v52 }
0x17c3   :  { %6683 = vmatprep.subr.bf16.mxu0 %v7116_v58 }
0x1890   :  { %v2582_v9 = vpop.f32.mrb[18].mxu0 }
0x1891   :  { %v2605_v57 = vadd.f32 %v2598_v2, %v2582_v9  ;;  %v2584_v51 = vpop.f32.mrb[19].mxu0 }
0x1892   :  { %v2606_v8 = vadd.f32 %v2602_v4, %v2584_v51 }
0x1893   :  { %2609 = vst [vmem:[#allocation2] sm:$0xff] %v2605_v57 }
0x1894   :  { %2610 = vst [vmem:[#allocation2 + $0x8] sm:$0xff] %v2606_v8  ;;  %v2588_v46 = vpop.f32.mrb[20].mxu0 }
0x1895   :  { %v2607_v17 = vadd.f32 %v2598_v2, %v2588_v46  ;;  %v2590_v45 = vpop.f32.mrb[21].mxu0 }
0x1896   :  { %v2608_v3 = vadd.f32 %v2602_v4, %v2590_v45 }
0x1897   :  { %2611 = vst [vmem:[#allocation2 + $0x10] sm:$0xff] %v2607_v17 }
0x1898   :  { %2612 = vst [vmem:[#allocation2 + $0x18] sm:$0xff] %v2608_v3 }
0x189a   :  { %v2622_v54 = vld [vmem:[#allocation2] sm:$0x3]  ;;  %v2829_v53 = vld [vmem:[#allocation2] sm:$0xc] }
0x189b   :  { %v2693_v37 = vadd.f32 %v7972_v27, %v2622_v54 }
0x189d   :  { %v5641_v39 = vmul.f32 -1.442695, %v2693_v37 }
0x189f   :  { %6930 = vpow2.f32 %v5641_v39  ;;  %v2724_v13 = vld [vmem:[#allocation2 + $0x18] sm:$0xc0]  ;;  %v2939_v4 = vld [vmem:[#allocation2 + $0x18] sm:$0x30] }
0x18a0   :  { %v2798_v14 = vadd.f32 %v2796_v44, %v2724_v13 }
0x18a2   :  { %v5643_v15 = vmul.f32 -1.442695, %v2798_v14 }
0x18a4   :  { %6932 = vpow2.f32 %v5643_v15 }
0x18a5   :  { %6934 = vtanh.f32 %v2693_v37 }
0x18a9   :  { %v6931_v24 = vpop.eup %6930 }
0x18aa   :  { %v2698_v16 = vadd.f32 1.0, %v6931_v24 }
0x18ac   :  { %6936 = vrcp.f32 %v2698_v16 }
0x18ad   :  { %6938 = vtanh.f32 %v2798_v14 }
0x18ae   :  { %v6933_v62 = vpop.eup %6932 }
0x18af   :  { %v2803_v18 = vadd.f32 1.0, %v6933_v62  ;;  %v6935_v21 = vpop.eup %6934 }
0x18b1   :  { %6940 = vrcp.f32 %v2803_v18 }
0x18b6   :  { %v6937_v20 = vpop.eup %6936 }
0x18b7   :  { %v2701_v27 = vsel %vm7646_vm7, %v6935_v21, %v6937_v20  ;;  %v6939_v31 = vpop.eup %6938 }
0x18b8   :  { %2704 = vrot.lane.b32.xlu0 %v2701_v27, %s7119_s10  ;;  %v2702_v12 = vmul.f32 %v2701_v27, %v7663_v7 }
0x18bb   :  { %v6941_v22 = vpop.eup %6940 }
0x18bc   :  { %v2806_v23 = vsel %vm7646_vm7, %v6939_v31, %v6941_v22 }
0x18bd   :  { %2809 = vrot.lane.b32.xlu1 %v2806_v23, %s7119_s10  ;;  %v2807_v61 = vmul.f32 %v2806_v23, %v7660_v5 }
0x192a   :  { %v2705_v28 = vpop.permute.xlu0 %2704 }
0x192b   :  { %v2707_v29 = vmul.f32 %v2705_v28, %v2701_v27 }
0x192d   :  { %2709 = vrot.lane.b32.xlu0 %v2707_v29, %s7118_s20 }
0x192f   :  { %v2810_v30 = vpop.permute.xlu1 %2809 }
0x1930   :  { %v2812_v32 = vmul.f32 %v2810_v30, %v2806_v23 }
0x1932   :  { %2814 = vrot.lane.b32.xlu1 %v2812_v32, %s7118_s20 }
0x199f   :  { %v2710_v33 = vpop.permute.xlu0 %2709 }
0x19a0   :  { %v8103_v34 = vadd.f32 %v2710_v33, %v2702_v12 }
0x19a2   :  { %6942 = vtanh.f32 %v8103_v34  ;;  %v2915_v16 = vrot.slane %v8103_v34, 6 }
0x19a4   :  { %v2815_v42 = vpop.permute.xlu1 %2814 }
0x19a5   :  { %v8107_v35 = vadd.f32 %v2815_v42, %v2807_v61 }
0x19a7   :  { %6944 = vtanh.f32 %v8107_v35  ;;  %v3028_v20 = vrot.slane %v8107_v35, 2 }
0x19ac   :  { %v6943_v36 = vpop.eup %6942 }
0x19ad   :  { %2715 = vrot.lane.b32.xlu0 %v6943_v36, %s7119_s10 }
0x19b1   :  { %v6945_v60 = vpop.eup %6944 }
0x19b2   :  { %2820 = vrot.lane.b32.xlu1 %v6945_v60, %s7119_s10 }
0x1a1f   :  { %v2716_v38 = vpop.permute.xlu0 %2715 }
0x1a20   :  { %v2718_v7 = vmul.f32 %v2716_v38, %v2701_v27  ;;  %v3052_v38 = vld [vmem:[#allocation2] sm:$0x30] }
0x1a22   :  { %2720 = vrot.lane.b32.xlu0 %v2718_v7, %s7118_s20 }
0x1a24   :  { %v2821_v41 = vpop.permute.xlu1 %2820 }
0x1a25   :  { %v8113_v43 = vmul.f32 %v2821_v41, %v2806_v23 }
0x1a27   :  { %v2940_v5 = vrot.slane %v8113_v43, 6 }
0x1a29   :  { %2941 = vrot.lane.b32.xlu1 %v2940_v5, %s7118_s20 }
0x1a94   :  { %v2721_v40 = vpop.permute.xlu0 %2720 }
0x1a95   :  { %2723 = vst.msk [vmem:[#allocation3] sm:$0x3] %vm729_vm8, %v2721_v40  ;;  %6210 = vmatmul.mubr.msk.f32.vlgmr.msra.gmra.mrb[22].mxu0 %vm622_vm4, %v2721_v40 }
0x1a96   :  { %6685 = vmatpush3.bf16.msra.mxu0 %v7921_v55  ;;  %6231 = vmatprep.mubr.msk.f32.mxu0 %vm7117_vm2, %v7115_v52 }
0x1a97   :  { %6686 = vmatprep.subr.bf16.mxu0 %v7116_v58 }
0x1a9a   :  { %6688 = vmatpush3.bf16.msra.mxu0 %v7931_v1 }
0x1a9b   :  { %v2942_v48 = vpop.permute.xlu1 %2941  ;;  %6695 = vmatprep.subr.bf16.mxu0 %v7116_v58 }
0x1a9c   :  { %6221 = vmatmul.mubr.msk.f32.vlgmr.msra.gmra.mrb[30].mxu1 %vm622_vm4, %v2942_v48 }
0x1a9d   :  { %6691 = vmatpush3.bf16.msra.mxu1 %v7945_v6  ;;  %6242 = vmatprep.mubr.msk.f32.mxu1 %vm7117_vm2, %v7115_v52 }
0x1a9e   :  { %6692 = vmatprep.subr.bf16.mxu1 %v7116_v58 }
0x1aa1   :  { %6694 = vmatpush3.bf16.msra.mxu1 %v7957_v11 }
0x1aa2   :  { %6701 = vmatprep.subr.bf16.mxu1 %v7116_v58 }
0x1b68   :  { %v2898_v49 = vpop.f32.mrb[22].mxu0 }
0x1b69   :  { %v2903_v47 = vrot.slane %v2898_v49, 6  ;;  %v6211_v50 = vpop.f32.mrb[23].mxu0  ;;  %v3165_v49 = vld [vmem:[#allocation2 + $0x18] sm:$0xc] }
0x1b6b   :  { %v2905_v56 = vadd.f32 %v2903_v47, %v2829_v53 }
0x1b6d   :  { %v5645_v19 = vmul.f32 -1.442695, %v2905_v56 }
0x1b6f   :  { %6946 = vpow2.f32 %v5645_v19  ;;  %v3011_v63 = vpop.f32.mrb[30].mxu1 }
0x1b70   :  { %v3016_v0 = vrot.slane %v3011_v63, 4  ;;  %v6222_v2 = vpop.f32.mrb[31].mxu1 }
0x1b72   :  { %v3018_v9 = vadd.f32 %v3016_v0, %v2939_v4 }
0x1b74   :  { %v5647_v57 = vmul.f32 -1.442695, %v3018_v9 }
0x1b76   :  { %6948 = vpow2.f32 %v5647_v57 }
0x1b77   :  { %6950 = vtanh.f32 %v2905_v56 }
0x1b79   :  { %v6947_v51 = vpop.eup %6946 }
0x1b7a   :  { %v2910_v8 = vadd.f32 1.0, %v6947_v51 }
0x1b7c   :  { %6952 = vrcp.f32 %v2910_v8 }
0x1b7d   :  { %6954 = vtanh.f32 %v3018_v9 }
0x1b80   :  { %v6949_v46 = vpop.eup %6948 }
0x1b81   :  { %v3023_v17 = vadd.f32 1.0, %v6949_v46  ;;  %v6951_v45 = vpop.eup %6950 }
0x1b83   :  { %6956 = vrcp.f32 %v3023_v17 }
0x1b86   :  { %v6953_v3 = vpop.eup %6952 }
0x1b87   :  { %v2913_v54 = vsel %vm7646_vm7, %v6951_v45, %v6953_v3  ;;  %v6955_v37 = vpop.eup %6954 }
0x1b88   :  { %2919 = vrot.lane.b32.xlu0 %v2913_v54, %s7119_s10  ;;  %v2917_v62 = vmul.f32 %v2915_v16, %v2913_v54 }
0x1b8d   :  { %v6957_v39 = vpop.eup %6956 }
0x1b8e   :  { %v3026_v44 = vsel %vm7646_vm7, %v6955_v37, %v6957_v39 }
0x1b8f   :  { %3032 = vrot.lane.b32.xlu1 %v3026_v44, %s7119_s10  ;;  %v3030_v27 = vmul.f32 %v3028_v20, %v3026_v44 }
0x1bfa   :  { %v2920_v13 = vpop.permute.xlu0 %2919 }
0x1bfb   :  { %v2922_v14 = vmul.f32 %v2920_v13, %v2913_v54 }
0x1bfd   :  { %2924 = vrot.lane.b32.xlu0 %v2922_v14, %s7118_s20 }
0x1c01   :  { %v3033_v15 = vpop.permute.xlu1 %3032 }
0x1c02   :  { %v3035_v24 = vmul.f32 %v3033_v15, %v3026_v44 }
0x1c04   :  { %3037 = vrot.lane.b32.xlu1 %v3035_v24, %s7118_s20 }
0x1c6f   :  { %v2925_v18 = vpop.permute.xlu0 %2924 }
0x1c70   :  { %v8141_v21 = vadd.f32 %v2925_v18, %v2917_v62 }
0x1c72   :  { %6958 = vtanh.f32 %v8141_v21  ;;  %v3141_v3 = vrot.slane %v8141_v21, 6 }
0x1c76   :  { %v3038_v31 = vpop.permute.xlu1 %3037 }
0x1c77   :  { %v8145_v22 = vadd.f32 %v3038_v31, %v3030_v27 }
0x1c79   :  { %6960 = vtanh.f32 %v8145_v22 }
0x1c7c   :  { %v6959_v23 = vpop.eup %6958 }
0x1c7d   :  { %2930 = vrot.lane.b32.xlu0 %v6959_v23, %s7119_s10 }
0x1c83   :  { %v6961_v28 = vpop.eup %6960 }
0x1c84   :  { %3043 = vrot.lane.b32.xlu1 %v6961_v28, %s7119_s10 }
0x1cef   :  { %v2931_v29 = vpop.permute.xlu0 %2930 }
0x1cf0   :  { %v8150_v30 = vmul.f32 %v2931_v29, %v2913_v54 }
0x1cf2   :  { %v3053_v32 = vrot.slane %v8150_v30, 2 }
0x1cf4   :  { %3054 = vrot.lane.b32.xlu0 %v3053_v32, %s7118_s20 }
0x1cf6   :  { %v3044_v12 = vpop.permute.xlu1 %3043 }
0x1cf7   :  { %v8154_v33 = vmul.f32 %v3044_v12, %v3026_v44  ;;  %v3254_v44 = vrot.slane %v8145_v22, 2  ;;  %v3278_v12 = vld [vmem:[#allocation2] sm:$0xc0] }
0x1cf9   :  { %v3166_v34 = vrot.slane %v8154_v33, 4 }
0x1cfb   :  { %3167 = vrot.lane.b32.xlu1 %v3166_v34, %s7118_s20 }
0x1d66   :  { %v3055_v61 = vpop.permute.xlu0 %3054 }
0x1d67   :  { %6232 = vmatmul.mubr.msk.f32.vlgmr.msra.gmra.mrb[24].mxu0 %vm622_vm4, %v3055_v61 }
0x1d68   :  { %6697 = vmatpush3.bf16.msra.mxu0 %v7921_v55  ;;  %6253 = vmatprep.mubr.msk.f32.mxu0 %vm7117_vm2, %v7115_v52 }
0x1d69   :  { %6698 = vmatprep.subr.bf16.mxu0 %v7116_v58 }
0x1d6c   :  { %6700 = vmatpush3.bf16.msra.mxu0 %v7931_v1 }
0x1d6d   :  { %v3168_v42 = vpop.permute.xlu1 %3167  ;;  %6707 = vmatprep.subr.bf16.mxu0 %v7116_v58 }
0x1d6e   :  { %6243 = vmatmul.mubr.msk.f32.vlgmr.msra.gmra.mrb[32].mxu1 %vm622_vm4, %v3168_v42  ;;  %v3391_v42 = vld [vmem:[#allocation2 + $0x18] sm:$0x3] }
0x1d6f   :  { %6703 = vmatpush3.bf16.msra.mxu1 %v7945_v6  ;;  %6264 = vmatprep.mubr.msk.f32.mxu1 %vm7117_vm2, %v7115_v52 }
0x1d70   :  { %6704 = vmatprep.subr.bf16.mxu1 %v7116_v58 }
0x1d73   :  { %6706 = vmatpush3.bf16.msra.mxu1 %v7957_v11 }
0x1d74   :  { %6713 = vmatprep.subr.bf16.mxu1 %v7116_v58 }
0x1e3a   :  { %v3124_v35 = vpop.f32.mrb[24].mxu0 }
0x1e3b   :  { %v3129_v36 = vrot.slane %v3124_v35, 4  ;;  %v6233_v60 = vpop.f32.mrb[25].mxu0 }
0x1e3d   :  { %v3131_v7 = vadd.f32 %v3129_v36, %v3052_v38 }
0x1e3f   :  { %v5649_v41 = vmul.f32 -1.442695, %v3131_v7 }
0x1e41   :  { %6962 = vpow2.f32 %v5649_v41  ;;  %v3237_v5 = vpop.f32.mrb[32].mxu1 }
0x1e42   :  { %v3242_v40 = vrot.slane %v3237_v5, 6  ;;  %v6244_v48 = vpop.f32.mrb[33].mxu1 }
0x1e44   :  { %v3244_v47 = vadd.f32 %v3242_v40, %v3165_v49 }
0x1e46   :  { %v5651_v50 = vmul.f32 -1.442695, %v3244_v47 }
0x1e48   :  { %6964 = vpow2.f32 %v5651_v50 }
0x1e49   :  { %6966 = vtanh.f32 %v3131_v7 }
0x1e4b   :  { %v6963_v53 = vpop.eup %6962 }
0x1e4c   :  { %v3136_v56 = vadd.f32 1.0, %v6963_v53 }
0x1e4e   :  { %6968 = vrcp.f32 %v3136_v56 }
0x1e4f   :  { %6970 = vtanh.f32 %v3244_v47 }
0x1e52   :  { %v6965_v19 = vpop.eup %6964 }
0x1e53   :  { %v3249_v63 = vadd.f32 1.0, %v6965_v19  ;;  %v6967_v0 = vpop.eup %6966 }
0x1e55   :  { %6972 = vrcp.f32 %v3249_v63 }
0x1e58   :  { %v6969_v2 = vpop.eup %6968 }
0x1e59   :  { %v3139_v4 = vsel %vm7646_vm7, %v6967_v0, %v6969_v2  ;;  %v6971_v9 = vpop.eup %6970 }
0x1e5a   :  { %3145 = vrot.lane.b32.xlu0 %v3139_v4, %s7119_s10  ;;  %v3143_v54 = vmul.f32 %v3141_v3, %v3139_v4 }
0x1e5f   :  { %v6973_v57 = vpop.eup %6972 }
0x1e60   :  { %v3252_v51 = vsel %vm7646_vm7, %v6971_v9, %v6973_v57 }
0x1e61   :  { %3258 = vrot.lane.b32.xlu1 %v3252_v51, %s7119_s10  ;;  %v3256_v13 = vmul.f32 %v3254_v44, %v3252_v51 }
0x1ecc   :  { %v3146_v8 = vpop.permute.xlu0 %3145 }
0x1ecd   :  { %v3148_v46 = vmul.f32 %v3146_v8, %v3139_v4 }
0x1ecf   :  { %3150 = vrot.lane.b32.xlu0 %v3148_v46, %s7118_s20 }
0x1ed3   :  { %v3259_v17 = vpop.permute.xlu1 %3258 }
0x1ed4   :  { %v3261_v45 = vmul.f32 %v3259_v17, %v3252_v51 }
0x1ed6   :  { %3263 = vrot.lane.b32.xlu1 %v3261_v45, %s7118_s20 }
0x1f41   :  { %v3151_v37 = vpop.permute.xlu0 %3150 }
0x1f42   :  { %v8181_v39 = vadd.f32 %v3151_v37, %v3143_v54 }
0x1f44   :  { %6974 = vtanh.f32 %v8181_v39 }
0x1f48   :  { %v3264_v14 = vpop.permute.xlu1 %3263 }
0x1f49   :  { %v8185_v15 = vadd.f32 %v3264_v14, %v3256_v13 }
0x1f4b   :  { %6976 = vtanh.f32 %v8185_v15  ;;  %v3477_v8 = vrot.slane %v8185_v15, 2 }
0x1f4e   :  { %v6975_v24 = vpop.eup %6974 }
0x1f4f   :  { %3156 = vrot.lane.b32.xlu0 %v6975_v24, %s7119_s10 }
0x1f55   :  { %v6977_v16 = vpop.eup %6976 }
0x1f56   :  { %3269 = vrot.lane.b32.xlu1 %v6977_v16, %s7119_s10  ;;  %v3501_v16 = vld [vmem:[#allocation2 + $0x10] sm:$0x3] }
0x1fc1   :  { %v3157_v62 = vpop.permute.xlu0 %3156 }
0x1fc2   :  { %v8190_v18 = vmul.f32 %v3157_v62, %v3139_v4  ;;  %v3367_v4 = vrot.slane %v8181_v39, 6 }
0x1fc4   :  { %v3279_v21 = vrot.slane %v8190_v18, 4 }
0x1fc6   :  { %3280 = vrot.lane.b32.xlu0 %v3279_v21, %s7118_s20 }
0x1fc8   :  { %v3270_v20 = vpop.permute.xlu1 %3269 }
0x1fc9   :  { %v8194_v27 = vmul.f32 %v3270_v20, %v3252_v51 }
0x1fcb   :  { %v3392_v31 = vrot.slane %v8194_v27, 2 }
0x1fcd   :  { %3393 = vrot.lane.b32.xlu1 %v3392_v31, %s7118_s20 }
0x2038   :  { %v3281_v22 = vpop.permute.xlu0 %3280 }
0x2039   :  { %6254 = vmatmul.mubr.msk.f32.vlgmr.msra.gmra.mrb[26].mxu0 %vm622_vm4, %v3281_v22 }
0x203a   :  { %6709 = vmatpush3.bf16.msra.mxu0 %v7921_v55  ;;  %6275 = vmatprep.mubr.msk.f32.mxu0 %vm7117_vm2, %v7115_v52 }
0x203b   :  { %6710 = vmatprep.subr.bf16.mxu0 %v7116_v58 }
0x203e   :  { %6712 = vmatpush3.bf16.msra.mxu0 %v7931_v1 }
0x203f   :  { %v3394_v23 = vpop.permute.xlu1 %3393  ;;  %6719 = vmatprep.subr.bf16.mxu0 %v7116_v58 }
0x2040   :  { %6265 = vmatmul.mubr.msk.f32.vlgmr.msra.gmra.mrb[34].mxu1 %vm622_vm4, %v3394_v23 }
0x2041   :  { %6715 = vmatpush3.bf16.msra.mxu1 %v7945_v6  ;;  %6286 = vmatprep.mubr.msk.f32.mxu1 %vm7117_vm2, %v7115_v52 }
0x2042   :  { %6716 = vmatprep.subr.bf16.mxu1 %v7116_v58 }
0x2045   :  { %6718 = vmatpush3.bf16.msra.mxu1 %v7957_v11 }
0x2046   :  { %6725 = vmatprep.subr.bf16.mxu1 %v7116_v58 }
0x210c   :  { %v3350_v28 = vpop.f32.mrb[26].mxu0 }
0x210d   :  { %v3355_v29 = vrot.slane %v3350_v28, 2  ;;  %v6255_v32 = vpop.f32.mrb[27].mxu0 }
0x210f   :  { %v3357_v34 = vadd.f32 %v3355_v29, %v3278_v12  ;;  %v3611_v29 = vld [vmem:[#allocation2 + $0x8] sm:$0xc0] }
0x2111   :  { %v5653_v61 = vmul.f32 -1.442695, %v3357_v34 }
0x2113   :  { %6978 = vpow2.f32 %v5653_v61  ;;  %v3463_v35 = vpop.f32.mrb[34].mxu1 }
0x2114   :  { %v3467_v36 = vadd.f32 %v3463_v35, %v3391_v42  ;;  %v6266_v60 = vpop.f32.mrb[35].mxu1 }
0x2116   :  { %v5655_v38 = vmul.f32 -1.442695, %v3467_v36 }
0x2118   :  { %6980 = vpow2.f32 %v5655_v38 }
0x2119   :  { %6982 = vtanh.f32 %v3357_v34 }
0x211d   :  { %v6979_v7 = vpop.eup %6978 }
0x211e   :  { %v3362_v41 = vadd.f32 1.0, %v6979_v7 }
0x2120   :  { %6984 = vrcp.f32 %v3362_v41 }
0x2121   :  { %6986 = vtanh.f32 %v3467_v36 }
0x2122   :  { %v6981_v5 = vpop.eup %6980 }
0x2123   :  { %v3472_v40 = vadd.f32 1.0, %v6981_v5  ;;  %v6983_v48 = vpop.eup %6982 }
0x2125   :  { %6988 = vrcp.f32 %v3472_v40 }
0x212a   :  { %v6985_v49 = vpop.eup %6984 }
0x212b   :  { %v3365_v47 = vsel %vm7646_vm7, %v6983_v48, %v6985_v49  ;;  %v6987_v50 = vpop.eup %6986 }
0x212c   :  { %3371 = vrot.lane.b32.xlu0 %v3365_v47, %s7119_s10  ;;  %v3369_v9 = vmul.f32 %v3367_v4, %v3365_v47 }
0x212f   :  { %v6989_v53 = vpop.eup %6988 }
0x2130   :  { %v3475_v56 = vsel %vm7646_vm7, %v6987_v50, %v6989_v53 }
0x2131   :  { %3481 = vrot.lane.b32.xlu1 %v3475_v56, %s7119_s10  ;;  %v3479_v46 = vmul.f32 %v3477_v8, %v3475_v56 }
0x219e   :  { %v3372_v19 = vpop.permute.xlu0 %3371 }
0x219f   :  { %v3374_v63 = vmul.f32 %v3372_v19, %v3365_v47 }
0x21a1   :  { %3376 = vrot.lane.b32.xlu0 %v3374_v63, %s7118_s20 }
0x21a3   :  { %v3482_v0 = vpop.permute.xlu1 %3481 }
0x21a4   :  { %v3484_v2 = vmul.f32 %v3482_v0, %v3475_v56 }
0x21a6   :  { %3486 = vrot.lane.b32.xlu1 %v3484_v2, %s7118_s20 }
0x2213   :  { %v3377_v57 = vpop.permute.xlu0 %3376 }
0x2214   :  { %v8221_v51 = vadd.f32 %v3377_v57, %v3369_v9 }
0x2216   :  { %6990 = vtanh.f32 %v8221_v51  ;;  %v3587_v50 = vrot.slane %v8221_v51, 6 }
0x2218   :  { %v3487_v17 = vpop.permute.xlu1 %3486 }
0x2219   :  { %v8225_v45 = vadd.f32 %v3487_v17, %v3479_v46 }
0x221b   :  { %6992 = vtanh.f32 %v8225_v45  ;;  %v3697_v63 = vrot.slane %v8225_v45, 2 }
0x2220   :  { %v6991_v3 = vpop.eup %6990 }
0x2221   :  { %3382 = vrot.lane.b32.xlu0 %v6991_v3, %s7119_s10 }
0x2225   :  { %v6993_v54 = vpop.eup %6992 }
0x2226   :  { %3492 = vrot.lane.b32.xlu1 %v6993_v54, %s7119_s10 }
0x2293   :  { %v3383_v37 = vpop.permute.xlu0 %3382 }
0x2294   :  { %v8230_v39 = vmul.f32 %v3383_v37, %v3365_v47 }
0x2296   :  { %v3502_v44 = vrot.slane %v8230_v39, 6 }
0x2298   :  { %3503 = vrot.lane.b32.xlu0 %v3502_v44, %s7118_s20  ;;  %v3493_v13 = vpop.permute.xlu1 %3492 }
0x2299   :  { %v3495_v14 = vmul.f32 %v3493_v13, %v3475_v56 }
0x229b   :  { %3497 = vrot.lane.b32.xlu1 %v3495_v14, %s7118_s20  ;;  %v3721_v14 = vld [vmem:[#allocation2 + $0x10] sm:$0xc] }
0x230a   :  { %v3504_v15 = vpop.permute.xlu0 %3503 }
0x230b   :  { %6276 = vmatmul.mubr.msk.f32.vlgmr.msra.gmra.mrb[28].mxu0 %vm622_vm4, %v3504_v15 }
0x230c   :  { %6721 = vmatpush3.bf16.msra.mxu0 %v7921_v55  ;;  %6297 = vmatprep.mubr.msk.f32.mxu0 %vm7117_vm2, %v7115_v52 }
0x230d   :  { %v3498_v24 = vpop.permute.xlu1 %3497  ;;  %6722 = vmatprep.subr.bf16.mxu0 %v7116_v58 }
0x230e   :  { %3500 = vst.msk [vmem:[#allocation4 + $0x8] sm:$0x3] %vm729_vm8, %v3498_v24  ;;  %6287 = vmatmul.mubr.msk.f32.vlgmr.msra.gmra.mrb[36].mxu1 %vm622_vm4, %v3498_v24 }
0x230f   :  { %6727 = vmatpush3.bf16.msra.mxu1 %v7945_v6  ;;  %6308 = vmatprep.mubr.msk.f32.mxu1 %vm7117_vm2, %v7115_v52 }
0x2310   :  { %6724 = vmatpush3.bf16.msra.mxu0 %v7931_v1  ;;  %6728 = vmatprep.subr.bf16.mxu1 %v7116_v58 }
0x2311   :  { %6731 = vmatprep.subr.bf16.mxu0 %v7116_v58 }
0x2313   :  { %6730 = vmatpush3.bf16.msra.mxu1 %v7957_v11 }
0x2314   :  { %6737 = vmatprep.subr.bf16.mxu1 %v7116_v58 }
0x23de   :  { %v3573_v62 = vpop.f32.mrb[28].mxu0 }
0x23df   :  { %v3577_v21 = vadd.f32 %v3573_v62, %v3501_v16  ;;  %v6277_v20 = vpop.f32.mrb[29].mxu0 }
0x23e0   :  { %v3831_v20 = vld [vmem:[#allocation2 + $0x8] sm:$0x30] }
0x23e1   :  { %v5657_v31 = vmul.f32 -1.442695, %v3577_v21  ;;  %v3680_v22 = vpop.f32.mrb[36].mxu1 }
0x23e2   :  { %v3685_v23 = vrot.slane %v3680_v22, 2  ;;  %v6288_v28 = vpop.f32.mrb[37].mxu1 }
0x23e3   :  { %6994 = vpow2.f32 %v5657_v31 }
0x23e4   :  { %v3687_v32 = vadd.f32 %v3685_v23, %v3611_v29 }
0x23e6   :  { %v5659_v12 = vmul.f32 -1.442695, %v3687_v32 }
0x23e8   :  { %6996 = vpow2.f32 %v5659_v12 }
0x23e9   :  { %6998 = vtanh.f32 %v3577_v21 }
0x23ed   :  { %v6995_v34 = vpop.eup %6994 }
0x23ee   :  { %v3582_v61 = vadd.f32 1.0, %v6995_v34 }
0x23f0   :  { %7000 = vrcp.f32 %v3582_v61 }
0x23f1   :  { %7002 = vtanh.f32 %v3687_v32 }
0x23f2   :  { %v6997_v42 = vpop.eup %6996 }
0x23f3   :  { %v3692_v35 = vadd.f32 1.0, %v6997_v42  ;;  %v6999_v36 = vpop.eup %6998 }
0x23f5   :  { %7004 = vrcp.f32 %v3692_v35 }
0x23fa   :  { %v7001_v60 = vpop.eup %7000 }
0x23fb   :  { %v3585_v38 = vsel %vm7646_vm7, %v6999_v36, %v7001_v60  ;;  %v7003_v7 = vpop.eup %7002 }
0x23fc   :  { %3591 = vrot.lane.b32.xlu0 %v3585_v38, %s7119_s10  ;;  %v3589_v53 = vmul.f32 %v3587_v50, %v3585_v38 }
0x23ff   :  { %v7005_v41 = vpop.eup %7004 }
0x2400   :  { %v3695_v5 = vsel %vm7646_vm7, %v7003_v7, %v7005_v41 }
0x2401   :  { %3701 = vrot.lane.b32.xlu1 %v3695_v5, %s7119_s10  ;;  %v3699_v0 = vmul.f32 %v3697_v63, %v3695_v5 }
0x246e   :  { %v3592_v40 = vpop.permute.xlu0 %3591 }
0x246f   :  { %v3594_v48 = vmul.f32 %v3592_v40, %v3585_v38 }
0x2471   :  { %3596 = vrot.lane.b32.xlu0 %v3594_v48, %s7118_s20 }
0x2473   :  { %v3702_v49 = vpop.permute.xlu1 %3701 }
0x2474   :  { %v3704_v47 = vmul.f32 %v3702_v49, %v3695_v5 }
0x2476   :  { %3706 = vrot.lane.b32.xlu1 %v3704_v47, %s7118_s20 }
0x24e3   :  { %v3597_v56 = vpop.permute.xlu0 %3596 }
0x24e4   :  { %v8259_v19 = vadd.f32 %v3597_v56, %v3589_v53 }
0x24e6   :  { %7006 = vtanh.f32 %v8259_v19 }
0x24e8   :  { %v3707_v2 = vpop.permute.xlu1 %3706 }
0x24e9   :  { %v8263_v4 = vadd.f32 %v3707_v2, %v3699_v0 }
0x24eb   :  { %7008 = vtanh.f32 %v8263_v4  ;;  %v3920_v47 = vrot.slane %v8263_v4, 2 }
0x24f0   :  { %v7007_v9 = vpop.eup %7006 }
0x24f1   :  { %3602 = vrot.lane.b32.xlu0 %v7007_v9, %s7119_s10 }
0x24f5   :  { %v7009_v57 = vpop.eup %7008 }
0x24f6   :  { %3712 = vrot.lane.b32.xlu1 %v7009_v57, %s7119_s10 }
0x2563   :  { %v3603_v51 = vpop.permute.xlu0 %3602 }
0x2564   :  { %v3605_v8 = vmul.f32 %v3603_v51, %v3585_v38 }
0x2566   :  { %3607 = vrot.lane.b32.xlu0 %v3605_v8, %s7118_s20 }
0x2568   :  { %v3713_v46 = vpop.permute.xlu1 %3712 }
0x2569   :  { %v8269_v17 = vmul.f32 %v3713_v46, %v3695_v5  ;;  %v3807_v5 = vrot.slane %v8259_v19, 6 }
0x256b   :  { %v3832_v45 = vrot.slane %v8269_v17, 6 }
0x256d   :  { %3833 = vrot.lane.b32.xlu1 %v3832_v45, %s7118_s20 }
0x25d8   :  { %v3608_v3 = vpop.permute.xlu0 %3607 }
0x25d9   :  { %3610 = vst.msk [vmem:[#allocation3 + $0x8] sm:$0x3] %vm729_vm8, %v3608_v3  ;;  %6298 = vmatmul.mubr.msk.f32.vlgmr.msra.gmra.mrb[30].mxu0 %vm622_vm4, %v3608_v3 }
0x25da   :  { %6733 = vmatpush3.bf16.msra.mxu0 %v7921_v55  ;;  %6319 = vmatprep.mubr.msk.f32.mxu0 %vm7117_vm2, %v7115_v52 }
0x25db   :  { %6734 = vmatprep.subr.bf16.mxu0 %v7116_v58 }
0x25de   :  { %6736 = vmatpush3.bf16.msra.mxu0 %v7931_v1 }
0x25df   :  { %v3834_v54 = vpop.permute.xlu1 %3833  ;;  %6743 = vmatprep.subr.bf16.mxu0 %v7116_v58 }
0x25e0   :  { %6309 = vmatmul.mubr.msk.f32.vlgmr.msra.gmra.mrb[38].mxu1 %vm622_vm4, %v3834_v54 }
0x25e1   :  { %6739 = vmatpush3.bf16.msra.mxu1 %v7945_v6  ;;  %6330 = vmatprep.mubr.msk.f32.mxu1 %vm7117_vm2, %v7115_v52 }
0x25e2   :  { %6740 = vmatprep.subr.bf16.mxu1 %v7116_v58 }
0x25e5   :  { %6742 = vmatpush3.bf16.msra.mxu1 %v7957_v11 }
0x25e6   :  { %6749 = vmatprep.subr.bf16.mxu1 %v7116_v58 }
0x26ac   :  { %v3790_v37 = vpop.f32.mrb[30].mxu0 }
0x26ad   :  { %v3795_v44 = vrot.slane %v3790_v37, 6  ;;  %v6299_v13 = vpop.f32.mrb[31].mxu0 }
0x26af   :  { %v3797_v15 = vadd.f32 %v3795_v44, %v3721_v14 }
0x26b1   :  { %v5661_v24 = vmul.f32 -1.442695, %v3797_v15 }
0x26b3   :  { %7010 = vpow2.f32 %v5661_v24  ;;  %v3903_v16 = vpop.f32.mrb[38].mxu1 }
0x26b4   :  { %v3908_v62 = vrot.slane %v3903_v16, 4  ;;  %v6310_v21 = vpop.f32.mrb[39].mxu1 }
0x26b6   :  { %v3910_v31 = vadd.f32 %v3908_v62, %v3831_v20 }
0x26b8   :  { %v5663_v22 = vmul.f32 -1.442695, %v3910_v31 }
0x26ba   :  { %7012 = vpow2.f32 %v5663_v22 }
0x26bb   :  { %7014 = vtanh.f32 %v3797_v15 }
0x26bd   :  { %v7011_v23 = vpop.eup %7010 }
0x26be   :  { %v3802_v28 = vadd.f32 1.0, %v7011_v23 }
0x26c0   :  { %7016 = vrcp.f32 %v3802_v28 }
0x26c1   :  { %7018 = vtanh.f32 %v3910_v31 }
0x26c4   :  { %v7013_v29 = vpop.eup %7012 }
0x26c5   :  { %v3915_v32 = vadd.f32 1.0, %v7013_v29  ;;  %v7015_v12 = vpop.eup %7014 }
0x26c7   :  { %7020 = vrcp.f32 %v3915_v32 }
0x26ca   :  { %v7017_v34 = vpop.eup %7016 }
0x26cb   :  { %v3805_v61 = vsel %vm7646_vm7, %v7015_v12, %v7017_v34  ;;  %v7019_v42 = vpop.eup %7018 }
0x26cc   :  { %3811 = vrot.lane.b32.xlu0 %v3805_v61, %s7119_s10  ;;  %v3809_v40 = vmul.f32 %v3807_v5, %v3805_v61 }
0x26d1   :  { %v7021_v35 = vpop.eup %7020 }
0x26d2   :  { %v3918_v36 = vsel %vm7646_vm7, %v7019_v42, %v7021_v35 }
0x26d3   :  { %3924 = vrot.lane.b32.xlu1 %v3918_v36, %s7119_s10  ;;  %v3922_v50 = vmul.f32 %v3920_v47, %v3918_v36 }
0x273e   :  { %v3812_v60 = vpop.permute.xlu0 %3811 }
0x273f   :  { %v3814_v38 = vmul.f32 %v3812_v60, %v3805_v61 }
0x2741   :  { %3816 = vrot.lane.b32.xlu0 %v3814_v38, %s7118_s20 }
0x2745   :  { %v3925_v7 = vpop.permute.xlu1 %3924 }
0x2746   :  { %v3927_v41 = vmul.f32 %v3925_v7, %v3918_v36 }
0x2748   :  { %3929 = vrot.lane.b32.xlu1 %v3927_v41, %s7118_s20 }
0x27b3   :  { %v3817_v48 = vpop.permute.xlu0 %3816 }
0x27b4   :  { %v8297_v49 = vadd.f32 %v3817_v48, %v3809_v40 }
0x27b6   :  { %7022 = vtanh.f32 %v8297_v49  ;;  %v4033_v42 = vrot.slane %v8297_v49, 6 }
0x27ba   :  { %v3930_v53 = vpop.permute.xlu1 %3929 }
0x27bb   :  { %v8301_v56 = vadd.f32 %v3930_v53, %v3922_v50 }
0x27bd   :  { %7024 = vtanh.f32 %v8301_v56  ;;  %v4146_v38 = vrot.slane %v8301_v56, 2 }
0x27c0   :  { %v7023_v63 = vpop.eup %7022 }
0x27c1   :  { %3822 = vrot.lane.b32.xlu0 %v7023_v63, %s7119_s10 }
0x27c7   :  { %v7025_v0 = vpop.eup %7024 }
0x27c8   :  { %3935 = vrot.lane.b32.xlu1 %v7025_v0, %s7119_s10 }
0x2833   :  { %v3823_v19 = vpop.permute.xlu0 %3822 }
0x2834   :  { %v8306_v2 = vmul.f32 %v3823_v19, %v3805_v61 }
0x2836   :  { %v3945_v9 = vrot.slane %v8306_v2, 2 }
0x2838   :  { %3946 = vrot.lane.b32.xlu0 %v3945_v9, %s7118_s20 }
0x283a   :  { %v3936_v4 = vpop.permute.xlu1 %3935 }
0x283b   :  { %v8310_v57 = vmul.f32 %v3936_v4, %v3918_v36 }
0x283d   :  { %v4058_v51 = vrot.slane %v8310_v57, 4 }
0x283f   :  { %4059 = vrot.lane.b32.xlu1 %v4058_v51, %s7118_s20 }
0x28aa   :  { %v3947_v8 = vpop.permute.xlu0 %3946 }
0x28ab   :  { %6320 = vmatmul.mubr.msk.f32.vlgmr.msra.gmra.mrb[32].mxu0 %vm622_vm4, %v3947_v8  ;;  %v4170_v8 = vld [vmem:[#allocation2 + $0x10] sm:$0xc0] }
0x28ac   :  { %6745 = vmatpush3.bf16.msra.mxu0 %v7921_v55  ;;  %6341 = vmatprep.mubr.msk.f32.mxu0 %vm7117_vm2, %v7115_v52 }
0x28ad   :  { %6746 = vmatprep.subr.bf16.mxu0 %v7116_v58 }
0x28b0   :  { %6748 = vmatpush3.bf16.msra.mxu0 %v7931_v1  ;;  %v3944_v1 = vld [vmem:[#allocation2 + $0x10] sm:$0x30] }
0x28b1   :  { %v4060_v46 = vpop.permute.xlu1 %4059  ;;  %6355 = vmatprep.subr.mxu0 %v7115_v52 }
0x28b2   :  { %6331 = vmatmul.mubr.msk.f32.vlgmr.msra.gmra.mrb[40].mxu1 %vm622_vm4, %v4060_v46 }
0x28b3   :  { %6751 = vmatpush3.bf16.msra.mxu1 %v7945_v6  ;;  %6352 = vmatprep.mubr.msk.f32.mxu1 %vm7117_vm2, %v7115_v52  ;;  %v4057_v6 = vld [vmem:[#allocation2 + $0x8] sm:$0xc] }
0x28b4   :  { %6752 = vmatprep.subr.bf16.mxu1 %v7116_v58 }
0x28b7   :  { %6754 = vmatpush3.bf16.msra.mxu1 %v7957_v11 }
0x28b8   :  { %6365 = vmatprep.subr.mxu1 %v7115_v52 }
0x297e   :  { %v4016_v55 = vpop.f32.mrb[32].mxu0 }
0x297f   :  { %v4021_v45 = vrot.slane %v4016_v55, 4  ;;  %v6321_v3 = vpop.f32.mrb[33].mxu0 }
0x2981   :  { %v4023_v54 = vadd.f32 %v4021_v45, %v3944_v1  ;;  %v4283_v45 = vld [vmem:[#allocation2 + $0x8] sm:$0x3] }
0x2983   :  { %v5665_v37 = vmul.f32 -1.442695, %v4023_v54 }
0x2985   :  { %7026 = vpow2.f32 %v5665_v37  ;;  %v4129_v44 = vpop.f32.mrb[40].mxu1 }
0x2986   :  { %v4134_v13 = vrot.slane %v4129_v44, 6  ;;  %v6332_v14 = vpop.f32.mrb[41].mxu1 }
0x2988   :  { %v4136_v15 = vadd.f32 %v4134_v13, %v4057_v6 }
0x298a   :  { %v5667_v24 = vmul.f32 -1.442695, %v4136_v15 }
0x298c   :  { %7028 = vpow2.f32 %v5667_v24 }
0x298d   :  { %7030 = vtanh.f32 %v4023_v54 }
0x298f   :  { %v7027_v16 = vpop.eup %7026 }
0x2990   :  { %v4028_v62 = vadd.f32 1.0, %v7027_v16 }
0x2992   :  { %7032 = vrcp.f32 %v4028_v62 }
0x2993   :  { %7034 = vtanh.f32 %v4136_v15 }
0x2996   :  { %v7029_v11 = vpop.eup %7028 }
0x2997   :  { %v4141_v21 = vadd.f32 1.0, %v7029_v11  ;;  %v7031_v20 = vpop.eup %7030 }
0x2999   :  { %7036 = vrcp.f32 %v4141_v21 }
0x299c   :  { %v7033_v31 = vpop.eup %7032 }
0x299d   :  { %v4031_v22 = vsel %vm7646_vm7, %v7031_v20, %v7033_v31  ;;  %v7035_v23 = vpop.eup %7034 }
0x299e   :  { %4037 = vrot.lane.b32.xlu0 %v4031_v22, %s7119_s10  ;;  %v4035_v35 = vmul.f32 %v4033_v42, %v4031_v22 }
0x29a3   :  { %v7037_v28 = vpop.eup %7036 }
0x29a4   :  { %v4144_v29 = vsel %vm7646_vm7, %v7035_v23, %v7037_v28 }
0x29a5   :  { %4150 = vrot.lane.b32.xlu1 %v4144_v29, %s7119_s10  ;;  %v4148_v7 = vmul.f32 %v4146_v38, %v4144_v29 }
0x2a10   :  { %v4038_v32 = vpop.permute.xlu0 %4037 }
0x2a11   :  { %v4040_v12 = vmul.f32 %v4038_v32, %v4031_v22 }
0x2a13   :  { %4042 = vrot.lane.b32.xlu0 %v4040_v12, %s7118_s20 }
0x2a17   :  { %v4151_v34 = vpop.permute.xlu1 %4150 }
0x2a18   :  { %v4153_v61 = vmul.f32 %v4151_v34, %v4144_v29 }
0x2a1a   :  { %4155 = vrot.lane.b32.xlu1 %v4153_v61, %s7118_s20 }
0x2a85   :  { %v4043_v36 = vpop.permute.xlu0 %4042 }
0x2a86   :  { %v4045_v60 = vadd.f32 %v4043_v36, %v4035_v35 }
0x2a88   :  { %7038 = vtanh.f32 %v4045_v60  ;;  %v4259_v28 = vrot.slane %v4045_v60, 6 }
0x2a8c   :  { %v4156_v41 = vpop.permute.xlu1 %4155 }
0x2a8d   :  { %v4158_v5 = vadd.f32 %v4156_v41, %v4148_v7 }
0x2a8f   :  { %7040 = vtanh.f32 %v4158_v5  ;;  %v4369_v34 = vrot.slane %v4158_v5, 2 }
0x2a92   :  { %v7039_v40 = vpop.eup %7038 }
0x2a93   :  { %4048 = vrot.lane.b32.xlu0 %v7039_v40, %s7119_s10 }
0x2a99   :  { %v7041_v48 = vpop.eup %7040 }
0x2a9a   :  { %4161 = vrot.lane.b32.xlu1 %v7041_v48, %s7119_s10 }
0x2b05   :  { %v4049_v47 = vpop.permute.xlu0 %4048 }
0x2b06   :  { %v8340_v50 = vmul.f32 %v4049_v47, %v4031_v22 }
0x2b08   :  { %v4171_v49 = vrot.slane %v8340_v50, 4 }
0x2b0a   :  { %4172 = vrot.lane.b32.xlu0 %v4171_v49, %s7118_s20 }
0x2b0c   :  { %v4162_v53 = vpop.permute.xlu1 %4161 }
0x2b0d   :  { %v4164_v63 = vmul.f32 %v4162_v53, %v4144_v29 }
0x2b0f   :  { %v4284_v56 = vrot.slane %v4164_v63, 2 }
0x2b11   :  { %4285 = vrot.lane.b32.xlu1 %v4284_v56, %s7118_s20 }
0x2b7c   :  { %v4173_v0 = vpop.permute.xlu0 %4172 }
0x2b7d   :  { %6342 = vmatmul.mubr.msk.f32.vlgmr.msra.gmra.mrb[34].mxu0 %vm622_vm4, %v4173_v0 }
0x2b7e   :  { %6357 = vmatprep.mubr.msk.f32.mxu0 %vm7117_vm2, %v7115_v52 }
0x2b83   :  { %v4286_v19 = vpop.permute.xlu1 %4285 }
0x2b84   :  { %6353 = vmatmul.mubr.msk.f32.vlgmr.msra.gmra.mrb[42].mxu1 %vm622_vm4, %v4286_v19 }
0x2b85   :  { %6367 = vmatprep.mubr.msk.f32.mxu1 %vm7117_vm2, %v7115_v52 }
0x2c50   :  { %v4242_v9 = vpop.f32.mrb[34].mxu0 }
0x2c51   :  { %v4247_v4 = vrot.slane %v4242_v9, 2  ;;  %v6343_v51 = vpop.f32.mrb[35].mxu0 }
0x2c53   :  { %v4249_v46 = vadd.f32 %v4247_v4, %v4170_v8 }
0x2c55   :  { %v5669_v55 = vmul.f32 -1.442695, %v4249_v46 }
0x2c57   :  { %7042 = vpow2.f32 %v5669_v55  ;;  %v4355_v3 = vpop.f32.mrb[42].mxu1 }
0x2c58   :  { %v4359_v1 = vadd.f32 %v4355_v3, %v4283_v45  ;;  %v6354_v54 = vpop.f32.mrb[43].mxu1 }
0x2c5a   :  { %v5671_v37 = vmul.f32 -1.442695, %v4359_v1 }
0x2c5c   :  { %7044 = vpow2.f32 %v5671_v37 }
0x2c5d   :  { %7046 = vtanh.f32 %v4249_v46 }
0x2c61   :  { %v7043_v44 = vpop.eup %7042 }
0x2c62   :  { %v4254_v13 = vadd.f32 1.0, %v7043_v44 }
0x2c64   :  { %7048 = vrcp.f32 %v4254_v13 }
0x2c65   :  { %7050 = vtanh.f32 %v4359_v1 }
0x2c66   :  { %v7045_v14 = vpop.eup %7044 }
0x2c67   :  { %v4364_v6 = vadd.f32 1.0, %v7045_v14  ;;  %v7047_v15 = vpop.eup %7046 }
0x2c69   :  { %7052 = vrcp.f32 %v4364_v6 }
0x2c6e   :  { %v7049_v24 = vpop.eup %7048 }
0x2c6f   :  { %v4257_v16 = vsel %vm7646_vm7, %v7047_v15, %v7049_v24  ;;  %v7051_v62 = vpop.eup %7050 }
0x2c70   :  { %4263 = vrot.lane.b32.xlu0 %v4257_v16, %s7119_s10  ;;  %v4261_v29 = vmul.f32 %v4259_v28, %v4257_v16 }
0x2c73   :  { %v7053_v11 = vpop.eup %7052 }
0x2c74   :  { %v4367_v21 = vsel %vm7646_vm7, %v7051_v62, %v7053_v11 }
0x2c75   :  { %4373 = vrot.lane.b32.xlu1 %v4367_v21, %s7119_s10  ;;  %v4371_v61 = vmul.f32 %v4369_v34, %v4367_v21 }
0x2ce2   :  { %v4264_v20 = vpop.permute.xlu0 %4263 }
0x2ce3   :  { %v4266_v31 = vmul.f32 %v4264_v20, %v4257_v16 }
0x2ce5   :  { %4268 = vrot.lane.b32.xlu0 %v4266_v31, %s7118_s20 }
0x2ce7   :  { %v4374_v22 = vpop.permute.xlu1 %4373 }
0x2ce8   :  { %v4376_v23 = vmul.f32 %v4374_v22, %v4367_v21 }
0x2cea   :  { %4378 = vrot.lane.b32.xlu1 %v4376_v23, %s7118_s20 }
0x2d57   :  { %v4269_v32 = vpop.permute.xlu0 %4268 }
0x2d58   :  { %v4271_v12 = vadd.f32 %v4269_v32, %v4261_v29 }
0x2d5a   :  { %7054 = vtanh.f32 %v4271_v12 }
0x2d5c   :  { %v4379_v42 = vpop.permute.xlu1 %4378 }
0x2d5d   :  { %v4381_v59 = vadd.f32 %v4379_v42, %v4371_v61 }
0x2d5f   :  { %7056 = vtanh.f32 %v4381_v59 }
0x2d64   :  { %v7055_v35 = vpop.eup %7054 }
0x2d65   :  { %4274 = vrot.lane.b32.xlu0 %v7055_v35, %s7119_s10 }
0x2d69   :  { %v7057_v36 = vpop.eup %7056  ;;  %3940 = vrot.lane.b32.xlu0 %v8310_v57, %s7118_s20 }
0x2d6a   :  { %4384 = vrot.lane.b32.xlu1 %v7057_v36, %s7119_s10 }
0x2d6d   :  { %3048 = vrot.lane.b32.xlu0 %v8154_v33, %s7118_s20 }
0x2d6e   :  { %3717 = vrot.lane.b32.xlu1 %v8269_v17, %s7118_s20 }
0x2d72   :  { %4166 = vrot.lane.b32.xlu1 %v4164_v63, %s7118_s20 }
0x2d76   :  { %2825 = vrot.lane.b32.xlu1 %v8113_v43, %s7118_s20 }
0x2d7a   :  { %3274 = vrot.lane.b32.xlu1 %v8194_v27, %s7118_s20 }
0x2d7e   :  { %3161 = vrot.lane.b32.xlu1 %v8190_v18, %s7118_s20 }
0x2d82   :  { %3827 = vrot.lane.b32.xlu1 %v8306_v2, %s7118_s20 }
0x2dd7   :  { %v4275_v57 = vpop.permute.xlu0 %4274 }
0x2dd8   :  { %v4277_v60 = vmul.f32 %v4275_v57, %v4257_v16 }
0x2dda   :  { %4279 = vrot.lane.b32.xlu1 %v4277_v60, %s7118_s20 }
0x2ddb   :  { %v3941_v33 = vpop.permute.xlu0 %3940 }
0x2ddc   :  { %3943 = vst.msk [vmem:[#allocation4] sm:$0x30] %vm1064_vm10, %v3941_v33  ;;  %v4385_v17 = vpop.permute.xlu1 %4384 }
0x2ddd   :  { %v4387_v38 = vmul.f32 %v4385_v17, %v4367_v21 }
0x2ddf   :  { %v3049_v7 = vpop.permute.xlu0 %3048  ;;  %4389 = vrot.lane.b32.xlu0 %v4387_v38, %s7118_s20 }
0x2de0   :  { %3051 = vst.msk [vmem:[#allocation4 + $0x8] sm:$0x30] %vm1064_vm10, %v3049_v7  ;;  %v3718_v43 = vpop.permute.xlu1 %3717 }
0x2de1   :  { %3720 = vst.msk [vmem:[#allocation4] sm:$0xc0] %vm839_vm9, %v3718_v43 }
0x2de3   :  { %2935 = vrot.lane.b32.xlu0 %v8150_v30, %s7118_s20 }
0x2de4   :  { %v4167_v18 = vpop.permute.xlu1 %4166 }
0x2de5   :  { %4169 = vst.msk [vmem:[#allocation4] sm:$0xc] %vm950_vm11, %v4167_v18 }
0x2de7   :  { %3387 = vrot.lane.b32.xlu0 %v8230_v39, %s7118_s20 }
0x2de8   :  { %v2826_v27 = vpop.permute.xlu1 %2825 }
0x2de9   :  { %2828 = vst.msk [vmem:[#allocation4 + $0x8] sm:$0xc0] %vm839_vm9, %v2826_v27 }
0x2deb   :  { %4053 = vrot.lane.b32.xlu0 %v8340_v50, %s7118_s20 }
0x2dec   :  { %v3275_v2 = vpop.permute.xlu1 %3274 }
0x2ded   :  { %3277 = vst.msk [vmem:[#allocation4 + $0x8] sm:$0xc] %vm950_vm11, %v3275_v2 }
0x2df0   :  { %v3162_v41 = vpop.permute.xlu1 %3161 }
0x2df1   :  { %3164 = vst.msk [vmem:[#allocation3] sm:$0x30] %vm1064_vm10, %v3162_v41 }
0x2df4   :  { %v3828_v5 = vpop.permute.xlu1 %3827  ;;  %v4432_v39 = vld [vmem:[#allocation4 + $0x8] sm:$0xff] }
0x2df5   :  { %3830 = vst.msk [vmem:[#allocation3 + $0x8] sm:$0xc] %vm950_vm11, %v3828_v5  ;;  %v4452_v47 = vcombine.high %v4432_v39, %v4432_v39  ;;  %v4459_v50 = vrot.slane %v4432_v39, %v7352_v10 }
0x2df7   :  { %v8399_v0 = vrot.slane %v4452_v47, %v7352_v10  ;;  %v4467_v19 = vcombine.high %v4459_v50, %v4459_v50  ;;  %v4497_v46 = vrot.slane %v4459_v50, %v7635_v25  ;;  %v5041_v14 = vrot.slane %v4459_v50, %v7638_v26 }
0x2df9   :  { %v8411_v37 = vcombine.high %v8399_v0, %v8399_v0  ;;  %v4501_v44 = vrot.slane %v4467_v19, %v7635_v25  ;;  %v4505_v62 = vrot.slane %v8399_v0, %v7635_v25  ;;  %v5045_v20 = vrot.slane %v4467_v19, %v7638_v26 }
0x2dfa   :  { %v5049_v34 = vrot.slane %v8399_v0, %v7638_v26 }
0x2dfb   :  { %v4509_v32 = vrot.slane %v8411_v37, %v7635_v25  ;;  %v5053_v36 = vrot.slane %v8411_v37, %v7638_v26 }
0x2e4c   :  { %v4280_v30 = vpop.permute.xlu1 %4279 }
0x2e4d   :  { %4282 = vst.msk [vmem:[#allocation3 + $0x8] sm:$0xc0] %vm839_vm9, %v4280_v30 }
0x2e51   :  { %v4390_v40 = vpop.permute.xlu0 %4389 }
0x2e52   :  { %4392 = vst.msk [vmem:[#allocation4] sm:$0x3] %vm729_vm8, %v4390_v40 }
0x2e55   :  { %v2936_v48 = vpop.permute.xlu0 %2935 }
0x2e56   :  { %2938 = vst.msk [vmem:[#allocation3] sm:$0xc] %vm950_vm11, %v2936_v48 }
0x2e59   :  { %v3388_v49 = vpop.permute.xlu0 %3387  ;;  %v4431_v53 = vld [vmem:[#allocation4] sm:$0xff] }
0x2e5a   :  { %3390 = vst.msk [vmem:[#allocation3] sm:$0xc0] %vm839_vm9, %v3388_v49  ;;  %v4435_v63 = vcombine.high %v4431_v53, %v4431_v53  ;;  %v4442_v56 = vrot.slane %v4431_v53, %v7352_v10 }
0x2e5c   :  { %v4449_v9 = vrot.slane %v4435_v63, %v7352_v10  ;;  %v4450_v4 = vcombine.high %v4442_v56, %v4442_v56  ;;  %v4481_v8 = vrot.slane %v4442_v56, %v7635_v25  ;;  %v5025_v55 = vrot.slane %v4442_v56, %v7638_v26 }
0x2e5d   :  { %v4054_v51 = vpop.permute.xlu0 %4053 }
0x2e5e   :  { %4056 = vst.msk [vmem:[#allocation3 + $0x8] sm:$0x30] %vm1064_vm10, %v4054_v51  ;;  %v4451_v45 = vcombine.high %v4449_v9, %v4449_v9  ;;  %v4485_v3 = vrot.slane %v4450_v4, %v7635_v25  ;;  %v4489_v1 = vrot.slane %v4449_v9, %v7635_v25  ;;  %v5029_v54 = vrot.slane %v4450_v4, %v7638_v26 }
0x2e5f   :  { %v5033_v13 = vrot.slane %v4449_v9, %v7638_v26 }
0x2e60   :  { %v4493_v6 = vrot.slane %v4451_v45, %v7635_v25  ;;  %v4511_v15 = vsel %vm4510_vm12, %v4485_v3, %v4481_v8  ;;  %v5037_v24 = vrot.slane %v4451_v45, %v7638_v26  ;;  %v5054_v16 = vsel %vm4510_vm12, %v5029_v54, %v5025_v55 }
0x2e61   :  { %v4513_v11 = vsel %vm4512_vm13, %v4489_v1, %v4511_v15  ;;  %v4393_v21 = vld [vmem:[#allocation3] sm:$0xff]  ;;  %v5055_v31 = vsel %vm4512_vm13, %v5033_v13, %v5054_v16 }
0x2e62   :  { %v4515_v22 = vsel %vm4514_vm14, %v4493_v6, %v4513_v11  ;;  %v4397_v23 = vcombine.high %v4393_v21, %v4393_v21  ;;  %v4404_v28 = vrot.slane %v4393_v21, %v7352_v10  ;;  %v5056_v29 = vsel %vm4514_vm14, %v5037_v24, %v5055_v31 }
0x2e63   :  { %v4517_v12 = vsel %vm4516_vm15, %v4497_v46, %v4515_v22  ;;  %v5057_v61 = vsel %vm4516_vm15, %v5041_v14, %v5056_v29 }
0x2e64   :  { %v4519_v42 = vsel %vm4518_vm0, %v4501_v44, %v4517_v12  ;;  %v4411_v59 = vrot.slane %v4397_v23, %v7352_v10  ;;  %v4412_v35 = vcombine.high %v4404_v28, %v4404_v28  ;;  %v4599_v33 = vrot.slane %v4404_v28, %v7635_v25  ;;  %v4473_v23 = vld [vmem:[%s8619_s6 + $0x20] sm:$0xff]  ;;  %v4476_v12 = vld [vmem:[%s8619_s6 + $0x38] sm:$0xff] }
0x2e65   :  { %v4521_v57 = vsel %vm4520_vm1, %v4505_v62, %v4519_v42  ;;  %v4394_v60 = vld [vmem:[#allocation3 + $0x8] sm:$0xff]  ;;  %v5136_v17 = vrot.slane %v4404_v28, %v7638_v26  ;;  %v5058_v38 = vsel %vm4518_vm0, %v5045_v20, %v5057_v61 }
0x2e66   :  { %v8443_v7 = vsel %vm4522_vm3, %v4509_v32, %v4521_v57  ;;  %v4413_v43 = vcombine.high %v4411_v59, %v4411_v59  ;;  %v4414_v18 = vcombine.high %v4394_v60, %v4394_v60  ;;  %v4421_v27 = vrot.slane %v4394_v60, %v7352_v10  ;;  %v4474_v28 = vld [vmem:[%s8619_s6 + $0x28] sm:$0xff]  ;;  %v4475_v32 = vld [vmem:[%s8619_s6 + $0x30] sm:$0xff] }
0x2e67   :  { %6356 = vmatpush3.xpose.msk.msra.mxu0 %vm622_vm4, %v8443_v7  ;;  %v4603_v2 = vrot.slane %v4412_v35, %v7635_v25  ;;  %v4607_v41 = vrot.slane %v4411_v59, %v7635_v25  ;;  %v5140_v5 = vrot.slane %v4412_v35, %v7638_v26  ;;  %v5144_v30 = vrot.slane %v4411_v59, %v7638_v26 }
0x2e68   :  { %6360 = vmatprep.subr.mxu0 %v7115_v52  ;;  %v4428_v40 = vrot.slane %v4414_v18, %v7352_v10  ;;  %v4429_v39 = vcombine.high %v4421_v27, %v4421_v27  ;;  %v4611_v48 = vrot.slane %v4413_v43, %v7635_v25  ;;  %v4615_v47 = vrot.slane %v4421_v27, %v7635_v25  ;;  %v4470_v18 = vld [vmem:[%s8619_s6 + $0x8] sm:$0xff] }
0x2e69   :  { %v4628_v50 = vsel %vm4510_vm12, %v4603_v2, %v4599_v33  ;;  %v5148_v49 = vrot.slane %v4413_v43, %v7638_v26  ;;  %v5152_v53 = vrot.slane %v4421_v27, %v7638_v26  ;;  %v5165_v63 = vsel %vm4510_vm12, %v5140_v5, %v5136_v17  ;;  %v4469_v43 = vld [vmem:[%s8619_s6] sm:$0xff]  ;;  %v4471_v2 = vld [vmem:[%s8619_s6 + $0x10] sm:$0xff] }
0x2e6a   :  { %6358 = vmatmul.mubr.msk.f32.vlgmr.msra.gmra.mrb[36].mxu0 %vm622_vm4, %v8443_v7  ;;  %v4430_v56 = vcombine.high %v4428_v40, %v4428_v40  ;;  %v4619_v0 = vrot.slane %v4429_v39, %v7635_v25  ;;  %v4623_v10 = vrot.slane %v4428_v40, %v7635_v25  ;;  %v4629_v19 = vsel %vm4512_vm13, %v4607_v41, %v4628_v50  ;;  %v4472_v41 = vld [vmem:[%s8619_s6 + $0x18] sm:$0xff]  ;;  %v8566_v50 = vld [vmem:[%s8620_s7] sm:$0x1]  ;;  %s7120_s7 = smov [#allocation7]  }
0x2e6b   :  { %v4630_v9 = vsel %vm4514_vm14, %v4611_v48, %v4629_v19  ;;  %6362 = vmatprep.mubr.msk.f32.mxu0 %vm7117_vm2, %v7115_v52  ;;  %v5156_v4 = vrot.slane %v4429_v39, %v7638_v26  ;;  %v5160_v51 = vrot.slane %v4428_v40, %v7638_v26  ;;  %v5166_v8 = vsel %vm4512_vm13, %v5144_v30, %v5165_v63  ;;  %s5573_s16 = sshll.u32 %s7120_s7, 4  ;;  %s5574_s16 = int_to_ptr.vmem [resolvable:$true] %s5573_s16 }
0x2e6c   :  { %v4627_v46 = vrot.slane %v4430_v56, %v7635_v25  ;;  %v4631_v55 = vsel %vm4516_vm15, %v4615_v47, %v4630_v9  ;;  %v5164_v45 = vrot.slane %v4430_v56, %v7638_v26  ;;  %v5167_v3 = vsel %vm4514_vm14, %v5148_v49, %v5166_v8  ;;  %s7066_s17 = scalar_lea.vmem %s5574_s16, 256  ;;  %p7071_p1 = scmp.lt.s32.totalorder %s5574_s16, %s5574_s16 }
0x2e6d   :  { %v4632_v1 = vsel %vm4518_vm0, %v4619_v0, %v4631_v55  ;;  %v5168_v54 = vsel %vm4516_vm15, %v5152_v53, %v5167_v3  ;;  %v5059_v37 = vsel %vm4520_vm1, %v5049_v34, %v5058_v38  ;;  %v6756_v29 = vpack.c.bf16 %v4474_v28, %v4473_v23  ;;  %p7067_p0 = scmp.ne.s32.totalorder %s5574_s16, %s7066_s17  ;;  %p7072_p2 = scmp.lt.s32.totalorder %s7066_s17, %s7066_s17 }
0x2e6e   :  { %v4633_v44 = vsel %vm4520_vm1, %v4623_v10, %v4632_v1  ;;  %v5169_v13 = vsel %vm4518_vm0, %v5156_v4, %v5168_v54  ;;  %v8481_v14 = vsel %vm4522_vm3, %v5053_v36, %v5059_v37  ;;  %v6759_v34 = vpack.c.bf16 %v4476_v12, %v4475_v32 }
0x2e6f   :  { %v4634_v25 = vsel %vm4522_vm3, %v4627_v46, %v4633_v44  ;;  %v5170_v6 = vsel %vm4520_vm1, %v5160_v51, %v5169_v13  ;;  %v8522_v27 = vpack.c.bf16 %v4470_v18, %v4469_v43  ;;  %p7073_p3 = por %p7072_p2, %p7071_p1 }
0x2e70   :  { %6361 = vmatpush3.xpose.msk.msra.mxu0 %vm622_vm4, %v4634_v25  ;;  %6366 = vmatpush3.msra.mxu1 %v4634_v25  ;;  %v8487_v26 = vsel %vm4522_vm3, %v5164_v45, %v5170_v6 }
0x2e71   :  { %6370 = vmatprep.subr.mxu1 %v7115_v52  ;;  %6755 = vmatprep.subr.bf16.mxu0 %v7116_v58  ;;  %p7074_p4 = pnand %p7073_p3, %p7067_p0 }
0x2e73   :  { %6363 = vmatmul.mubr.msk.f32.vlgmr.msra.gmra.mrb[36].mxu0 %vm622_vm4, %v4634_v25 }
0x2e74   :  { %6383 = vmatprep.mubr.msk.f32.mxu0 %vm7117_vm2, %v7115_v52  ;;  %6757 = vmatpush3.bf16.msra.mxu0 %v6756_v29 }
0x2e75   :  { %6758 = vmatprep.subr.bf16.mxu0 %v7116_v58 }
0x2e78   :  { %6760 = vmatpush3.bf16.msra.mxu0 %v6759_v34 }
0x2e79   :  { %6397 = vmatprep.subr.mxu0 %v7115_v52 }
0x2f46   :  { %v4703_v15 = vpop.f32.mrb[36].mxu0 }
0x2f47   :  { %v4707_v24 = vmul.f32 0.125, %v4703_v15  ;;  %v6364_v16 = vpop.f32.mrb[37].mxu0 }
0x2f49   :  { %v4709_v62 = vsel %vm4708_vm5, %v4707_v24, -inf }
0x2f4a   :  { %4710 = vmax.xlane.f32.xlu0 %v4709_v62 }
0x2fd7   :  { %v4711_v11 = vpop.xlane.xlu0 %4710 }
0x2fd8   :  { %v4712_v21 = vsub.f32 %v4707_v24, %v4711_v11 }
0x2fda   :  { %v4713_v20 = vmul.f32 1.442695, %v4712_v21 }
0x2fdc   :  { %7058 = vpow2.f32 %v4713_v20 }
0x2fe6   :  { %v7059_v31 = vpop.eup %7058 }
0x2fe7   :  { %v4715_v22 = vsel %vm4708_vm5, %v7059_v31, 0.0 }
0x2fe8   :  { %4716 = vadd.xlane.f32.xlu1 %v4715_v22 }
0x3075   :  { %v4717_v61 = vpop.xlane.xlu1 %4716 }
0x3076   :  { %7060 = vrcp.f32 %v4717_v61 }
0x3080   :  { %v7061_v42 = vpop.eup %7060 }
0x3081   :  { %v4719_v59 = vmul.f32 %v7061_v42, %v7059_v31 }
0x3083   :  { %v4721_v35 = vsel %vm4708_vm5, %v4719_v59, 0.0  ;;  %4720 = vst.msk [vmem:[#allocation7] sm:$0xff] %vm4708_vm5, %v4719_v59 }
0x3084   :  { %v4722_v36 = vrot.slane %v4721_v35, 4 }
0x3086   :  { %v4723_v57 = vadd.f32 %v4722_v36, %v4721_v35 }
0x3088   :  { %v4724_v60 = vrot.slane %v4723_v57, 2 }
0x308a   :  { %v4725_v33 = vadd.f32 %v4724_v60, %v4723_v57 }
0x308c   :  { %v4726_v17 = vrot.slane %v4725_v33, 1 }
0x308e   :  { %v4727_v38 = vadd.f32 %v4726_v17, %v4725_v33 }
0x3090   :  { %6368 = vmatmul.mubr.msk.f32.vlgmr.msra.gmra.mrb[44].mxu1 %vm4708_vm5, %v4727_v38 }
0x3091   :  { %6371 = vmatpush3.msra.mxu1 %v8443_v7  ;;  %6372 = vmatprep.mubr.msk.f32.mxu1 %vm7117_vm2, %v7115_v52  ;;  %v8533_v7 = vpack.c.bf16 %v4472_v41, %v4471_v2 }
0x3092   :  { %6761 = vmatprep.subr.bf16.mxu1 %v7116_v58 }
0x3094   :  { %6373 = vmatmul.mubr.msk.f32.vlgmr.msra.gmra.mrb[46].mxu1 %vm4708_vm5, %v4727_v38 }
0x3095   :  { %6763 = vmatpush3.bf16.msra.mxu1 %v8522_v27  ;;  %6394 = vmatprep.mubr.msk.f32.mxu1 %vm7117_vm2, %v7115_v52 }
0x3096   :  { %6764 = vmatprep.subr.bf16.mxu1 %v7116_v58 }
0x3099   :  { %6766 = vmatpush3.bf16.msra.mxu1 %v8533_v7 }
0x309a   :  { %6407 = vmatprep.subr.mxu1 %v7115_v52 }
0x3163   :  { %v4798_v5 = vpop.f32.mrb[44].mxu1 }
0x3164   :  { %v6369_v30 = vpop.f32.mrb[45].mxu1  ;;  %6395 = vmatmul.mubr.msk.f32.vlgmr.msra.gmra.mrb[48].mxu1 %vm622_vm4, %v4798_v5 }
0x3165   :  { %6408 = vmatpush3.msra.mxu1 %v8487_v26  ;;  %6409 = vmatprep.mubr.msk.f32.mxu1 %vm7117_vm2, %v7115_v52 }
0x3166   :  { %6412 = vmatprep.subr.mxu1 %v7115_v52 }
0x3167   :  { %v4869_v40 = vpop.f32.mrb[46].mxu1 }
0x3168   :  { %v6374_v39 = vpop.f32.mrb[47].mxu1  ;;  %6384 = vmatmul.mubr.msk.f32.vlgmr.msra.gmra.mrb[38].mxu0 %vm622_vm4, %v4869_v40 }
0x3169   :  { %6398 = vmatpush3.xpose.msk.msra.mxu0 %vm622_vm4, %v8481_v14  ;;  %6399 = vmatprep.mubr.msk.f32.mxu0 %vm7117_vm2, %v7115_v52 }
0x316a   :  { %6402 = vmatprep.subr.mxu0 %v7115_v52 }
0x316c   :  { %6400 = vmatmul.mubr.msk.f32.vlgmr.msra.gmra.mrb[40].mxu0 %vm622_vm4, %v8481_v14 }
0x316d   :  { %6403 = vmatpush3.xpose.msk.msra.mxu0 %vm622_vm4, %v8487_v26  ;;  %6404 = vmatprep.mubr.msk.f32.mxu0 %vm7117_vm2, %v7115_v52 }
0x316e   :  { %6767 = vmatprep.subr.bf16.mxu0 %v7116_v58 }
0x3174   :  { %6405 = vmatmul.mubr.msk.f32.vlgmr.msra.gmra.mrb[40].mxu0 %vm622_vm4, %v8487_v26 }
0x3175   :  { %6769 = vmatpush3.bf16.msra.mxu0 %v6756_v29  ;;  %6425 = vmatprep.mubr.msk.f32.mxu0 %vm7117_vm2, %v7115_v52 }
0x3176   :  { %6770 = vmatprep.subr.bf16.mxu0 %v7116_v58 }
0x3179   :  { %6772 = vmatpush3.bf16.msra.mxu0 %v6759_v34 }
0x3237   :  { %v5015_v48 = vpop.f32.mrb[48].mxu1 }
0x3238   :  { %v6396_v47 = vpop.f32.mrb[49].mxu1 }
0x323b   :  { %v4942_v49 = vpop.f32.mrb[38].mxu0 }
0x323c   :  { %v5016_v53 = vadd.f32 %v5015_v48, %v4942_v49  ;;  %v6385_v63 = vpop.f32.mrb[39].mxu0 }
0x323e   :  { %v5019_v56 = vadd.f32 %v5016_v53, %v8566_v50 }
0x3240   :  { %5021 = vst.msk [vmem:[#allocation5] sm:$0x1] %vm5020_vm6, %v5019_v56 }
0x3247   :  { %v5240_v0 = vpop.f32.mrb[40].mxu0 }
0x3248   :  { %v5244_v10 = vmul.f32 0.125, %v5240_v0  ;;  %v6406_v19 = vpop.f32.mrb[41].mxu0 }
0x324a   :  { %v5245_v9 = vsel %vm4708_vm5, %v5244_v10, -inf }
0x324b   :  { %5246 = vmax.xlane.f32.xlu0 %v5245_v9 }
0x32d8   :  { %v5247_v4 = vpop.xlane.xlu0 %5246 }
0x32d9   :  { %v5248_v51 = vsub.f32 %v5244_v10, %v5247_v4 }
0x32db   :  { %v5249_v8 = vmul.f32 1.442695, %v5248_v51 }
0x32dd   :  { %7062 = vpow2.f32 %v5249_v8 }
0x32e7   :  { %v7063_v46 = vpop.eup %7062 }
0x32e8   :  { %v5251_v55 = vsel %vm4708_vm5, %v7063_v46, 0.0 }
0x32e9   :  { %5252 = vadd.xlane.f32.xlu0 %v5251_v55 }
0x3376   :  { %v5253_v45 = vpop.xlane.xlu0 %5252 }
0x3377   :  { %7064 = vrcp.f32 %v5253_v45 }
0x3381   :  { %v7065_v3 = vpop.eup %7064 }
0x3382   :  { %v5255_v1 = vmul.f32 %v7065_v3, %v7063_v46 }
0x3384   :  { %v5258_v54 = vsel %vm4708_vm5, %v5255_v1, 0.0  ;;  %5257 = vst.msk [vmem:[#allocation7 + $0x8] sm:$0xff] %vm4708_vm5, %v5255_v1 }
0x3385   :  { %v5259_v37 = vrot.slane %v5258_v54, 4 }
0x3387   :  { %v5260_v44 = vadd.f32 %v5259_v37, %v5258_v54 }
0x3389   :  { %v5261_v13 = vrot.slane %v5260_v44, 2 }
0x338b   :  { %v5262_v25 = vadd.f32 %v5261_v13, %v5260_v44 }
0x338d   :  { %v5263_v6 = vrot.slane %v5262_v25, 1 }
0x338f   :  { %v5264_v26 = vadd.f32 %v5263_v6, %v5262_v25 }
0x3391   :  { %6410 = vmatmul.mubr.msk.f32.vlgmr.msra.gmra.mrb[50].mxu1 %vm4708_vm5, %v5264_v26 }
0x3392   :  { %6413 = vmatpush3.msra.mxu1 %v8481_v14  ;;  %6414 = vmatprep.mubr.msk.f32.mxu1 %vm7117_vm2, %v7115_v52 }
0x3393   :  { %6773 = vmatprep.subr.bf16.mxu1 %v7116_v58 }
0x3395   :  { %6415 = vmatmul.mubr.msk.f32.vlgmr.msra.gmra.mrb[52].mxu1 %vm4708_vm5, %v5264_v26 }
0x3396   :  { %6775 = vmatpush3.bf16.msra.mxu1 %v8522_v27  ;;  %6436 = vmatprep.mubr.msk.f32.mxu1 %vm7117_vm2, %v7115_v52 }
0x3397   :  { %6776 = vmatprep.subr.bf16.mxu1 %v7116_v58 }
0x339a   :  { %6778 = vmatpush3.bf16.msra.mxu1 %v8533_v7 }
0x3464   :  { %v5335_v15 = vpop.f32.mrb[50].mxu1 }
0x3465   :  { %v6411_v24 = vpop.f32.mrb[51].mxu1  ;;  %6437 = vmatmul.mubr.msk.f32.vlgmr.msra.gmra.mrb[54].mxu1 %vm622_vm4, %v5335_v15 }
0x3468   :  { %v5406_v14 = vpop.f32.mrb[52].mxu1 }
0x3469   :  { %v6416_v16 = vpop.f32.mrb[53].mxu1  ;;  %6426 = vmatmul.mubr.msk.f32.vlgmr.msra.gmra.mrb[42].mxu0 %vm622_vm4, %v5406_v14 }
0x346a   :  { %7077 = shalt.err (!%p7074_p4)
}
0x346b   :  { %s7078_s9 = scalar_lea.hbm %s8628_s15, 256 }
0x346c   :  { %p7079_p5 = scmp.ne.s32.totalorder %s8628_s15, %s7078_s9  ;;  %p7082_p6 = scmp.lt.u32.totalorder %s7078_s9, %s8628_s15 }
0x346e   :  { %p7084_p7 = pnand %p7082_p6, %p7079_p5 }
0x3470   :  { %7087 = shalt.err (!%p7084_p7)
}
0x3471   :  { %s7121_s24 = smov 128   ;;  %s7122_s13 = smov 8  }
0x3472   :  { %5579 = dma.vmem_to_hbm [thread:$0]  %s5574_s16, 256, %s8628_s15, [#allocation8], %s7121_s24, %s7121_s24, %s7122_s13  }
0x3473   :  { %s7123_s25 = smov [#allocation5]  }
0x3474   :  { %s5564_s8 = sshll.u32 %s7123_s25, 4  ;;  %s5565_s8 = int_to_ptr.vmem [resolvable:$true] %s5564_s8 }
0x3475   :  { %s7088_s26 = scalar_lea.vmem %s5565_s8, 32  ;;  %p7093_p9 = scmp.lt.s32.totalorder %s5565_s8, %s5565_s8 }
0x3476   :  { %p7089_p8 = scmp.ne.s32.totalorder %s5565_s8, %s7088_s26  ;;  %p7094_p10 = scmp.lt.s32.totalorder %s7088_s26, %s7088_s26 }
0x3478   :  { %p7095_p11 = por %p7094_p10, %p7093_p9 }
0x347a   :  { %p7096_p12 = pnand %p7095_p11, %p7089_p8 }
0x3538   :  { %v5552_v52 = vpop.f32.mrb[54].mxu1 }
0x3539   :  { %v6438_v58 = vpop.f32.mrb[55].mxu1 }
0x353c   :  { %v5479_v62 = vpop.f32.mrb[42].mxu0 }
0x353d   :  { %v5553_v11 = vadd.f32 %v5552_v52, %v5479_v62  ;;  %v6427_v21 = vpop.f32.mrb[43].mxu0 }
0x353f   :  { %v5556_v20 = vadd.f32 %v5553_v11, %v8566_v50 }
0x3541   :  { %5557 = vst.msk [vmem:[#allocation5 + $0x1] sm:$0x1] %vm5020_vm6, %v5556_v20 }
0x3542   :  { %7099 = shalt.err (!%p7096_p12)
}
0x3543   :  { %s7100_s1 = scalar_lea.hbm %s8627_s14, 32 }
0x3544   :  { %p7101_p13 = scmp.ne.s32.totalorder %s8627_s14, %s7100_s1  ;;  %p7104_p0 = scmp.lt.u32.totalorder %s7100_s1, %s8627_s14 }
0x3546   :  { %p7106_p1 = pnand %p7104_p0, %p7101_p13 }
0x3548   :  { %7109 = shalt.err (!%p7106_p1)
}
0x3549   :  { %5567 = dma.vmem_to_hbm [thread:$0]  %s5565_s8, 32, %s8627_s14, [#allocation6]  }
0x354a   :  { %7110 = dma.done.wait [#allocation6], 32  }
0x354b   :  { %7111 = vsyncadd [#allocation6], 4294967264 }
0x354c   :  { %7112 = dma.done.wait [#allocation8], 256  }
0x354d   :  { %7113 = vsyncadd [#allocation8], 4294967040 }
0x354e   :  { %5586 = vsyncpa [#allocation6], 1 }
0x354f   :  { %5587 = vsyncpa [#allocation8], 1 }

</bundles_post_ra>
